<compile_context>
chip_gen: v7x
topology: tpu7x:2x2x1
jax: 0.10.0
libtpu: 0.0.40
codegen_flags: <defaults>
</compile_context>

<pallas_src>
import functools

import jax
import jax.numpy as jnp
from jax import lax
from jax.experimental import pallas as pl
from jax.experimental.pallas import tpu as pltpu


def _resnet_block_kernel(x_ref, w1_ref, w2_ref, o_ref, *, width, eps=1e-5):
    # x_ref: (NB, C, S) VMEM, S = H*W flattened row-major (s = h*W + w).
    # w{1,2}_ref: (9, C_out, C_in) VMEM, tap index t = kh*3 + kw.
    # o_ref: (NB, C, S) VMEM.
    nb, C, S = x_ref.shape
    Wd = width
    cdt = w1_ref.dtype  # matmul operand dtype (bf16 or f32); accumulation is f32.

    # Lane-only boundary masks, shape (1, S); broadcast inside jnp.where.
    col = lax.broadcasted_iota(jnp.int32, (1, S), 1)
    wmod = col % Wd
    h_first = col < Wd           # h == 0
    h_last = col >= S - Wd       # h == H - 1
    w_first = wmod == 0          # w == 0
    w_last = wmod == Wd - 1      # w == W - 1

    def conv3x3_reflect(z, w_ref):
        # Conv2d(k=3, padding=0, bias=False)(ReflectionPad2d(1)(z)) on the
        # flattened (C, S) layout. Tap (kh, kw) reads source offset
        # (dh, dw) = (kh-1, kw-1) with reflected indices at the borders.
        # Reflection is separable: vertical shift+reflect, then horizontal.
        nxt_row = pltpu.roll(z, S - Wd, 1)   # value at s + W (row below)
        prv_row = pltpu.roll(z, Wd, 1)       # value at s - W (row above)
        v_taps = (
            jnp.where(h_first, nxt_row, prv_row),   # kh = 0 (dh = -1)
            z,                                      # kh = 1 (dh =  0)
            jnp.where(h_last, prv_row, nxt_row),    # kh = 2 (dh = +1)
        )
        acc = jnp.zeros((C, S), jnp.float32)
        for kh, v in enumerate(v_taps):
            nxt = pltpu.roll(v, S - 1, 1)    # value at s + 1
            prv = pltpu.roll(v, 1, 1)        # value at s - 1
            taps = (
                jnp.where(w_first, nxt, prv),   # kw = 0 (dw = -1)
                v,                              # kw = 1 (dw =  0)
                jnp.where(w_last, prv, nxt),    # kw = 2 (dw = +1)
            )
            for kw, t in enumerate(taps):
                w_t = w_ref[kh * 3 + kw]        # (C_out, C_in) contiguous slab
                # One MXU matmul per tap; f32 accumulation.
                acc = acc + jnp.dot(
                    w_t, t.astype(cdt),
                    preferred_element_type=jnp.float32,
                    precision=lax.Precision.HIGHEST)
        return acc

    def instance_norm(z):
        # nn.InstanceNorm2d default: affine=False, biased variance, eps=1e-5.
        m = jnp.mean(z, axis=1, keepdims=True)
        d = z - m
        v = jnp.mean(d * d, axis=1, keepdims=True)
        return d * lax.rsqrt(v + eps)   # rsqrt -> EUP (free slot)

    # Short static loop over the samples in this block (nb is 1 or N, tiny).
    for n in range(nb):
        x = x_ref[n].astype(jnp.float32)
        y = conv3x3_reflect(x, w1_ref)
        y = jnp.maximum(instance_norm(y), 0.0)
        y = conv3x3_reflect(y, w2_ref)
        y = instance_norm(y)
        o_ref[n] = (x + y).astype(o_ref.dtype)   # lane-dense (C, 256) store


def _tensorcores_per_chip():
    # Megacore detection (perf-only: affects how the batch maps to grid steps).
    try:
        kind = jax.devices()[0].device_kind.lower()
    except Exception:
        return 1
    if any(tag in kind for tag in ("v7", "v5p", "v4")):
        return 2
    return 1


def resnet_block(x, w1, w2, *, compute_dtype=jnp.bfloat16):
    """x: (N, C, H, W); w1, w2: (C, C, 3, 3) PyTorch OIHW conv weights."""
    N, C, H, W = x.shape
    S = H * W
    x_flat = x.reshape(N, C, S)

    # (O, I, KH, KW) -> (KH, KW, O, I) -> (9, O, I): one contiguous
    # (C_out, C_in) MXU operand per tap, cast once in the wrapper.
    def prep(w):
        return jnp.transpose(w, (2, 3, 0, 1)).reshape(9, C, C).astype(compute_dtype)

    w1_t = prep(w1)
    w2_t = prep(w2)

    # Single-TC chips: fold the whole batch into one grid step (saves N-1
    # pipeline-step overheads at this tiny per-step FLOP count).
    # Megacore chips: keep a parallel batch grid so samples split across TCs.
    tc = _tensorcores_per_chip()
    if tc > 1 and N % tc == 0:
        nb = N // tc
    else:
        nb = N
    grid = (N // nb,)

    kernel = functools.partial(_resnet_block_kernel, width=W)

    out_flat = pl.pallas_call(
        kernel,
        out_shape=jax.ShapeDtypeStruct((N, C, S), x.dtype),
        grid_spec=pltpu.PrefetchScalarGridSpec(
            num_scalar_prefetch=0,
            grid=grid,
            in_specs=[
                pl.BlockSpec((nb, C, S), lambda g: (g, 0, 0)),
                pl.BlockSpec((9, C, C), lambda g: (0, 0, 0)),   # weights resident
                pl.BlockSpec((9, C, C), lambda g: (0, 0, 0)),
            ],
            out_specs=pl.BlockSpec((nb, C, S), lambda g: (g, 0, 0)),
        ),
        compiler_params=pltpu.CompilerParams(
            dimension_semantics=("parallel",),          # megacore over batch
            vmem_limit_bytes=32 * 1024 * 1024,          # raise v5e's 16 MiB default
        ),
    )(x_flat, w1_t, w2_t)
    return out_flat.reshape(N, C, H, W)


def resnet_block_ref(x, w1, w2):
    """Pure-JAX reference matching the PyTorch module semantics."""
    def pad(z):
        return jnp.pad(z, ((0, 0), (0, 0), (1, 1), (1, 1)), mode="reflect")

    def conv(z, w):
        return jax.lax.conv_general_dilated(
            z, w, window_strides=(1, 1), padding="VALID",
            dimension_numbers=("NCHW", "OIHW", "NCHW"),
            precision=jax.lax.Precision.HIGHEST)

    def inorm(z, eps=1e-5):
        m = jnp.mean(z, axis=(2, 3), keepdims=True)
        v = jnp.mean((z - m) ** 2, axis=(2, 3), keepdims=True)
        return (z - m) * jax.lax.rsqrt(v + eps)

    y = jnp.maximum(inorm(conv(pad(x), w1)), 0.0)
    y = inorm(conv(pad(y), w2))
    return x + y


if __name__ == "__main__":
    key = jax.random.PRNGKey(0)
    kx, k1, k2 = jax.random.split(key, 3)

    N, C, H, W = 2, 4, 16, 16
    x = jax.random.normal(kx, (N, C, H, W), dtype=jnp.float32)
    # Deterministic conv weights (PyTorch default init style: U(-b, b), b = 1/sqrt(fan_in)).
    bound = 1.0 / (C * 3 * 3) ** 0.5
    w1 = jax.random.uniform(k1, (C, C, 3, 3), minval=-bound, maxval=bound,
                            dtype=jnp.float32)
    w2 = jax.random.uniform(k2, (C, C, 3, 3), minval=-bound, maxval=bound,
                            dtype=jnp.float32)

    ref = jax.block_until_ready(resnet_block_ref(x, w1, w2))

    # f32 MXU path: tight tolerance (previous 1e-2 was loose enough to hide
    # tap-indexing / reflection-mask regressions).
    out_f32 = jax.block_until_ready(
        resnet_block(x, w1, w2, compute_dtype=jnp.float32))
    assert out_f32.shape == (N, C, H, W)
    err_f32 = float(jnp.max(jnp.abs(out_f32 - ref)))
    assert jnp.allclose(out_f32, ref, atol=1e-4, rtol=1e-4), err_f32

    # bf16-operand / f32-accumulate MXU path (2x MXU rate, half activation
    # bytes through the matmul); looser tolerance is inherent to bf16 operands.
    out_bf16 = jax.block_until_ready(
        resnet_block(x, w1, w2, compute_dtype=jnp.bfloat16))
    err_bf16 = float(jnp.max(jnp.abs(out_bf16 - ref)))
    assert jnp.allclose(out_bf16, ref, atol=5e-2, rtol=5e-2), err_bf16

    print("KERNEL_OK")
</pallas_src>

<mosaic_0001>
module attributes {stable_mosaic.version = 11 : i64} {
  func.func @_resnet_block_kernel(%arg0: i32, %arg1: memref<2x4x256xf32, #tpu.memory_space<vmem>>, %arg2: memref<9x4x4xf32, #tpu.memory_space<vmem>>, %arg3: memref<9x4x4xf32, #tpu.memory_space<vmem>>, %arg4: memref<2x4x256xf32, #tpu.memory_space<vmem>>) attributes {dimension_semantics = [#tpu.dimension_semantics<parallel>], iteration_bounds = array<i64: 1>, scalar_prefetch = 0 : i64, scratch_operands = 0 : i64, tpu.core_type = #tpu.core_type<tc>, window_params = [{transform_indices = @transform_0, window_bounds = array<i64: 2, 4, 256>}, {pipeline_mode = #tpu.pipeline_mode<synchronous>, transform_indices = @transform_1, window_bounds = array<i64: 9, 4, 4>}, {pipeline_mode = #tpu.pipeline_mode<synchronous>, transform_indices = @transform_2, window_bounds = array<i64: 9, 4, 4>}, {transform_indices = @transform_3, window_bounds = array<i64: 2, 4, 256>}]} {
    %0 = tpu.iota {dimensions = array<i32: 1>} : vector<1x256xi32>
    %c16_i32 = arith.constant 16 : i32
    %c0_i32 = arith.constant 0 : i32
    %1 = arith.cmpi eq, %c16_i32, %c0_i32 : i32
    %c1_i32 = arith.constant 1 : i32
    %2 = arith.select %1, %c1_i32, %c16_i32 : i32
    %3 = vector.broadcast %2 : i32 to vector<1x256xi32>
    %4 = arith.remsi %0, %3 : vector<1x256xi32>
    %c0_i32_0 = arith.constant 0 : i32
    %5 = vector.broadcast %c0_i32_0 : i32 to vector<1x256xi32>
    %6 = arith.cmpi ne, %4, %5 : vector<1x256xi32>
    %c0_i32_1 = arith.constant 0 : i32
    %7 = vector.broadcast %c0_i32_1 : i32 to vector<1x256xi32>
    %8 = arith.cmpi slt, %4, %7 : vector<1x256xi32>
    %c0_i32_2 = arith.constant 0 : i32
    %9 = arith.cmpi slt, %2, %c0_i32_2 : i32
    %10 = vector.broadcast %9 : i1 to vector<1x256xi1>
    %11 = vector.broadcast %10 : vector<1x256xi1> to vector<1x256xi1>
    %12 = arith.xori %8, %11 : vector<1x256xi1>
    %13 = arith.andi %12, %6 : vector<1x256xi1>
    %14 = vector.broadcast %2 : i32 to vector<1x256xi32>
    %15 = arith.addi %4, %14 : vector<1x256xi32>
    %16 = arith.select %13, %15, %4 : vector<1x256xi1>, vector<1x256xi32>
    %c16_i32_3 = arith.constant 16 : i32
    %17 = vector.broadcast %c16_i32_3 : i32 to vector<1x256xi32>
    %18 = arith.cmpi slt, %0, %17 : vector<1x256xi32>
    %c240_i32 = arith.constant 240 : i32
    %19 = vector.broadcast %c240_i32 : i32 to vector<1x256xi32>
    %20 = arith.cmpi sge, %0, %19 : vector<1x256xi32>
    %c0_i32_4 = arith.constant 0 : i32
    %21 = vector.broadcast %c0_i32_4 : i32 to vector<1x256xi32>
    %22 = arith.cmpi eq, %16, %21 : vector<1x256xi32>
    %c15_i32 = arith.constant 15 : i32
    %23 = vector.broadcast %c15_i32 : i32 to vector<1x256xi32>
    %24 = arith.cmpi eq, %16, %23 : vector<1x256xi32>
    %c0 = arith.constant 0 : index
    %c0_5 = arith.constant 0 : index
    %c0_6 = arith.constant 0 : index
    %25 = vector.load %arg1[%c0, %c0_5, %c0_6] : memref<2x4x256xf32, #tpu.memory_space<vmem>>, vector<1x4x256xf32>
    %26 = vector.shape_cast %25 : vector<1x4x256xf32> to vector<4x256xf32>
    %c240_i32_7 = arith.constant 240 : i32
    %27 = tpu.dynamic_rotate %26 by %c240_i32_7 dim 1 : vector<4x256xf32>, i32 -> vector<4x256xf32>
    %c16_i32_8 = arith.constant 16 : i32
    %28 = tpu.dynamic_rotate %26 by %c16_i32_8 dim 1 : vector<4x256xf32>, i32 -> vector<4x256xf32>
    %29 = vector.shape_cast %18 : vector<1x256xi1> to vector<1x256xi1>
    %30 = vector.broadcast %29 : vector<1x256xi1> to vector<4x256xi1>
    %31 = arith.select %30, %27, %28 : vector<4x256xi1>, vector<4x256xf32>
    %32 = vector.shape_cast %20 : vector<1x256xi1> to vector<1x256xi1>
    %33 = vector.broadcast %32 : vector<1x256xi1> to vector<4x256xi1>
    %34 = arith.select %33, %28, %27 : vector<4x256xi1>, vector<4x256xf32>
    %cst = arith.constant 0.000000e+00 : f32
    %35 = vector.broadcast %cst : f32 to vector<4x256xf32>
    %c255_i32 = arith.constant 255 : i32
    %36 = tpu.dynamic_rotate %31 by %c255_i32 dim 1 : vector<4x256xf32>, i32 -> vector<4x256xf32>
    %c1_i32_9 = arith.constant 1 : i32
    %37 = tpu.dynamic_rotate %31 by %c1_i32_9 dim 1 : vector<4x256xf32>, i32 -> vector<4x256xf32>
    %38 = vector.shape_cast %22 : vector<1x256xi1> to vector<1x256xi1>
    %39 = vector.broadcast %38 : vector<1x256xi1> to vector<4x256xi1>
    %40 = arith.select %39, %36, %37 : vector<4x256xi1>, vector<4x256xf32>
    %41 = vector.shape_cast %24 : vector<1x256xi1> to vector<1x256xi1>
    %42 = vector.broadcast %41 : vector<1x256xi1> to vector<4x256xi1>
    %43 = arith.select %42, %37, %36 : vector<4x256xi1>, vector<4x256xf32>
    %c0_10 = arith.constant 0 : index
    %c0_11 = arith.constant 0 : index
    %c0_12 = arith.constant 0 : index
    %44 = vector.load %arg2[%c0_10, %c0_11, %c0_12] : memref<9x4x4xf32, #tpu.memory_space<vmem>>, vector<1x4x4xf32>
    %45 = vector.shape_cast %44 : vector<1x4x4xf32> to vector<4x4xf32>
    %cst_13 = arith.constant dense<0.000000e+00> : vector<4x256xf32>
    %46 = tpu.matmul %45, %40, %cst_13 {dimension_numbers = #tpu.dot_dimension_numbers<[1], [0], [0], [1], [0, 0, 1, 1], [], []>, precision = #tpu.contract_precision<fp32>} : vector<4x4xf32>, vector<4x256xf32>, vector<4x256xf32> -> vector<4x256xf32>
    %47 = arith.addf %35, %46 : vector<4x256xf32>
    %c1 = arith.constant 1 : index
    %c0_14 = arith.constant 0 : index
    %c0_15 = arith.constant 0 : index
    %48 = vector.load %arg2[%c1, %c0_14, %c0_15] : memref<9x4x4xf32, #tpu.memory_space<vmem>>, vector<1x4x4xf32>
    %49 = vector.shape_cast %48 : vector<1x4x4xf32> to vector<4x4xf32>
    %cst_16 = arith.constant dense<0.000000e+00> : vector<4x256xf32>
    %50 = tpu.matmul %49, %31, %cst_16 {dimension_numbers = #tpu.dot_dimension_numbers<[1], [0], [0], [1], [0, 0, 1, 1], [], []>, precision = #tpu.contract_precision<fp32>} : vector<4x4xf32>, vector<4x256xf32>, vector<4x256xf32> -> vector<4x256xf32>
    %51 = arith.addf %47, %50 : vector<4x256xf32>
    %c2 = arith.constant 2 : index
    %c0_17 = arith.constant 0 : index
    %c0_18 = arith.constant 0 : index
    %52 = vector.load %arg2[%c2, %c0_17, %c0_18] : memref<9x4x4xf32, #tpu.memory_space<vmem>>, vector<1x4x4xf32>
    %53 = vector.shape_cast %52 : vector<1x4x4xf32> to vector<4x4xf32>
    %cst_19 = arith.constant dense<0.000000e+00> : vector<4x256xf32>
    %54 = tpu.matmul %53, %43, %cst_19 {dimension_numbers = #tpu.dot_dimension_numbers<[1], [0], [0], [1], [0, 0, 1, 1], [], []>, precision = #tpu.contract_precision<fp32>} : vector<4x4xf32>, vector<4x256xf32>, vector<4x256xf32> -> vector<4x256xf32>
    %55 = arith.addf %51, %54 : vector<4x256xf32>
    %c255_i32_20 = arith.constant 255 : i32
    %56 = tpu.dynamic_rotate %26 by %c255_i32_20 dim 1 : vector<4x256xf32>, i32 -> vector<4x256xf32>
    %c1_i32_21 = arith.constant 1 : i32
    %57 = tpu.dynamic_rotate %26 by %c1_i32_21 dim 1 : vector<4x256xf32>, i32 -> vector<4x256xf32>
    %58 = vector.shape_cast %22 : vector<1x256xi1> to vector<1x256xi1>
    %59 = vector.broadcast %58 : vector<1x256xi1> to vector<4x256xi1>
    %60 = arith.select %59, %56, %57 : vector<4x256xi1>, vector<4x256xf32>
    %61 = vector.shape_cast %24 : vector<1x256xi1> to vector<1x256xi1>
    %62 = vector.broadcast %61 : vector<1x256xi1> to vector<4x256xi1>
    %63 = arith.select %62, %57, %56 : vector<4x256xi1>, vector<4x256xf32>
    %c3 = arith.constant 3 : index
    %c0_22 = arith.constant 0 : index
    %c0_23 = arith.constant 0 : index
    %64 = vector.load %arg2[%c3, %c0_22, %c0_23] : memref<9x4x4xf32, #tpu.memory_space<vmem>>, vector<1x4x4xf32>
    %65 = vector.shape_cast %64 : vector<1x4x4xf32> to vector<4x4xf32>
    %cst_24 = arith.constant dense<0.000000e+00> : vector<4x256xf32>
    %66 = tpu.matmul %65, %60, %cst_24 {dimension_numbers = #tpu.dot_dimension_numbers<[1], [0], [0], [1], [0, 0, 1, 1], [], []>, precision = #tpu.contract_precision<fp32>} : vector<4x4xf32>, vector<4x256xf32>, vector<4x256xf32> -> vector<4x256xf32>
    %67 = arith.addf %55, %66 : vector<4x256xf32>
    %c4 = arith.constant 4 : index
    %c0_25 = arith.constant 0 : index
    %c0_26 = arith.constant 0 : index
    %68 = vector.load %arg2[%c4, %c0_25, %c0_26] : memref<9x4x4xf32, #tpu.memory_space<vmem>>, vector<1x4x4xf32>
    %69 = vector.shape_cast %68 : vector<1x4x4xf32> to vector<4x4xf32>
    %cst_27 = arith.constant dense<0.000000e+00> : vector<4x256xf32>
    %70 = tpu.matmul %69, %26, %cst_27 {dimension_numbers = #tpu.dot_dimension_numbers<[1], [0], [0], [1], [0, 0, 1, 1], [], []>, precision = #tpu.contract_precision<fp32>} : vector<4x4xf32>, vector<4x256xf32>, vector<4x256xf32> -> vector<4x256xf32>
    %71 = arith.addf %67, %70 : vector<4x256xf32>
    %c5 = arith.constant 5 : index
    %c0_28 = arith.constant 0 : index
    %c0_29 = arith.constant 0 : index
    %72 = vector.load %arg2[%c5, %c0_28, %c0_29] : memref<9x4x4xf32, #tpu.memory_space<vmem>>, vector<1x4x4xf32>
    %73 = vector.shape_cast %72 : vector<1x4x4xf32> to vector<4x4xf32>
    %cst_30 = arith.constant dense<0.000000e+00> : vector<4x256xf32>
    %74 = tpu.matmul %73, %63, %cst_30 {dimension_numbers = #tpu.dot_dimension_numbers<[1], [0], [0], [1], [0, 0, 1, 1], [], []>, precision = #tpu.contract_precision<fp32>} : vector<4x4xf32>, vector<4x256xf32>, vector<4x256xf32> -> vector<4x256xf32>
    %75 = arith.addf %71, %74 : vector<4x256xf32>
    %c255_i32_31 = arith.constant 255 : i32
    %76 = tpu.dynamic_rotate %34 by %c255_i32_31 dim 1 : vector<4x256xf32>, i32 -> vector<4x256xf32>
    %c1_i32_32 = arith.constant 1 : i32
    %77 = tpu.dynamic_rotate %34 by %c1_i32_32 dim 1 : vector<4x256xf32>, i32 -> vector<4x256xf32>
    %78 = vector.shape_cast %22 : vector<1x256xi1> to vector<1x256xi1>
    %79 = vector.broadcast %78 : vector<1x256xi1> to vector<4x256xi1>
    %80 = arith.select %79, %76, %77 : vector<4x256xi1>, vector<4x256xf32>
    %81 = vector.shape_cast %24 : vector<1x256xi1> to vector<1x256xi1>
    %82 = vector.broadcast %81 : vector<1x256xi1> to vector<4x256xi1>
    %83 = arith.select %82, %77, %76 : vector<4x256xi1>, vector<4x256xf32>
    %c6 = arith.constant 6 : index
    %c0_33 = arith.constant 0 : index
    %c0_34 = arith.constant 0 : index
    %84 = vector.load %arg2[%c6, %c0_33, %c0_34] : memref<9x4x4xf32, #tpu.memory_space<vmem>>, vector<1x4x4xf32>
    %85 = vector.shape_cast %84 : vector<1x4x4xf32> to vector<4x4xf32>
    %cst_35 = arith.constant dense<0.000000e+00> : vector<4x256xf32>
    %86 = tpu.matmul %85, %80, %cst_35 {dimension_numbers = #tpu.dot_dimension_numbers<[1], [0], [0], [1], [0, 0, 1, 1], [], []>, precision = #tpu.contract_precision<fp32>} : vector<4x4xf32>, vector<4x256xf32>, vector<4x256xf32> -> vector<4x256xf32>
    %87 = arith.addf %75, %86 : vector<4x256xf32>
    %c7 = arith.constant 7 : index
    %c0_36 = arith.constant 0 : index
    %c0_37 = arith.constant 0 : index
    %88 = vector.load %arg2[%c7, %c0_36, %c0_37] : memref<9x4x4xf32, #tpu.memory_space<vmem>>, vector<1x4x4xf32>
    %89 = vector.shape_cast %88 : vector<1x4x4xf32> to vector<4x4xf32>
    %cst_38 = arith.constant dense<0.000000e+00> : vector<4x256xf32>
    %90 = tpu.matmul %89, %34, %cst_38 {dimension_numbers = #tpu.dot_dimension_numbers<[1], [0], [0], [1], [0, 0, 1, 1], [], []>, precision = #tpu.contract_precision<fp32>} : vector<4x4xf32>, vector<4x256xf32>, vector<4x256xf32> -> vector<4x256xf32>
    %91 = arith.addf %87, %90 : vector<4x256xf32>
    %c8 = arith.constant 8 : index
    %c0_39 = arith.constant 0 : index
    %c0_40 = arith.constant 0 : index
    %92 = vector.load %arg2[%c8, %c0_39, %c0_40] : memref<9x4x4xf32, #tpu.memory_space<vmem>>, vector<1x4x4xf32>
    %93 = vector.shape_cast %92 : vector<1x4x4xf32> to vector<4x4xf32>
    %cst_41 = arith.constant dense<0.000000e+00> : vector<4x256xf32>
    %94 = tpu.matmul %93, %83, %cst_41 {dimension_numbers = #tpu.dot_dimension_numbers<[1], [0], [0], [1], [0, 0, 1, 1], [], []>, precision = #tpu.contract_precision<fp32>} : vector<4x4xf32>, vector<4x256xf32>, vector<4x256xf32> -> vector<4x256xf32>
    %95 = arith.addf %91, %94 : vector<4x256xf32>
    %cst_42 = arith.constant dense<0.000000e+00> : vector<4xf32>
    %96 = vector.multi_reduction <add>, %95, %cst_42 [1] : vector<4x256xf32> to vector<4xf32>
    %97 = vector.shape_cast %96 : vector<4xf32> to vector<4x1xf32>
    %cst_43 = arith.constant 2.560000e+02 : f32
    %98 = vector.broadcast %cst_43 : f32 to vector<4x1xf32>
    %99 = arith.divf %97, %98 : vector<4x1xf32>
    %100 = vector.broadcast %99 : vector<4x1xf32> to vector<4x256xf32>
    %101 = arith.subf %95, %100 : vector<4x256xf32>
    %102 = arith.mulf %101, %101 : vector<4x256xf32>
    %cst_44 = arith.constant dense<0.000000e+00> : vector<4xf32>
    %103 = vector.multi_reduction <add>, %102, %cst_44 [1] : vector<4x256xf32> to vector<4xf32>
    %104 = vector.shape_cast %103 : vector<4xf32> to vector<4x1xf32>
    %cst_45 = arith.constant 2.560000e+02 : f32
    %105 = vector.broadcast %cst_45 : f32 to vector<4x1xf32>
    %106 = arith.divf %104, %105 : vector<4x1xf32>
    %cst_46 = arith.constant 9.99999974E-6 : f32
    %107 = vector.broadcast %cst_46 : f32 to vector<4x1xf32>
    %108 = arith.addf %106, %107 : vector<4x1xf32>
    %109 = math.rsqrt %108 : vector<4x1xf32>
    %110 = vector.broadcast %109 : vector<4x1xf32> to vector<4x256xf32>
    %111 = arith.mulf %101, %110 : vector<4x256xf32>
    %cst_47 = arith.constant 0.000000e+00 : f32
    %112 = vector.broadcast %cst_47 : f32 to vector<4x256xf32>
    %113 = arith.maximumf %111, %112 : vector<4x256xf32>
    %c240_i32_48 = arith.constant 240 : i32
    %114 = tpu.dynamic_rotate %113 by %c240_i32_48 dim 1 : vector<4x256xf32>, i32 -> vector<4x256xf32>
    %c16_i32_49 = arith.constant 16 : i32
    %115 = tpu.dynamic_rotate %113 by %c16_i32_49 dim 1 : vector<4x256xf32>, i32 -> vector<4x256xf32>
    %116 = vector.shape_cast %18 : vector<1x256xi1> to vector<1x256xi1>
    %117 = vector.broadcast %116 : vector<1x256xi1> to vector<4x256xi1>
    %118 = arith.select %117, %114, %115 : vector<4x256xi1>, vector<4x256xf32>
    %119 = vector.shape_cast %20 : vector<1x256xi1> to vector<1x256xi1>
    %120 = vector.broadcast %119 : vector<1x256xi1> to vector<4x256xi1>
    %121 = arith.select %120, %115, %114 : vector<4x256xi1>, vector<4x256xf32>
    %cst_50 = arith.constant 0.000000e+00 : f32
    %122 = vector.broadcast %cst_50 : f32 to vector<4x256xf32>
    %c255_i32_51 = arith.constant 255 : i32
    %123 = tpu.dynamic_rotate %118 by %c255_i32_51 dim 1 : vector<4x256xf32>, i32 -> vector<4x256xf32>
    %c1_i32_52 = arith.constant 1 : i32
    %124 = tpu.dynamic_rotate %118 by %c1_i32_52 dim 1 : vector<4x256xf32>, i32 -> vector<4x256xf32>
    %125 = vector.shape_cast %22 : vector<1x256xi1> to vector<1x256xi1>
    %126 = vector.broadcast %125 : vector<1x256xi1> to vector<4x256xi1>
    %127 = arith.select %126, %123, %124 : vector<4x256xi1>, vector<4x256xf32>
    %128 = vector.shape_cast %24 : vector<1x256xi1> to vector<1x256xi1>
    %129 = vector.broadcast %128 : vector<1x256xi1> to vector<4x256xi1>
    %130 = arith.select %129, %124, %123 : vector<4x256xi1>, vector<4x256xf32>
    %c0_53 = arith.constant 0 : index
    %c0_54 = arith.constant 0 : index
    %c0_55 = arith.constant 0 : index
    %131 = vector.load %arg3[%c0_53, %c0_54, %c0_55] : memref<9x4x4xf32, #tpu.memory_space<vmem>>, vector<1x4x4xf32>
    %132 = vector.shape_cast %131 : vector<1x4x4xf32> to vector<4x4xf32>
    %cst_56 = arith.constant dense<0.000000e+00> : vector<4x256xf32>
    %133 = tpu.matmul %132, %127, %cst_56 {dimension_numbers = #tpu.dot_dimension_numbers<[1], [0], [0], [1], [0, 0, 1, 1], [], []>, precision = #tpu.contract_precision<fp32>} : vector<4x4xf32>, vector<4x256xf32>, vector<4x256xf32> -> vector<4x256xf32>
    %134 = arith.addf %122, %133 : vector<4x256xf32>
    %c1_57 = arith.constant 1 : index
    %c0_58 = arith.constant 0 : index
    %c0_59 = arith.constant 0 : index
    %135 = vector.load %arg3[%c1_57, %c0_58, %c0_59] : memref<9x4x4xf32, #tpu.memory_space<vmem>>, vector<1x4x4xf32>
    %136 = vector.shape_cast %135 : vector<1x4x4xf32> to vector<4x4xf32>
    %cst_60 = arith.constant dense<0.000000e+00> : vector<4x256xf32>
    %137 = tpu.matmul %136, %118, %cst_60 {dimension_numbers = #tpu.dot_dimension_numbers<[1], [0], [0], [1], [0, 0, 1, 1], [], []>, precision = #tpu.contract_precision<fp32>} : vector<4x4xf32>, vector<4x256xf32>, vector<4x256xf32> -> vector<4x256xf32>
    %138 = arith.addf %134, %137 : vector<4x256xf32>
    %c2_61 = arith.constant 2 : index
    %c0_62 = arith.constant 0 : index
    %c0_63 = arith.constant 0 : index
    %139 = vector.load %arg3[%c2_61, %c0_62, %c0_63] : memref<9x4x4xf32, #tpu.memory_space<vmem>>, vector<1x4x4xf32>
    %140 = vector.shape_cast %139 : vector<1x4x4xf32> to vector<4x4xf32>
    %cst_64 = arith.constant dense<0.000000e+00> : vector<4x256xf32>
    %141 = tpu.matmul %140, %130, %cst_64 {dimension_numbers = #tpu.dot_dimension_numbers<[1], [0], [0], [1], [0, 0, 1, 1], [], []>, precision = #tpu.contract_precision<fp32>} : vector<4x4xf32>, vector<4x256xf32>, vector<4x256xf32> -> vector<4x256xf32>
    %142 = arith.addf %138, %141 : vector<4x256xf32>
    %c255_i32_65 = arith.constant 255 : i32
    %143 = tpu.dynamic_rotate %113 by %c255_i32_65 dim 1 : vector<4x256xf32>, i32 -> vector<4x256xf32>
    %c1_i32_66 = arith.constant 1 : i32
    %144 = tpu.dynamic_rotate %113 by %c1_i32_66 dim 1 : vector<4x256xf32>, i32 -> vector<4x256xf32>
    %145 = vector.shape_cast %22 : vector<1x256xi1> to vector<1x256xi1>
    %146 = vector.broadcast %145 : vector<1x256xi1> to vector<4x256xi1>
    %147 = arith.select %146, %143, %144 : vector<4x256xi1>, vector<4x256xf32>
    %148 = vector.shape_cast %24 : vector<1x256xi1> to vector<1x256xi1>
    %149 = vector.broadcast %148 : vector<1x256xi1> to vector<4x256xi1>
    %150 = arith.select %149, %144, %143 : vector<4x256xi1>, vector<4x256xf32>
    %c3_67 = arith.constant 3 : index
    %c0_68 = arith.constant 0 : index
    %c0_69 = arith.constant 0 : index
    %151 = vector.load %arg3[%c3_67, %c0_68, %c0_69] : memref<9x4x4xf32, #tpu.memory_space<vmem>>, vector<1x4x4xf32>
    %152 = vector.shape_cast %151 : vector<1x4x4xf32> to vector<4x4xf32>
    %cst_70 = arith.constant dense<0.000000e+00> : vector<4x256xf32>
    %153 = tpu.matmul %152, %147, %cst_70 {dimension_numbers = #tpu.dot_dimension_numbers<[1], [0], [0], [1], [0, 0, 1, 1], [], []>, precision = #tpu.contract_precision<fp32>} : vector<4x4xf32>, vector<4x256xf32>, vector<4x256xf32> -> vector<4x256xf32>
    %154 = arith.addf %142, %153 : vector<4x256xf32>
    %c4_71 = arith.constant 4 : index
    %c0_72 = arith.constant 0 : index
    %c0_73 = arith.constant 0 : index
    %155 = vector.load %arg3[%c4_71, %c0_72, %c0_73] : memref<9x4x4xf32, #tpu.memory_space<vmem>>, vector<1x4x4xf32>
    %156 = vector.shape_cast %155 : vector<1x4x4xf32> to vector<4x4xf32>
    %cst_74 = arith.constant dense<0.000000e+00> : vector<4x256xf32>
    %157 = tpu.matmul %156, %113, %cst_74 {dimension_numbers = #tpu.dot_dimension_numbers<[1], [0], [0], [1], [0, 0, 1, 1], [], []>, precision = #tpu.contract_precision<fp32>} : vector<4x4xf32>, vector<4x256xf32>, vector<4x256xf32> -> vector<4x256xf32>
    %158 = arith.addf %154, %157 : vector<4x256xf32>
    %c5_75 = arith.constant 5 : index
    %c0_76 = arith.constant 0 : index
    %c0_77 = arith.constant 0 : index
    %159 = vector.load %arg3[%c5_75, %c0_76, %c0_77] : memref<9x4x4xf32, #tpu.memory_space<vmem>>, vector<1x4x4xf32>
    %160 = vector.shape_cast %159 : vector<1x4x4xf32> to vector<4x4xf32>
    %cst_78 = arith.constant dense<0.000000e+00> : vector<4x256xf32>
    %161 = tpu.matmul %160, %150, %cst_78 {dimension_numbers = #tpu.dot_dimension_numbers<[1], [0], [0], [1], [0, 0, 1, 1], [], []>, precision = #tpu.contract_precision<fp32>} : vector<4x4xf32>, vector<4x256xf32>, vector<4x256xf32> -> vector<4x256xf32>
    %162 = arith.addf %158, %161 : vector<4x256xf32>
    %c255_i32_79 = arith.constant 255 : i32
    %163 = tpu.dynamic_rotate %121 by %c255_i32_79 dim 1 : vector<4x256xf32>, i32 -> vector<4x256xf32>
    %c1_i32_80 = arith.constant 1 : i32
    %164 = tpu.dynamic_rotate %121 by %c1_i32_80 dim 1 : vector<4x256xf32>, i32 -> vector<4x256xf32>
    %165 = vector.shape_cast %22 : vector<1x256xi1> to vector<1x256xi1>
    %166 = vector.broadcast %165 : vector<1x256xi1> to vector<4x256xi1>
    %167 = arith.select %166, %163, %164 : vector<4x256xi1>, vector<4x256xf32>
    %168 = vector.shape_cast %24 : vector<1x256xi1> to vector<1x256xi1>
    %169 = vector.broadcast %168 : vector<1x256xi1> to vector<4x256xi1>
    %170 = arith.select %169, %164, %163 : vector<4x256xi1>, vector<4x256xf32>
    %c6_81 = arith.constant 6 : index
    %c0_82 = arith.constant 0 : index
    %c0_83 = arith.constant 0 : index
    %171 = vector.load %arg3[%c6_81, %c0_82, %c0_83] : memref<9x4x4xf32, #tpu.memory_space<vmem>>, vector<1x4x4xf32>
    %172 = vector.shape_cast %171 : vector<1x4x4xf32> to vector<4x4xf32>
    %cst_84 = arith.constant dense<0.000000e+00> : vector<4x256xf32>
    %173 = tpu.matmul %172, %167, %cst_84 {dimension_numbers = #tpu.dot_dimension_numbers<[1], [0], [0], [1], [0, 0, 1, 1], [], []>, precision = #tpu.contract_precision<fp32>} : vector<4x4xf32>, vector<4x256xf32>, vector<4x256xf32> -> vector<4x256xf32>
    %174 = arith.addf %162, %173 : vector<4x256xf32>
    %c7_85 = arith.constant 7 : index
    %c0_86 = arith.constant 0 : index
    %c0_87 = arith.constant 0 : index
    %175 = vector.load %arg3[%c7_85, %c0_86, %c0_87] : memref<9x4x4xf32, #tpu.memory_space<vmem>>, vector<1x4x4xf32>
    %176 = vector.shape_cast %175 : vector<1x4x4xf32> to vector<4x4xf32>
    %cst_88 = arith.constant dense<0.000000e+00> : vector<4x256xf32>
    %177 = tpu.matmul %176, %121, %cst_88 {dimension_numbers = #tpu.dot_dimension_numbers<[1], [0], [0], [1], [0, 0, 1, 1], [], []>, precision = #tpu.contract_precision<fp32>} : vector<4x4xf32>, vector<4x256xf32>, vector<4x256xf32> -> vector<4x256xf32>
    %178 = arith.addf %174, %177 : vector<4x256xf32>
    %c8_89 = arith.constant 8 : index
    %c0_90 = arith.constant 0 : index
    %c0_91 = arith.constant 0 : index
    %179 = vector.load %arg3[%c8_89, %c0_90, %c0_91] : memref<9x4x4xf32, #tpu.memory_space<vmem>>, vector<1x4x4xf32>
    %180 = vector.shape_cast %179 : vector<1x4x4xf32> to vector<4x4xf32>
    %cst_92 = arith.constant dense<0.000000e+00> : vector<4x256xf32>
    %181 = tpu.matmul %180, %170, %cst_92 {dimension_numbers = #tpu.dot_dimension_numbers<[1], [0], [0], [1], [0, 0, 1, 1], [], []>, precision = #tpu.contract_precision<fp32>} : vector<4x4xf32>, vector<4x256xf32>, vector<4x256xf32> -> vector<4x256xf32>
    %182 = arith.addf %178, %181 : vector<4x256xf32>
    %cst_93 = arith.constant dense<0.000000e+00> : vector<4xf32>
    %183 = vector.multi_reduction <add>, %182, %cst_93 [1] : vector<4x256xf32> to vector<4xf32>
    %184 = vector.shape_cast %183 : vector<4xf32> to vector<4x1xf32>
    %cst_94 = arith.constant 2.560000e+02 : f32
    %185 = vector.broadcast %cst_94 : f32 to vector<4x1xf32>
    %186 = arith.divf %184, %185 : vector<4x1xf32>
    %187 = vector.broadcast %186 : vector<4x1xf32> to vector<4x256xf32>
    %188 = arith.subf %182, %187 : vector<4x256xf32>
    %189 = arith.mulf %188, %188 : vector<4x256xf32>
    %cst_95 = arith.constant dense<0.000000e+00> : vector<4xf32>
    %190 = vector.multi_reduction <add>, %189, %cst_95 [1] : vector<4x256xf32> to vector<4xf32>
    %191 = vector.shape_cast %190 : vector<4xf32> to vector<4x1xf32>
    %cst_96 = arith.constant 2.560000e+02 : f32
    %192 = vector.broadcast %cst_96 : f32 to vector<4x1xf32>
    %193 = arith.divf %191, %192 : vector<4x1xf32>
    %cst_97 = arith.constant 9.99999974E-6 : f32
    %194 = vector.broadcast %cst_97 : f32 to vector<4x1xf32>
    %195 = arith.addf %193, %194 : vector<4x1xf32>
    %196 = math.rsqrt %195 : vector<4x1xf32>
    %197 = vector.broadcast %196 : vector<4x1xf32> to vector<4x256xf32>
    %198 = arith.mulf %188, %197 : vector<4x256xf32>
    %199 = arith.addf %26, %198 : vector<4x256xf32>
    %c0_98 = arith.constant 0 : index
    %c0_99 = arith.constant 0 : index
    %c0_100 = arith.constant 0 : index
    %200 = vector.load %arg4[%c0_98, %c0_99, %c0_100] : memref<2x4x256xf32, #tpu.memory_space<vmem>>, vector<1x4x256xf32>
    %201 = vector.shape_cast %200 : vector<1x4x256xf32> to vector<4x256xf32>
    %202 = vector.shape_cast %199 : vector<4x256xf32> to vector<1x4x256xf32>
    tpu.vector_store %arg4[%c0_98, %c0_99, %c0_100], %202 {strides = array<i32>} : memref<2x4x256xf32, #tpu.memory_space<vmem>>, vector<1x4x256xf32>,
    %c1_101 = arith.constant 1 : index
    %c0_102 = arith.constant 0 : index
    %c0_103 = arith.constant 0 : index
    %203 = vector.load %arg1[%c1_101, %c0_102, %c0_103] : memref<2x4x256xf32, #tpu.memory_space<vmem>>, vector<1x4x256xf32>
    %204 = vector.shape_cast %203 : vector<1x4x256xf32> to vector<4x256xf32>
    %c240_i32_104 = arith.constant 240 : i32
    %205 = tpu.dynamic_rotate %204 by %c240_i32_104 dim 1 : vector<4x256xf32>, i32 -> vector<4x256xf32>
    %c16_i32_105 = arith.constant 16 : i32
    %206 = tpu.dynamic_rotate %204 by %c16_i32_105 dim 1 : vector<4x256xf32>, i32 -> vector<4x256xf32>
    %207 = vector.shape_cast %18 : vector<1x256xi1> to vector<1x256xi1>
    %208 = vector.broadcast %207 : vector<1x256xi1> to vector<4x256xi1>
    %209 = arith.select %208, %205, %206 : vector<4x256xi1>, vector<4x256xf32>
    %210 = vector.shape_cast %20 : vector<1x256xi1> to vector<1x256xi1>
    %211 = vector.broadcast %210 : vector<1x256xi1> to vector<4x256xi1>
    %212 = arith.select %211, %206, %205 : vector<4x256xi1>, vector<4x256xf32>
    %cst_106 = arith.constant 0.000000e+00 : f32
    %213 = vector.broadcast %cst_106 : f32 to vector<4x256xf32>
    %c255_i32_107 = arith.constant 255 : i32
    %214 = tpu.dynamic_rotate %209 by %c255_i32_107 dim 1 : vector<4x256xf32>, i32 -> vector<4x256xf32>
    %c1_i32_108 = arith.constant 1 : i32
    %215 = tpu.dynamic_rotate %209 by %c1_i32_108 dim 1 : vector<4x256xf32>, i32 -> vector<4x256xf32>
    %216 = vector.shape_cast %22 : vector<1x256xi1> to vector<1x256xi1>
    %217 = vector.broadcast %216 : vector<1x256xi1> to vector<4x256xi1>
    %218 = arith.select %217, %214, %215 : vector<4x256xi1>, vector<4x256xf32>
    %219 = vector.shape_cast %24 : vector<1x256xi1> to vector<1x256xi1>
    %220 = vector.broadcast %219 : vector<1x256xi1> to vector<4x256xi1>
    %221 = arith.select %220, %215, %214 : vector<4x256xi1>, vector<4x256xf32>
    %c0_109 = arith.constant 0 : index
    %c0_110 = arith.constant 0 : index
    %c0_111 = arith.constant 0 : index
    %222 = vector.load %arg2[%c0_109, %c0_110, %c0_111] : memref<9x4x4xf32, #tpu.memory_space<vmem>>, vector<1x4x4xf32>
    %223 = vector.shape_cast %222 : vector<1x4x4xf32> to vector<4x4xf32>
    %cst_112 = arith.constant dense<0.000000e+00> : vector<4x256xf32>
    %224 = tpu.matmul %223, %218, %cst_112 {dimension_numbers = #tpu.dot_dimension_numbers<[1], [0], [0], [1], [0, 0, 1, 1], [], []>, precision = #tpu.contract_precision<fp32>} : vector<4x4xf32>, vector<4x256xf32>, vector<4x256xf32> -> vector<4x256xf32>
    %225 = arith.addf %213, %224 : vector<4x256xf32>
    %c1_113 = arith.constant 1 : index
    %c0_114 = arith.constant 0 : index
    %c0_115 = arith.constant 0 : index
    %226 = vector.load %arg2[%c1_113, %c0_114, %c0_115] : memref<9x4x4xf32, #tpu.memory_space<vmem>>, vector<1x4x4xf32>
    %227 = vector.shape_cast %226 : vector<1x4x4xf32> to vector<4x4xf32>
    %cst_116 = arith.constant dense<0.000000e+00> : vector<4x256xf32>
    %228 = tpu.matmul %227, %209, %cst_116 {dimension_numbers = #tpu.dot_dimension_numbers<[1], [0], [0], [1], [0, 0, 1, 1], [], []>, precision = #tpu.contract_precision<fp32>} : vector<4x4xf32>, vector<4x256xf32>, vector<4x256xf32> -> vector<4x256xf32>
    %229 = arith.addf %225, %228 : vector<4x256xf32>
    %c2_117 = arith.constant 2 : index
    %c0_118 = arith.constant 0 : index
    %c0_119 = arith.constant 0 : index
    %230 = vector.load %arg2[%c2_117, %c0_118, %c0_119] : memref<9x4x4xf32, #tpu.memory_space<vmem>>, vector<1x4x4xf32>
    %231 = vector.shape_cast %230 : vector<1x4x4xf32> to vector<4x4xf32>
    %cst_120 = arith.constant dense<0.000000e+00> : vector<4x256xf32>
    %232 = tpu.matmul %231, %221, %cst_120 {dimension_numbers = #tpu.dot_dimension_numbers<[1], [0], [0], [1], [0, 0, 1, 1], [], []>, precision = #tpu.contract_precision<fp32>} : vector<4x4xf32>, vector<4x256xf32>, vector<4x256xf32> -> vector<4x256xf32>
    %233 = arith.addf %229, %232 : vector<4x256xf32>
    %c255_i32_121 = arith.constant 255 : i32
    %234 = tpu.dynamic_rotate %204 by %c255_i32_121 dim 1 : vector<4x256xf32>, i32 -> vector<4x256xf32>
    %c1_i32_122 = arith.constant 1 : i32
    %235 = tpu.dynamic_rotate %204 by %c1_i32_122 dim 1 : vector<4x256xf32>, i32 -> vector<4x256xf32>
    %236 = vector.shape_cast %22 : vector<1x256xi1> to vector<1x256xi1>
    %237 = vector.broadcast %236 : vector<1x256xi1> to vector<4x256xi1>
    %238 = arith.select %237, %234, %235 : vector<4x256xi1>, vector<4x256xf32>
    %239 = vector.shape_cast %24 : vector<1x256xi1> to vector<1x256xi1>
    %240 = vector.broadcast %239 : vector<1x256xi1> to vector<4x256xi1>
    %241 = arith.select %240, %235, %234 : vector<4x256xi1>, vector<4x256xf32>
    %c3_123 = arith.constant 3 : index
    %c0_124 = arith.constant 0 : index
    %c0_125 = arith.constant 0 : index
    %242 = vector.load %arg2[%c3_123, %c0_124, %c0_125] : memref<9x4x4xf32, #tpu.memory_space<vmem>>, vector<1x4x4xf32>
    %243 = vector.shape_cast %242 : vector<1x4x4xf32> to vector<4x4xf32>
    %cst_126 = arith.constant dense<0.000000e+00> : vector<4x256xf32>
    %244 = tpu.matmul %243, %238, %cst_126 {dimension_numbers = #tpu.dot_dimension_numbers<[1], [0], [0], [1], [0, 0, 1, 1], [], []>, precision = #tpu.contract_precision<fp32>} : vector<4x4xf32>, vector<4x256xf32>, vector<4x256xf32> -> vector<4x256xf32>
    %245 = arith.addf %233, %244 : vector<4x256xf32>
    %c4_127 = arith.constant 4 : index
    %c0_128 = arith.constant 0 : index
    %c0_129 = arith.constant 0 : index
    %246 = vector.load %arg2[%c4_127, %c0_128, %c0_129] : memref<9x4x4xf32, #tpu.memory_space<vmem>>, vector<1x4x4xf32>
    %247 = vector.shape_cast %246 : vector<1x4x4xf32> to vector<4x4xf32>
    %cst_130 = arith.constant dense<0.000000e+00> : vector<4x256xf32>
    %248 = tpu.matmul %247, %204, %cst_130 {dimension_numbers = #tpu.dot_dimension_numbers<[1], [0], [0], [1], [0, 0, 1, 1], [], []>, precision = #tpu.contract_precision<fp32>} : vector<4x4xf32>, vector<4x256xf32>, vector<4x256xf32> -> vector<4x256xf32>
    %249 = arith.addf %245, %248 : vector<4x256xf32>
    %c5_131 = arith.constant 5 : index
    %c0_132 = arith.constant 0 : index
    %c0_133 = arith.constant 0 : index
    %250 = vector.load %arg2[%c5_131, %c0_132, %c0_133] : memref<9x4x4xf32, #tpu.memory_space<vmem>>, vector<1x4x4xf32>
    %251 = vector.shape_cast %250 : vector<1x4x4xf32> to vector<4x4xf32>
    %cst_134 = arith.constant dense<0.000000e+00> : vector<4x256xf32>
    %252 = tpu.matmul %251, %241, %cst_134 {dimension_numbers = #tpu.dot_dimension_numbers<[1], [0], [0], [1], [0, 0, 1, 1], [], []>, precision = #tpu.contract_precision<fp32>} : vector<4x4xf32>, vector<4x256xf32>, vector<4x256xf32> -> vector<4x256xf32>
    %253 = arith.addf %249, %252 : vector<4x256xf32>
    %c255_i32_135 = arith.constant 255 : i32
    %254 = tpu.dynamic_rotate %212 by %c255_i32_135 dim 1 : vector<4x256xf32>, i32 -> vector<4x256xf32>
    %c1_i32_136 = arith.constant 1 : i32
    %255 = tpu.dynamic_rotate %212 by %c1_i32_136 dim 1 : vector<4x256xf32>, i32 -> vector<4x256xf32>
    %256 = vector.shape_cast %22 : vector<1x256xi1> to vector<1x256xi1>
    %257 = vector.broadcast %256 : vector<1x256xi1> to vector<4x256xi1>
    %258 = arith.select %257, %254, %255 : vector<4x256xi1>, vector<4x256xf32>
    %259 = vector.shape_cast %24 : vector<1x256xi1> to vector<1x256xi1>
    %260 = vector.broadcast %259 : vector<1x256xi1> to vector<4x256xi1>
    %261 = arith.select %260, %255, %254 : vector<4x256xi1>, vector<4x256xf32>
    %c6_137 = arith.constant 6 : index
    %c0_138 = arith.constant 0 : index
    %c0_139 = arith.constant 0 : index
    %262 = vector.load %arg2[%c6_137, %c0_138, %c0_139] : memref<9x4x4xf32, #tpu.memory_space<vmem>>, vector<1x4x4xf32>
    %263 = vector.shape_cast %262 : vector<1x4x4xf32> to vector<4x4xf32>
    %cst_140 = arith.constant dense<0.000000e+00> : vector<4x256xf32>
    %264 = tpu.matmul %263, %258, %cst_140 {dimension_numbers = #tpu.dot_dimension_numbers<[1], [0], [0], [1], [0, 0, 1, 1], [], []>, precision = #tpu.contract_precision<fp32>} : vector<4x4xf32>, vector<4x256xf32>, vector<4x256xf32> -> vector<4x256xf32>
    %265 = arith.addf %253, %264 : vector<4x256xf32>
    %c7_141 = arith.constant 7 : index
    %c0_142 = arith.constant 0 : index
    %c0_143 = arith.constant 0 : index
    %266 = vector.load %arg2[%c7_141, %c0_142, %c0_143] : memref<9x4x4xf32, #tpu.memory_space<vmem>>, vector<1x4x4xf32>
    %267 = vector.shape_cast %266 : vector<1x4x4xf32> to vector<4x4xf32>
    %cst_144 = arith.constant dense<0.000000e+00> : vector<4x256xf32>
    %268 = tpu.matmul %267, %212, %cst_144 {dimension_numbers = #tpu.dot_dimension_numbers<[1], [0], [0], [1], [0, 0, 1, 1], [], []>, precision = #tpu.contract_precision<fp32>} : vector<4x4xf32>, vector<4x256xf32>, vector<4x256xf32> -> vector<4x256xf32>
    %269 = arith.addf %265, %268 : vector<4x256xf32>
    %c8_145 = arith.constant 8 : index
    %c0_146 = arith.constant 0 : index
    %c0_147 = arith.constant 0 : index
    %270 = vector.load %arg2[%c8_145, %c0_146, %c0_147] : memref<9x4x4xf32, #tpu.memory_space<vmem>>, vector<1x4x4xf32>
    %271 = vector.shape_cast %270 : vector<1x4x4xf32> to vector<4x4xf32>
    %cst_148 = arith.constant dense<0.000000e+00> : vector<4x256xf32>
    %272 = tpu.matmul %271, %261, %cst_148 {dimension_numbers = #tpu.dot_dimension_numbers<[1], [0], [0], [1], [0, 0, 1, 1], [], []>, precision = #tpu.contract_precision<fp32>} : vector<4x4xf32>, vector<4x256xf32>, vector<4x256xf32> -> vector<4x256xf32>
    %273 = arith.addf %269, %272 : vector<4x256xf32>
    %cst_149 = arith.constant dense<0.000000e+00> : vector<4xf32>
    %274 = vector.multi_reduction <add>, %273, %cst_149 [1] : vector<4x256xf32> to vector<4xf32>
    %275 = vector.shape_cast %274 : vector<4xf32> to vector<4x1xf32>
    %cst_150 = arith.constant 2.560000e+02 : f32
    %276 = vector.broadcast %cst_150 : f32 to vector<4x1xf32>
    %277 = arith.divf %275, %276 : vector<4x1xf32>
    %278 = vector.broadcast %277 : vector<4x1xf32> to vector<4x256xf32>
    %279 = arith.subf %273, %278 : vector<4x256xf32>
    %280 = arith.mulf %279, %279 : vector<4x256xf32>
    %cst_151 = arith.constant dense<0.000000e+00> : vector<4xf32>
    %281 = vector.multi_reduction <add>, %280, %cst_151 [1] : vector<4x256xf32> to vector<4xf32>
    %282 = vector.shape_cast %281 : vector<4xf32> to vector<4x1xf32>
    %cst_152 = arith.constant 2.560000e+02 : f32
    %283 = vector.broadcast %cst_152 : f32 to vector<4x1xf32>
    %284 = arith.divf %282, %283 : vector<4x1xf32>
    %cst_153 = arith.constant 9.99999974E-6 : f32
    %285 = vector.broadcast %cst_153 : f32 to vector<4x1xf32>
    %286 = arith.addf %284, %285 : vector<4x1xf32>
    %287 = math.rsqrt %286 : vector<4x1xf32>
    %288 = vector.broadcast %287 : vector<4x1xf32> to vector<4x256xf32>
    %289 = arith.mulf %279, %288 : vector<4x256xf32>
    %cst_154 = arith.constant 0.000000e+00 : f32
    %290 = vector.broadcast %cst_154 : f32 to vector<4x256xf32>
    %291 = arith.maximumf %289, %290 : vector<4x256xf32>
    %c240_i32_155 = arith.constant 240 : i32
    %292 = tpu.dynamic_rotate %291 by %c240_i32_155 dim 1 : vector<4x256xf32>, i32 -> vector<4x256xf32>
    %c16_i32_156 = arith.constant 16 : i32
    %293 = tpu.dynamic_rotate %291 by %c16_i32_156 dim 1 : vector<4x256xf32>, i32 -> vector<4x256xf32>
    %294 = vector.shape_cast %18 : vector<1x256xi1> to vector<1x256xi1>
    %295 = vector.broadcast %294 : vector<1x256xi1> to vector<4x256xi1>
    %296 = arith.select %295, %292, %293 : vector<4x256xi1>, vector<4x256xf32>
    %297 = vector.shape_cast %20 : vector<1x256xi1> to vector<1x256xi1>
    %298 = vector.broadcast %297 : vector<1x256xi1> to vector<4x256xi1>
    %299 = arith.select %298, %293, %292 : vector<4x256xi1>, vector<4x256xf32>
    %cst_157 = arith.constant 0.000000e+00 : f32
    %300 = vector.broadcast %cst_157 : f32 to vector<4x256xf32>
    %c255_i32_158 = arith.constant 255 : i32
    %301 = tpu.dynamic_rotate %296 by %c255_i32_158 dim 1 : vector<4x256xf32>, i32 -> vector<4x256xf32>
    %c1_i32_159 = arith.constant 1 : i32
    %302 = tpu.dynamic_rotate %296 by %c1_i32_159 dim 1 : vector<4x256xf32>, i32 -> vector<4x256xf32>
    %303 = vector.shape_cast %22 : vector<1x256xi1> to vector<1x256xi1>
    %304 = vector.broadcast %303 : vector<1x256xi1> to vector<4x256xi1>
    %305 = arith.select %304, %301, %302 : vector<4x256xi1>, vector<4x256xf32>
    %306 = vector.shape_cast %24 : vector<1x256xi1> to vector<1x256xi1>
    %307 = vector.broadcast %306 : vector<1x256xi1> to vector<4x256xi1>
    %308 = arith.select %307, %302, %301 : vector<4x256xi1>, vector<4x256xf32>
    %c0_160 = arith.constant 0 : index
    %c0_161 = arith.constant 0 : index
    %c0_162 = arith.constant 0 : index
    %309 = vector.load %arg3[%c0_160, %c0_161, %c0_162] : memref<9x4x4xf32, #tpu.memory_space<vmem>>, vector<1x4x4xf32>
    %310 = vector.shape_cast %309 : vector<1x4x4xf32> to vector<4x4xf32>
    %cst_163 = arith.constant dense<0.000000e+00> : vector<4x256xf32>
    %311 = tpu.matmul %310, %305, %cst_163 {dimension_numbers = #tpu.dot_dimension_numbers<[1], [0], [0], [1], [0, 0, 1, 1], [], []>, precision = #tpu.contract_precision<fp32>} : vector<4x4xf32>, vector<4x256xf32>, vector<4x256xf32> -> vector<4x256xf32>
    %312 = arith.addf %300, %311 : vector<4x256xf32>
    %c1_164 = arith.constant 1 : index
    %c0_165 = arith.constant 0 : index
    %c0_166 = arith.constant 0 : index
    %313 = vector.load %arg3[%c1_164, %c0_165, %c0_166] : memref<9x4x4xf32, #tpu.memory_space<vmem>>, vector<1x4x4xf32>
    %314 = vector.shape_cast %313 : vector<1x4x4xf32> to vector<4x4xf32>
    %cst_167 = arith.constant dense<0.000000e+00> : vector<4x256xf32>
    %315 = tpu.matmul %314, %296, %cst_167 {dimension_numbers = #tpu.dot_dimension_numbers<[1], [0], [0], [1], [0, 0, 1, 1], [], []>, precision = #tpu.contract_precision<fp32>} : vector<4x4xf32>, vector<4x256xf32>, vector<4x256xf32> -> vector<4x256xf32>
    %316 = arith.addf %312, %315 : vector<4x256xf32>
    %c2_168 = arith.constant 2 : index
    %c0_169 = arith.constant 0 : index
    %c0_170 = arith.constant 0 : index
    %317 = vector.load %arg3[%c2_168, %c0_169, %c0_170] : memref<9x4x4xf32, #tpu.memory_space<vmem>>, vector<1x4x4xf32>
    %318 = vector.shape_cast %317 : vector<1x4x4xf32> to vector<4x4xf32>
    %cst_171 = arith.constant dense<0.000000e+00> : vector<4x256xf32>
    %319 = tpu.matmul %318, %308, %cst_171 {dimension_numbers = #tpu.dot_dimension_numbers<[1], [0], [0], [1], [0, 0, 1, 1], [], []>, precision = #tpu.contract_precision<fp32>} : vector<4x4xf32>, vector<4x256xf32>, vector<4x256xf32> -> vector<4x256xf32>
    %320 = arith.addf %316, %319 : vector<4x256xf32>
    %c255_i32_172 = arith.constant 255 : i32
    %321 = tpu.dynamic_rotate %291 by %c255_i32_172 dim 1 : vector<4x256xf32>, i32 -> vector<4x256xf32>
    %c1_i32_173 = arith.constant 1 : i32
    %322 = tpu.dynamic_rotate %291 by %c1_i32_173 dim 1 : vector<4x256xf32>, i32 -> vector<4x256xf32>
    %323 = vector.shape_cast %22 : vector<1x256xi1> to vector<1x256xi1>
    %324 = vector.broadcast %323 : vector<1x256xi1> to vector<4x256xi1>
    %325 = arith.select %324, %321, %322 : vector<4x256xi1>, vector<4x256xf32>
    %326 = vector.shape_cast %24 : vector<1x256xi1> to vector<1x256xi1>
    %327 = vector.broadcast %326 : vector<1x256xi1> to vector<4x256xi1>
    %328 = arith.select %327, %322, %321 : vector<4x256xi1>, vector<4x256xf32>
    %c3_174 = arith.constant 3 : index
    %c0_175 = arith.constant 0 : index
    %c0_176 = arith.constant 0 : index
    %329 = vector.load %arg3[%c3_174, %c0_175, %c0_176] : memref<9x4x4xf32, #tpu.memory_space<vmem>>, vector<1x4x4xf32>
    %330 = vector.shape_cast %329 : vector<1x4x4xf32> to vector<4x4xf32>
    %cst_177 = arith.constant dense<0.000000e+00> : vector<4x256xf32>
    %331 = tpu.matmul %330, %325, %cst_177 {dimension_numbers = #tpu.dot_dimension_numbers<[1], [0], [0], [1], [0, 0, 1, 1], [], []>, precision = #tpu.contract_precision<fp32>} : vector<4x4xf32>, vector<4x256xf32>, vector<4x256xf32> -> vector<4x256xf32>
    %332 = arith.addf %320, %331 : vector<4x256xf32>
    %c4_178 = arith.constant 4 : index
    %c0_179 = arith.constant 0 : index
    %c0_180 = arith.constant 0 : index
    %333 = vector.load %arg3[%c4_178, %c0_179, %c0_180] : memref<9x4x4xf32, #tpu.memory_space<vmem>>, vector<1x4x4xf32>
    %334 = vector.shape_cast %333 : vector<1x4x4xf32> to vector<4x4xf32>
    %cst_181 = arith.constant dense<0.000000e+00> : vector<4x256xf32>
    %335 = tpu.matmul %334, %291, %cst_181 {dimension_numbers = #tpu.dot_dimension_numbers<[1], [0], [0], [1], [0, 0, 1, 1], [], []>, precision = #tpu.contract_precision<fp32>} : vector<4x4xf32>, vector<4x256xf32>, vector<4x256xf32> -> vector<4x256xf32>
    %336 = arith.addf %332, %335 : vector<4x256xf32>
    %c5_182 = arith.constant 5 : index
    %c0_183 = arith.constant 0 : index
    %c0_184 = arith.constant 0 : index
    %337 = vector.load %arg3[%c5_182, %c0_183, %c0_184] : memref<9x4x4xf32, #tpu.memory_space<vmem>>, vector<1x4x4xf32>
    %338 = vector.shape_cast %337 : vector<1x4x4xf32> to vector<4x4xf32>
    %cst_185 = arith.constant dense<0.000000e+00> : vector<4x256xf32>
    %339 = tpu.matmul %338, %328, %cst_185 {dimension_numbers = #tpu.dot_dimension_numbers<[1], [0], [0], [1], [0, 0, 1, 1], [], []>, precision = #tpu.contract_precision<fp32>} : vector<4x4xf32>, vector<4x256xf32>, vector<4x256xf32> -> vector<4x256xf32>
    %340 = arith.addf %336, %339 : vector<4x256xf32>
    %c255_i32_186 = arith.constant 255 : i32
    %341 = tpu.dynamic_rotate %299 by %c255_i32_186 dim 1 : vector<4x256xf32>, i32 -> vector<4x256xf32>
    %c1_i32_187 = arith.constant 1 : i32
    %342 = tpu.dynamic_rotate %299 by %c1_i32_187 dim 1 : vector<4x256xf32>, i32 -> vector<4x256xf32>
    %343 = vector.shape_cast %22 : vector<1x256xi1> to vector<1x256xi1>
    %344 = vector.broadcast %343 : vector<1x256xi1> to vector<4x256xi1>
    %345 = arith.select %344, %341, %342 : vector<4x256xi1>, vector<4x256xf32>
    %346 = vector.shape_cast %24 : vector<1x256xi1> to vector<1x256xi1>
    %347 = vector.broadcast %346 : vector<1x256xi1> to vector<4x256xi1>
    %348 = arith.select %347, %342, %341 : vector<4x256xi1>, vector<4x256xf32>
    %c6_188 = arith.constant 6 : index
    %c0_189 = arith.constant 0 : index
    %c0_190 = arith.constant 0 : index
    %349 = vector.load %arg3[%c6_188, %c0_189, %c0_190] : memref<9x4x4xf32, #tpu.memory_space<vmem>>, vector<1x4x4xf32>
    %350 = vector.shape_cast %349 : vector<1x4x4xf32> to vector<4x4xf32>
    %cst_191 = arith.constant dense<0.000000e+00> : vector<4x256xf32>
    %351 = tpu.matmul %350, %345, %cst_191 {dimension_numbers = #tpu.dot_dimension_numbers<[1], [0], [0], [1], [0, 0, 1, 1], [], []>, precision = #tpu.contract_precision<fp32>} : vector<4x4xf32>, vector<4x256xf32>, vector<4x256xf32> -> vector<4x256xf32>
    %352 = arith.addf %340, %351 : vector<4x256xf32>
    %c7_192 = arith.constant 7 : index
    %c0_193 = arith.constant 0 : index
    %c0_194 = arith.constant 0 : index
    %353 = vector.load %arg3[%c7_192, %c0_193, %c0_194] : memref<9x4x4xf32, #tpu.memory_space<vmem>>, vector<1x4x4xf32>
    %354 = vector.shape_cast %353 : vector<1x4x4xf32> to vector<4x4xf32>
    %cst_195 = arith.constant dense<0.000000e+00> : vector<4x256xf32>
    %355 = tpu.matmul %354, %299, %cst_195 {dimension_numbers = #tpu.dot_dimension_numbers<[1], [0], [0], [1], [0, 0, 1, 1], [], []>, precision = #tpu.contract_precision<fp32>} : vector<4x4xf32>, vector<4x256xf32>, vector<4x256xf32> -> vector<4x256xf32>
    %356 = arith.addf %352, %355 : vector<4x256xf32>
    %c8_196 = arith.constant 8 : index
    %c0_197 = arith.constant 0 : index
    %c0_198 = arith.constant 0 : index
    %357 = vector.load %arg3[%c8_196, %c0_197, %c0_198] : memref<9x4x4xf32, #tpu.memory_space<vmem>>, vector<1x4x4xf32>
    %358 = vector.shape_cast %357 : vector<1x4x4xf32> to vector<4x4xf32>
    %cst_199 = arith.constant dense<0.000000e+00> : vector<4x256xf32>
    %359 = tpu.matmul %358, %348, %cst_199 {dimension_numbers = #tpu.dot_dimension_numbers<[1], [0], [0], [1], [0, 0, 1, 1], [], []>, precision = #tpu.contract_precision<fp32>} : vector<4x4xf32>, vector<4x256xf32>, vector<4x256xf32> -> vector<4x256xf32>
    %360 = arith.addf %356, %359 : vector<4x256xf32>
    %cst_200 = arith.constant dense<0.000000e+00> : vector<4xf32>
    %361 = vector.multi_reduction <add>, %360, %cst_200 [1] : vector<4x256xf32> to vector<4xf32>
    %362 = vector.shape_cast %361 : vector<4xf32> to vector<4x1xf32>
    %cst_201 = arith.constant 2.560000e+02 : f32
    %363 = vector.broadcast %cst_201 : f32 to vector<4x1xf32>
    %364 = arith.divf %362, %363 : vector<4x1xf32>
    %365 = vector.broadcast %364 : vector<4x1xf32> to vector<4x256xf32>
    %366 = arith.subf %360, %365 : vector<4x256xf32>
    %367 = arith.mulf %366, %366 : vector<4x256xf32>
    %cst_202 = arith.constant dense<0.000000e+00> : vector<4xf32>
    %368 = vector.multi_reduction <add>, %367, %cst_202 [1] : vector<4x256xf32> to vector<4xf32>
    %369 = vector.shape_cast %368 : vector<4xf32> to vector<4x1xf32>
    %cst_203 = arith.constant 2.560000e+02 : f32
    %370 = vector.broadcast %cst_203 : f32 to vector<4x1xf32>
    %371 = arith.divf %369, %370 : vector<4x1xf32>
    %cst_204 = arith.constant 9.99999974E-6 : f32
    %372 = vector.broadcast %cst_204 : f32 to vector<4x1xf32>
    %373 = arith.addf %371, %372 : vector<4x1xf32>
    %374 = math.rsqrt %373 : vector<4x1xf32>
    %375 = vector.broadcast %374 : vector<4x1xf32> to vector<4x256xf32>
    %376 = arith.mulf %366, %375 : vector<4x256xf32>
    %377 = arith.addf %204, %376 : vector<4x256xf32>
    %c1_205 = arith.constant 1 : index
    %c0_206 = arith.constant 0 : index
    %c0_207 = arith.constant 0 : index
    %378 = vector.load %arg4[%c1_205, %c0_206, %c0_207] : memref<2x4x256xf32, #tpu.memory_space<vmem>>, vector<1x4x256xf32>
    %379 = vector.shape_cast %378 : vector<1x4x256xf32> to vector<4x256xf32>
    %380 = vector.shape_cast %377 : vector<4x256xf32> to vector<1x4x256xf32>
    tpu.vector_store %arg4[%c1_205, %c0_206, %c0_207], %380 {strides = array<i32>} : memref<2x4x256xf32, #tpu.memory_space<vmem>>, vector<1x4x256xf32>,
    return
  }
  func.func @transform_0(%arg0: i32) -> (i32, i32, i32) {
    %c0_i32 = arith.constant 0 : i32
    %c0_i32_0 = arith.constant 0 : i32
    %c0_i32_1 = arith.constant 0 : i32
    return %arg0, %c0_i32, %c0_i32_0 : i32, i32, i32
  }
  func.func @transform_1(%arg0: i32) -> (i32, i32, i32) {
    %c0_i32 = arith.constant 0 : i32
    %c0_i32_0 = arith.constant 0 : i32
    %c0_i32_1 = arith.constant 0 : i32
    %c0_i32_2 = arith.constant 0 : i32
    return %c0_i32, %c0_i32_0, %c0_i32_1 : i32, i32, i32
  }
  func.func @transform_2(%arg0: i32) -> (i32, i32, i32) {
    %c0_i32 = arith.constant 0 : i32
    %c0_i32_0 = arith.constant 0 : i32
    %c0_i32_1 = arith.constant 0 : i32
    %c0_i32_2 = arith.constant 0 : i32
    return %c0_i32, %c0_i32_0, %c0_i32_1 : i32, i32, i32
  }
  func.func @transform_3(%arg0: i32) -> (i32, i32, i32) {
    %c0_i32 = arith.constant 0 : i32
    %c0_i32_0 = arith.constant 0 : i32
    %c0_i32_1 = arith.constant 0 : i32
    return %arg0, %c0_i32, %c0_i32_0 : i32, i32, i32
  }
}

</mosaic_0001>

<bundles_post_ra>
// kernel: tpu_custom_call.1
= control target key start
LH: loop header
LB: loop body
LE: loop exit
PB: predicated region body
PF: predicated region fallthrough
CT: control target
= control target key end

     0   :  { %s18120_s14 = smov 16   ;;  %s18121_s15 = smov 112   ;;  %s19514_s0 = inlined_call_operand.vmem [shape: f32[2,4,256], index: 0, kind: input, shape index: {}]   ;;  %s19515_s1 = inlined_call_operand.vmem [shape: f32[9,4,4], index: 1, kind: input, shape index: {}]   ;;  %s19516_s2 = inlined_call_operand.vmem [shape: f32[9,4,4], index: 2, kind: input, shape index: {}]   ;;  %s19517_s3 = inlined_call_operand.hbm [shape: f32[2,4,256], index: 3, kind: output, shape index: {}]  }
   0x1   :  { %v18151_v0 = vld [vmem:[%s19514_s0] sm:$0xff] }
   0x2   :  { %61 = vrot.lane.b32.xlu1 %v18151_v0, %s18120_s14  ;;  %54 = vrot.lane.b32.xlu0 %v18151_v0, %s18121_s15  ;;  %v18159_v1 = vcombine.high %v18151_v0, %v18151_v0 }
   0x3   :  { %8 = vsyncpa [#allocation3], 0  ;;  %v18122_v2 = vmov 0.0   ;;  %v17618_v3 = vld [vmem:[%s19515_s1 + $0x4] sm:$0xf]  ;;  %vm108_vm0 = vcmask 31744   ;;  %v15_v6 = vlaneseq }
   0x4   :  { %185 = vmatprep.mubr.f32.mxu0 %v18122_v2  ;;  %4567 = vmatprep.mubr.f32.mxu1 %v18122_v2  ;;  %v110_v4 = vsel %vm108_vm0, %v17618_v3, 0  ;;  %vm112_vm3 = vcmask 1043456   ;;  %s18123_s18 = smov 127   ;;  %s18124_s19 = smov 1   ;;  %v105_v35 = vld [vmem:[%s19515_s1] sm:$0xf] }
   0x5   :  { %v18171_v5 = vand.u32 4294901760, %v110_v4  ;;  %v18174_v8 = vand.u32 127, %v15_v6  ;;  %v585_v36 = vsel %vm108_vm0, %v105_v35, 0  ;;  %v17619_v35 = vld [vmem:[%s19515_s1 + $0x8] sm:$0xf]  ;;  %s18125_s20 = smov [#allocation2]  }
   0x6   :  { %63 = vrot.lane.b32.xlu1 %v18159_v1, %s18120_s14  ;;  %56 = vrot.lane.b32.xlu0 %v18159_v1, %s18121_s15  ;;  %v18234_v37 = vand.u32 4294901760, %v585_v36  ;;  %s17607_s21 = sshll.u32 %s18125_s20, 4  ;;  %s17608_s21 = int_to_ptr.vmem [resolvable:$true] %s17607_s21 }
   0x7   :  { %v187_v7 = vsub.f32 %v110_v4, %v18171_v5  ;;  %vm42_vm1 = vcmp.lt.s32.totalorder %v18174_v8, 16  ;;  %vm58_vm2 = vcmp.lt.s32.totalorder %v18174_v8, 112  ;;  %v18199_v30 = vadd.s32 128, %v18174_v8  ;;  %s18096_s24 = scalar_lea.vmem %s17608_s21, 256  ;;  %p18101_p1 = scmp.lt.s32.totalorder %s17608_s21, %s17608_s21 }
   0x8   :  { %v18237_v38 = vsub.f32 %v585_v36, %v18234_v37  ;;  %v22_v41 = vand.u32 15, %v18174_v8  ;;  %vm83_vm5 = vcmp.lt.s32.totalorder %v18174_v8, 127  ;;  %vm90_vm6 = vcmp.lt.s32.totalorder %v18174_v8, 1  ;;  %p18097_p0 = scmp.ne.s32.totalorder %s17608_s21, %s18096_s24  ;;  %p18102_p2 = scmp.lt.s32.totalorder %s18096_s24, %s18096_s24 }
   0x9   :  { %v188_v9 = vand.u32 4294901760, %v187_v7  ;;  %vm45_vm4 = vcmp.ge.s32.totalorder %v18199_v30, 240  ;;  %v29_v39 = vand.u32 15, %v18199_v30 }
   0xa   :  { %v662_v43 = vand.u32 4294901760, %v18237_v38  ;;  %vm18248_vm8 = vcmp.eq.s32.totalorder %v22_v41, 0  ;;  %vm18291_vm10 = vcmp.eq.s32.totalorder %v22_v41, 15  ;;  %p18103_p3 = por %p18102_p2, %p18101_p1 }
   0xb   :  { %v189_v12 = vsub.f32 %v187_v7, %v188_v9  ;;  %vm18244_vm7 = vcmp.eq.s32.totalorder %v29_v39, 0  ;;  %vm18287_vm9 = vcmp.eq.s32.totalorder %v29_v39, 15 }
   0xc   :  { %v663_v48 = vsub.f32 %v18237_v38, %v662_v43  ;;  %p18104_p4 = pnand %p18103_p3, %p18097_p0 }
   0xd   :  { %v190_v22 = vand.u32 4294901760, %v189_v12 }
   0xe   :  { %v664_v61 = vand.u32 4294901760, %v663_v48 }
  0x74   :  { %v62_v10 = vpop.permute.xlu1 %61  ;;  %v55_v11 = vpop.permute.xlu0 %54 }
  0x78   :  { %v64_v13 = vpop.permute.xlu1 %63  ;;  %v57_v14 = vpop.permute.xlu0 %56 }
  0x79   :  { %v65_v15 = vsel %vm42_vm1, %v62_v10, %v64_v13  ;;  %v66_v16 = vsel %vm42_vm1, %v64_v13, %v62_v10  ;;  %v18184_v17 = vsel %vm58_vm2, %v55_v11, %v57_v14  ;;  %v60_v33 = vsel %vm58_vm2, %v57_v14, %v55_v11 }
  0x7a   :  { %v117_v18 = vsel %vm112_vm3, %v65_v15, 0  ;;  %81 = vrot.lane.b32.xlu1 %v65_v15, %s18123_s18  ;;  %v71_v19 = vsel %vm42_vm1, %v18184_v17, %v66_v16  ;;  %v18214_v34 = vsel %vm45_vm4, %v65_v15, %v60_v33 }
  0x7b   :  { %v119_v20 = vand.u32 4294901760, %v117_v18  ;;  %79 = vrot.lane.b32.xlu0 %v71_v19, %s18123_s18  ;;  %v114_v21 = vsel %vm112_vm3, %v71_v19, 0 }
  0x7c   :  { %v121_v23 = vand.u32 4294901760, %v114_v21 }
  0x7d   :  { %v198_v24 = vsub.f32 %v117_v18, %v119_v20  ;;  %120 = vmatprep.subr.mxu0 %v119_v20 }
  0x7e   :  { %v204_v25 = vsub.f32 %v114_v21, %v121_v23  ;;  %88 = vrot.lane.b32.xlu1 %v65_v15, %s18124_s19  ;;  %122 = vmatpush1.msra.mxu0 %v121_v23 }
  0x7f   :  { %86 = vrot.lane.b32.xlu0 %v71_v19, %s18124_s19  ;;  %191 = vmatmul.mubr.f32.vlgmr.msra.gmra.mrb[0].mxu0 %v190_v22  ;;  %v199_v26 = vand.u32 4294901760, %v198_v24 }
  0x80   :  { %v205_v27 = vand.u32 4294901760, %v204_v25  ;;  %271 = vmatprep.mubr.f32.mxu0 %v18122_v2 }
  0x81   :  { %v200_v28 = vsub.f32 %v198_v24, %v199_v26 }
  0x82   :  { %1538 = vrot.lane.b32.xlu1 %v18159_v1, %s18123_s18  ;;  %v206_v29 = vsub.f32 %v204_v25, %v205_v27 }
  0x83   :  { %1536 = vrot.lane.b32.xlu0 %v18151_v0, %s18123_s18  ;;  %v201_v31 = vand.u32 4294901760, %v200_v28 }
  0x84   :  { %v207_v32 = vand.u32 4294901760, %v206_v29 }
  0x85   :  { %202 = vmatprep.subr.mxu0 %v201_v31 }
  0x86   :  { %1544 = vrot.lane.b32.xlu1 %v18159_v1, %s18124_s19  ;;  %208 = vmatpush1.msra.mxu0 %v207_v32 }
  0x87   :  { %1542 = vrot.lane.b32.xlu0 %v18151_v0, %s18124_s19  ;;  %273 = vmatmul.mubr.f32.vlgmr.msra.gmra.mrb[0].mxu0 %v18171_v5 }
  0x88   :  { %281 = vmatprep.subr.mxu0 %v198_v24  ;;  %347 = vmatprep.mubr.f32.mxu0 %v18122_v2 }
  0x89   :  { %284 = vmatpush1.msra.mxu0 %v204_v25 }
  0x8a   :  { %357 = vmatprep.subr.mxu0 %v119_v20  ;;  %2986 = vrot.lane.b32.xlu1 %v18214_v34, %s18123_s18 }
  0x8b   :  { %2984 = vrot.lane.b32.xlu0 %v18184_v17, %s18123_s18 }
  0x8e   :  { %2992 = vrot.lane.b32.xlu1 %v18214_v34, %s18124_s19 }
  0x8f   :  { %2990 = vrot.lane.b32.xlu0 %v18184_v17, %s18124_s19  ;;  %350 = vmatmul.mubr.f32.vlgmr.msra.gmra.mrb[0].mxu0 %v187_v7 }
  0x90   :  { %359 = vmatpush1.msra.mxu0 %v121_v23  ;;  %422 = vmatprep.mubr.f32.mxu0 %v18122_v2 }
  0x91   :  { %435 = vmatprep.subr.mxu0 %v199_v26 }
  0x97   :  { %426 = vmatmul.mubr.f32.vlgmr.msra.gmra.mrb[0].mxu0 %v188_v9 }
  0x98   :  { %439 = vmatpush1.msra.mxu0 %v205_v27  ;;  %502 = vmatprep.mubr.f32.mxu0 %v18122_v2 }
  0x99   :  { %511 = vmatprep.subr.mxu0 %v119_v20 }
  0x9f   :  { %504 = vmatmul.mubr.f32.vlgmr.msra.gmra.mrb[0].mxu0 %v18171_v5 }
  0xa0   :  { %513 = vmatpush1.msra.mxu0 %v121_v23  ;;  %576 = vmatprep.mubr.f32.mxu0 %v18122_v2 }
  0xa7   :  { %578 = vmatmul.mubr.f32.vlgmr.msra.gmra.mrb[0].mxu0 %v18171_v5 }
  0xa8   :  { %659 = vmatprep.mubr.f32.mxu0 %v18122_v2 }
  0xec   :  { %v82_v40 = vpop.permute.xlu1 %81 }
  0xed   :  { %v80_v42 = vpop.permute.xlu0 %79 }
  0xee   :  { %v18257_v49 = vsel %vm83_vm5, %v80_v42, %v82_v40  ;;  %v85_v50 = vsel %vm83_vm5, %v82_v40, %v80_v42  ;;  %v1061_v40 = vsel %vm108_vm0, %v17619_v35, 0 }
  0xf0   :  { %v89_v45 = vpop.permute.xlu1 %88 }
  0xf1   :  { %v87_v47 = vpop.permute.xlu0 %86 }
  0xf2   :  { %v91_v51 = vsel %vm90_vm6, %v87_v47, %v89_v45  ;;  %v18265_v52 = vsel %vm90_vm6, %v89_v45, %v87_v47  ;;  %v18356_v45 = vand.u32 4294901760, %v1061_v40 }
  0xf3   :  { %v97_v53 = vsel %vm18248_vm8, %v18257_v49, %v18265_v52  ;;  %v98_v54 = vsel %vm18244_vm7, %v85_v50, %v91_v51  ;;  %v104_v32 = vsel %vm18287_vm9, %v91_v51, %v85_v50  ;;  %v103_v39 = vsel %vm18291_vm10, %v18265_v52, %v18257_v49 }
  0xf4   :  { %v588_v55 = vsel %vm112_vm3, %v97_v53, 0  ;;  %v591_v56 = vsel %vm112_vm3, %v98_v54, 0  ;;  %v1539_v57 = vpop.permute.xlu1 %1538  ;;  %v1067_v33 = vsel %vm112_vm3, %v104_v32, 0  ;;  %v1064_v41 = vsel %vm112_vm3, %v103_v39, 0 }
  0xf5   :  { %v593_v58 = vand.u32 4294901760, %v591_v56  ;;  %v18275_v59 = vand.u32 4294901760, %v588_v55  ;;  %v1537_v60 = vpop.permute.xlu0 %1536  ;;  %v1069_v36 = vand.u32 4294901760, %v1067_v33  ;;  %v1071_v47 = vand.u32 4294901760, %v1064_v41 }
  0xf6   :  { %v18280_v3 = vsel %vm83_vm5, %v1537_v60, %v1539_v57  ;;  %v18284_v4 = vsel %vm83_vm5, %v1539_v57, %v1537_v60  ;;  %v18368_v57 = vld [vmem:[%s19514_s0 + $0x8] sm:$0xff] }
  0xf7   :  { %v672_v62 = vsub.f32 %v591_v56, %v593_v58  ;;  %v678_v63 = vsub.f32 %v588_v55, %v18275_v59  ;;  %594 = vmatprep.subr.mxu0 %v593_v58  ;;  %v1148_v42 = vsub.f32 %v1067_v33, %v1069_v36  ;;  %v1154_v48 = vsub.f32 %v1064_v41, %v1071_v47 }
  0xf8   :  { %v1545_v5 = vpop.permute.xlu1 %1544  ;;  %596 = vmatpush1.msra.mxu0 %v18275_v59  ;;  %8849 = vrot.lane.b32.xlu0 %v18368_v57, %s18121_s15 }
  0xf9   :  { %v1543_v9 = vpop.permute.xlu0 %1542  ;;  %665 = vmatmul.mubr.f32.vlgmr.msra.gmra.mrb[0].mxu0 %v664_v61  ;;  %v673_v12 = vand.u32 4294901760, %v672_v62  ;;  %v679_v13 = vand.u32 4294901760, %v678_v63  ;;  %v1155_v51 = vand.u32 4294901760, %v1154_v48  ;;  %v17620_v61 = vld [vmem:[%s19515_s1 + $0xc] sm:$0xf] }
  0xfa   :  { %v18297_v10 = vsel %vm90_vm6, %v1543_v9, %v1545_v5  ;;  %v18301_v11 = vsel %vm90_vm6, %v1545_v5, %v1543_v9  ;;  %745 = vmatprep.mubr.f32.mxu0 %v18122_v2 }
  0xfb   :  { %v1550_v14 = vsel %vm18291_vm10, %v18301_v11, %v18280_v3  ;;  %v1551_v15 = vsel %vm18287_vm9, %v18297_v10, %v18284_v4  ;;  %v674_v20 = vsub.f32 %v672_v62, %v673_v12  ;;  %v680_v21 = vsub.f32 %v678_v63, %v679_v13 }
  0xfc   :  { %v2987_v16 = vpop.permute.xlu1 %2986  ;;  %v1156_v54 = vsub.f32 %v1154_v48, %v1155_v51  ;;  %8855 = vrot.lane.b32.xlu0 %v18368_v57, %s18120_s14 }
  0xfd   :  { %v2985_v18 = vpop.permute.xlu0 %2984  ;;  %v675_v22 = vand.u32 4294901760, %v674_v20  ;;  %v681_v24 = vand.u32 4294901760, %v680_v21 }
  0xfe   :  { %v18314_v19 = vsel %vm83_vm5, %v2985_v18, %v2987_v16  ;;  %v18318_v26 = vsel %vm83_vm5, %v2987_v16, %v2985_v18  ;;  %v1157_v56 = vand.u32 4294901760, %v1156_v54 }
  0xff   :  { %676 = vmatprep.subr.mxu0 %v675_v22 }
 0x100   :  { %v2993_v23 = vpop.permute.xlu1 %2992  ;;  %682 = vmatpush1.msra.mxu0 %v681_v24 }
 0x101   :  { %v2991_v25 = vpop.permute.xlu0 %2990  ;;  %747 = vmatmul.mubr.f32.vlgmr.msra.gmra.mrb[0].mxu0 %v18234_v37  ;;  %755 = vmatprep.subr.mxu0 %v672_v62  ;;  %v1548_v62 = vsel %vm18248_vm8, %v18280_v3, %v18301_v11 }
 0x102   :  { %v18322_v27 = vsel %vm90_vm6, %v2991_v25, %v2993_v23  ;;  %v18326_v28 = vsel %vm90_vm6, %v2993_v23, %v2991_v25  ;;  %758 = vmatpush1.msra.mxu0 %v678_v63  ;;  %821 = vmatprep.mubr.f32.mxu0 %v18122_v2  ;;  %v1555_v63 = vsel %vm108_vm0, %v17620_v61, 0  ;;  %v1558_v9 = vsel %vm112_vm3, %v1548_v62, 0 }
 0x103   :  { %v2998_v29 = vsel %vm18291_vm10, %v18326_v28, %v18314_v19  ;;  %v2999_v31 = vsel %vm18287_vm9, %v18322_v27, %v18318_v26  ;;  %831 = vmatprep.subr.mxu0 %v593_v58  ;;  %v1565_v16 = vand.u32 4294901760, %v1558_v9 }
 0x105   :  { %v1648_v21 = vsub.f32 %v1558_v9, %v1565_v16 }
 0x107   :  { %v1649_v24 = vand.u32 4294901760, %v1648_v21 }
 0x109   :  { %824 = vmatmul.mubr.f32.vlgmr.msra.gmra.mrb[0].mxu0 %v18237_v38  ;;  %v1149_v38 = vand.u32 4294901760, %v1148_v42  ;;  %v1650_v32 = vsub.f32 %v1648_v21, %v1649_v24 }
 0x10a   :  { %833 = vmatpush1.msra.mxu0 %v18275_v59  ;;  %896 = vmatprep.mubr.f32.mxu0 %v18122_v2 }
 0x10b   :  { %909 = vmatprep.subr.mxu0 %v673_v12  ;;  %v1150_v49 = vsub.f32 %v1148_v42, %v1149_v38  ;;  %v1630_v12 = vand.u32 4294901760, %v1555_v63  ;;  %v1651_v35 = vand.u32 4294901760, %v1650_v32 }
 0x10d   :  { %v1151_v52 = vand.u32 4294901760, %v1150_v49  ;;  %v1631_v18 = vsub.f32 %v1555_v63, %v1630_v12 }
 0x10f   :  { %v1632_v22 = vand.u32 4294901760, %v1631_v18 }
 0x111   :  { %900 = vmatmul.mubr.f32.vlgmr.msra.gmra.mrb[0].mxu0 %v662_v43  ;;  %v1137_v43 = vsub.f32 %v1061_v40, %v18356_v45  ;;  %v1633_v25 = vsub.f32 %v1631_v18, %v1632_v22  ;;  %v17621_v40 = vld [vmem:[%s19515_s1 + $0x10] sm:$0xf] }
 0x112   :  { %913 = vmatpush1.msra.mxu0 %v679_v13  ;;  %976 = vmatprep.mubr.f32.mxu0 %v18122_v2  ;;  %v2033_v41 = vsel %vm108_vm0, %v17621_v40, 0  ;;  %v17623_v40 = vld [vmem:[%s19515_s1 + $0x18] sm:$0xf] }
 0x113   :  { %985 = vmatprep.subr.mxu0 %v593_v58  ;;  %v1138_v50 = vand.u32 4294901760, %v1137_v43  ;;  %v1549_v58 = vsel %vm18244_vm7, %v18284_v4, %v18297_v10  ;;  %v1634_v33 = vand.u32 4294901760, %v1633_v25  ;;  %v2512_v10 = vsel %vm112_vm3, %v1550_v14, 0 }
 0x114   :  { %v2519_v3 = vand.u32 4294901760, %v2512_v10 }
 0x115   :  { %v1139_v53 = vsub.f32 %v1137_v43, %v1138_v50 }
 0x117   :  { %v1140_v55 = vand.u32 4294901760, %v1139_v53 }
 0x119   :  { %978 = vmatmul.mubr.f32.vlgmr.msra.gmra.mrb[0].mxu0 %v18234_v37 }
 0x11a   :  { %987 = vmatpush1.msra.mxu0 %v18275_v59  ;;  %1050 = vmatprep.mubr.f32.mxu0 %v18122_v2  ;;  %v1561_v59 = vsel %vm112_vm3, %v1549_v58, 0 }
 0x11b   :  { %1070 = vmatprep.subr.mxu0 %v1069_v36  ;;  %v1563_v60 = vand.u32 4294901760, %v1561_v59 }
 0x11d   :  { %v1642_v5 = vsub.f32 %v1561_v59, %v1563_v60  ;;  %v17622_v59 = vld [vmem:[%s19515_s1 + $0x14] sm:$0xf] }
 0x11e   :  { %v2509_v62 = vsel %vm108_vm0, %v17622_v59, 0  ;;  %v3487_v59 = vsel %vm112_vm3, %v18214_v34, 0 }
 0x11f   :  { %v1643_v13 = vand.u32 4294901760, %v1642_v5 }
 0x121   :  { %1052 = vmatmul.mubr.f32.vlgmr.msra.gmra.mrb[0].mxu0 %v18234_v37  ;;  %v18374_v37 = vcombine.high %v18368_v57, %v18368_v57  ;;  %v1644_v20 = vsub.f32 %v1642_v5, %v1643_v13 }
 0x122   :  { %1072 = vmatpush1.msra.mxu0 %v1071_v47  ;;  %1135 = vmatprep.mubr.f32.mxu0 %v18122_v2 }
 0x123   :  { %1152 = vmatprep.subr.mxu0 %v1151_v52  ;;  %8851 = vrot.lane.b32.xlu1 %v18374_v37, %s18121_s15  ;;  %v1645_v23 = vand.u32 4294901760, %v1644_v20 }
 0x127   :  { %8857 = vrot.lane.b32.xlu1 %v18374_v37, %s18120_s14 }
 0x129   :  { %1141 = vmatmul.mubr.f32.vlgmr.msra.gmra.mrb[0].mxu0 %v1140_v55 }
 0x12a   :  { %1158 = vmatpush1.msra.mxu0 %v1157_v56  ;;  %1221 = vmatprep.mubr.f32.mxu0 %v18122_v2  ;;  %v2515_v56 = vsel %vm112_vm3, %v1551_v15, 0 }
 0x12b   :  { %1231 = vmatprep.subr.mxu0 %v1148_v42  ;;  %v2035_v42 = vsel %vm112_vm3, %v18151_v0, 0  ;;  %v18434_v61 = vand.u32 4294901760, %v2515_v56 }
 0x12d   :  { %v2596_v15 = vsub.f32 %v2515_v56, %v18434_v61 }
 0x12f   :  { %v2597_v11 = vand.u32 4294901760, %v2596_v15 }
 0x131   :  { %1223 = vmatmul.mubr.f32.vlgmr.msra.gmra.mrb[0].mxu0 %v18356_v45  ;;  %v2598_v20 = vsub.f32 %v2596_v15, %v2597_v11 }
 0x132   :  { %1234 = vmatpush1.msra.mxu0 %v1154_v48  ;;  %1297 = vmatprep.mubr.f32.mxu0 %v18122_v2 }
 0x133   :  { %1307 = vmatprep.subr.mxu0 %v1069_v36 }
 0x139   :  { %1300 = vmatmul.mubr.f32.vlgmr.msra.gmra.mrb[0].mxu0 %v1137_v43 }
 0x13a   :  { %1309 = vmatpush1.msra.mxu0 %v1071_v47  ;;  %1372 = vmatprep.mubr.f32.mxu0 %v18122_v2 }
 0x13b   :  { %1385 = vmatprep.subr.mxu0 %v1149_v38  ;;  %v2041_v38 = vand.u32 4294901760, %v2035_v42 }
 0x13d   :  { %v2124_v48 = vsub.f32 %v2035_v42, %v2041_v38  ;;  %v2996_v42 = vsel %vm18248_vm8, %v18314_v19, %v18326_v28 }
 0x141   :  { %1376 = vmatmul.mubr.f32.vlgmr.msra.gmra.mrb[0].mxu0 %v1138_v50 }
 0x142   :  { %1389 = vmatpush1.msra.mxu0 %v1155_v51  ;;  %1452 = vmatprep.mubr.f32.mxu0 %v18122_v2  ;;  %v2125_v51 = vand.u32 4294901760, %v2124_v48 }
 0x143   :  { %1461 = vmatprep.subr.mxu0 %v1069_v36  ;;  %v2037_v36 = vsel %vm112_vm3, %v18159_v1, 0 }
 0x144   :  { %v2039_v39 = vand.u32 4294901760, %v2037_v36  ;;  %v2126_v0 = vsub.f32 %v2124_v48, %v2125_v51 }
 0x146   :  { %v2127_v55 = vand.u32 4294901760, %v2126_v0 }
 0x149   :  { %1454 = vmatmul.mubr.f32.vlgmr.msra.gmra.mrb[0].mxu0 %v18356_v45 }
 0x14a   :  { %1463 = vmatpush1.msra.mxu0 %v1071_v47  ;;  %1526 = vmatprep.mubr.f32.mxu0 %v18122_v2  ;;  %v18416_v47 = vand.u32 4294901760, %v2033_v41 }
 0x14b   :  { %1564 = vmatprep.subr.mxu0 %v1563_v60 }
 0x14c   :  { %v2107_v43 = vsub.f32 %v2033_v41, %v18416_v47 }
 0x14e   :  { %v2108_v50 = vand.u32 4294901760, %v2107_v43 }
 0x150   :  { %v2109_v53 = vsub.f32 %v2107_v43, %v2108_v50 }
 0x151   :  { %1528 = vmatmul.mubr.f32.vlgmr.msra.gmra.mrb[0].mxu0 %v18356_v45  ;;  %v2118_v45 = vsub.f32 %v2037_v36, %v2039_v39 }
 0x152   :  { %1566 = vmatpush1.msra.mxu0 %v1565_v16  ;;  %1629 = vmatprep.mubr.f32.mxu0 %v18122_v2  ;;  %v2110_v54 = vand.u32 4294901760, %v2109_v53 }
 0x153   :  { %1646 = vmatprep.subr.mxu0 %v1645_v23  ;;  %v2119_v1 = vand.u32 4294901760, %v2118_v45  ;;  %v2599_v23 = vand.u32 4294901760, %v2598_v20 }
 0x155   :  { %v2120_v49 = vsub.f32 %v2118_v45, %v2119_v1 }
 0x157   :  { %v2121_v52 = vand.u32 4294901760, %v2120_v49 }
 0x159   :  { %1635 = vmatmul.mubr.f32.vlgmr.msra.gmra.mrb[0].mxu0 %v1634_v33 }
 0x15a   :  { %1652 = vmatpush1.msra.mxu0 %v1651_v35  ;;  %1715 = vmatprep.mubr.f32.mxu0 %v18122_v2  ;;  %v2997_v35 = vsel %vm18244_vm7, %v18318_v26, %v18322_v27  ;;  %v3962_v26 = vsel %vm112_vm3, %v2998_v29, 0 }
 0x15b   :  { %1725 = vmatprep.subr.mxu0 %v1642_v5  ;;  %v18449_v5 = vand.u32 4294901760, %v2509_v62 }
 0x15d   :  { %v2585_v14 = vsub.f32 %v2509_v62, %v18449_v5 }
 0x161   :  { %1717 = vmatmul.mubr.f32.vlgmr.msra.gmra.mrb[0].mxu0 %v1630_v12 }
 0x162   :  { %1728 = vmatpush1.msra.mxu0 %v1648_v21  ;;  %1791 = vmatprep.mubr.f32.mxu0 %v18122_v2  ;;  %v2586_v21 = vand.u32 4294901760, %v2585_v14 }
 0x163   :  { %1801 = vmatprep.subr.mxu0 %v1563_v60 }
 0x169   :  { %1794 = vmatmul.mubr.f32.vlgmr.msra.gmra.mrb[0].mxu0 %v1631_v18  ;;  %v2602_v18 = vsub.f32 %v2512_v10, %v2519_v3 }
 0x16a   :  { %1803 = vmatpush1.msra.mxu0 %v1565_v16  ;;  %1866 = vmatprep.mubr.f32.mxu0 %v18122_v2  ;;  %v8850_v58 = vpop.permute.xlu0 %8849 }
 0x16b   :  { %1879 = vmatprep.subr.mxu0 %v1643_v13 }
 0x16e   :  { %v8856_v63 = vpop.permute.xlu0 %8855 }
 0x171   :  { %1870 = vmatmul.mubr.f32.vlgmr.msra.gmra.mrb[0].mxu0 %v1632_v22  ;;  %v2603_v22 = vand.u32 4294901760, %v2602_v18 }
 0x172   :  { %1883 = vmatpush1.msra.mxu0 %v1649_v24  ;;  %1946 = vmatprep.mubr.f32.mxu0 %v18122_v2  ;;  %v2587_v24 = vsub.f32 %v2585_v14, %v2586_v21 }
 0x173   :  { %1955 = vmatprep.subr.mxu0 %v1563_v60  ;;  %v2604_v25 = vsub.f32 %v2602_v18, %v2603_v22 }
 0x174   :  { %v2588_v32 = vand.u32 4294901760, %v2587_v24 }
 0x175   :  { %v2605_v33 = vand.u32 4294901760, %v2604_v25  ;;  %v3965_v25 = vsel %vm112_vm3, %v2999_v31, 0 }
 0x179   :  { %1948 = vmatmul.mubr.f32.vlgmr.msra.gmra.mrb[0].mxu0 %v1630_v12 }
 0x17a   :  { %1957 = vmatpush1.msra.mxu0 %v1565_v16  ;;  %2020 = vmatprep.mubr.f32.mxu0 %v18122_v2 }
 0x17b   :  { %2040 = vmatprep.subr.mxu0 %v2039_v39 }
 0x181   :  { %2022 = vmatmul.mubr.f32.vlgmr.msra.gmra.mrb[0].mxu0 %v1630_v12 }
 0x182   :  { %2042 = vmatpush1.msra.mxu0 %v2041_v38  ;;  %2105 = vmatprep.mubr.f32.mxu0 %v18122_v2 }
 0x183   :  { %2122 = vmatprep.subr.mxu0 %v2121_v52 }
 0x189   :  { %2111 = vmatmul.mubr.f32.vlgmr.msra.gmra.mrb[0].mxu0 %v2110_v54 }
 0x18a   :  { %2128 = vmatpush1.msra.mxu0 %v2127_v55  ;;  %2191 = vmatprep.mubr.f32.mxu0 %v18122_v2 }
 0x18b   :  { %2201 = vmatprep.subr.mxu0 %v2118_v45  ;;  %v3003_v45 = vsel %vm108_vm0, %v17623_v40, 0  ;;  %v3969_v40 = vand.u32 4294901760, %v3962_v26 }
 0x191   :  { %2193 = vmatmul.mubr.f32.vlgmr.msra.gmra.mrb[0].mxu0 %v18416_v47 }
 0x192   :  { %2204 = vmatpush1.msra.mxu0 %v2124_v48  ;;  %2267 = vmatprep.mubr.f32.mxu0 %v18122_v2 }
 0x193   :  { %2277 = vmatprep.subr.mxu0 %v2039_v39 }
 0x195   :  { %v8852_v60 = vpop.permute.xlu1 %8851 }
 0x196   :  { %v18440_v4 = vsel %vm58_vm2, %v8850_v58, %v8852_v60 }
 0x199   :  { %2270 = vmatmul.mubr.f32.vlgmr.msra.gmra.mrb[0].mxu0 %v2107_v43  ;;  %v8858_v9 = vpop.permute.xlu1 %8857 }
 0x19a   :  { %2279 = vmatpush1.msra.mxu0 %v2041_v38  ;;  %2342 = vmatprep.mubr.f32.mxu0 %v18122_v2  ;;  %v18453_v12 = vsel %vm42_vm1, %v8856_v63, %v8858_v9  ;;  %v8860_v13 = vsel %vm42_vm1, %v8858_v9, %v8856_v63  ;;  %v3484_v63 = vsel %vm112_vm3, %v18184_v17, 0 }
 0x19b   :  { %2355 = vmatprep.subr.mxu0 %v2119_v1  ;;  %v18460_v16 = vsel %vm42_vm1, %v18440_v4, %v8860_v13  ;;  %8867 = vrot.lane.b32.xlu1 %v18453_v12, %s18123_s18  ;;  %v3078_v1 = vand.u32 4294901760, %v3003_v45 }
 0x19c   :  { %8865 = vrot.lane.b32.xlu0 %v18460_v16, %s18123_s18 }
 0x19d   :  { %v3079_v49 = vsub.f32 %v3003_v45, %v3078_v1 }
 0x19f   :  { %8873 = vrot.lane.b32.xlu1 %v18453_v12, %s18124_s19  ;;  %v3080_v52 = vand.u32 4294901760, %v3079_v49 }
 0x1a0   :  { %8871 = vrot.lane.b32.xlu0 %v18460_v16, %s18124_s19 }
 0x1a1   :  { %2346 = vmatmul.mubr.f32.vlgmr.msra.gmra.mrb[0].mxu0 %v2108_v50  ;;  %v3081_v54 = vsub.f32 %v3079_v49, %v3080_v52 }
 0x1a2   :  { %2359 = vmatpush1.msra.mxu0 %v2125_v51  ;;  %2422 = vmatprep.mubr.f32.mxu0 %v18122_v2 }
 0x1a3   :  { %2431 = vmatprep.subr.mxu0 %v2039_v39  ;;  %10310 = vrot.lane.b32.xlu1 %v18374_v37, %s18123_s18  ;;  %v3009_v39 = vsel %vm112_vm3, %v2997_v35, 0  ;;  %v3082_v56 = vand.u32 4294901760, %v3081_v54 }
 0x1a4   :  { %10308 = vrot.lane.b32.xlu0 %v18368_v57, %s18123_s18  ;;  %v3011_v41 = vand.u32 4294901760, %v3009_v39 }
 0x1a7   :  { %10316 = vrot.lane.b32.xlu1 %v18374_v37, %s18124_s19 }
 0x1a8   :  { %10314 = vrot.lane.b32.xlu0 %v18368_v57, %s18124_s19  ;;  %v8854_v57 = vsel %vm58_vm2, %v8852_v60, %v8850_v58  ;;  %v17624_v60 = vld [vmem:[%s19515_s1 + $0x1c] sm:$0xf] }
 0x1a9   :  { %2424 = vmatmul.mubr.f32.vlgmr.msra.gmra.mrb[0].mxu0 %v18416_v47  ;;  %v18500_v36 = vsel %vm45_vm4, %v18453_v12, %v8854_v57  ;;  %v3481_v62 = vsel %vm108_vm0, %v17624_v60, 0  ;;  %v3967_v57 = vand.u32 4294901760, %v3965_v25  ;;  %v8890_v60 = vsel %vm112_vm3, %v18453_v12, 0 }
 0x1aa   :  { %2433 = vmatpush1.msra.mxu0 %v2041_v38  ;;  %2496 = vmatprep.mubr.f32.mxu0 %v18122_v2  ;;  %v3090_v38 = vsub.f32 %v3009_v39, %v3011_v41 }
 0x1ab   :  { %2518 = vmatprep.subr.mxu0 %v18434_v61  ;;  %11753 = vrot.lane.b32.xlu1 %v18440_v4, %s18123_s18  ;;  %v4046_v27 = vsub.f32 %v3965_v25, %v3967_v57 }
 0x1ac   :  { %v3091_v48 = vand.u32 4294901760, %v3090_v38 }
 0x1ae   :  { %v3092_v51 = vsub.f32 %v3090_v38, %v3091_v48 }
 0x1af   :  { %11755 = vrot.lane.b32.xlu1 %v18500_v36, %s18123_s18 }
 0x1b0   :  { %v3093_v0 = vand.u32 4294901760, %v3092_v51 }
 0x1b1   :  { %2498 = vmatmul.mubr.f32.vlgmr.msra.gmra.mrb[0].mxu0 %v18416_v47  ;;  %v3006_v47 = vsel %vm112_vm3, %v2996_v42, 0 }
 0x1b2   :  { %2520 = vmatpush1.msra.mxu0 %v2519_v3  ;;  %2583 = vmatprep.mubr.f32.mxu0 %v18122_v2  ;;  %v3013_v43 = vand.u32 4294901760, %v3006_v47 }
 0x1b3   :  { %2600 = vmatprep.subr.mxu0 %v2599_v23  ;;  %11759 = vrot.lane.b32.xlu1 %v18440_v4, %s18124_s19 }
 0x1b4   :  { %v3096_v50 = vsub.f32 %v3006_v47, %v3013_v43  ;;  %v4052_v47 = vsub.f32 %v3962_v26, %v3969_v40 }
 0x1b6   :  { %v3097_v53 = vand.u32 4294901760, %v3096_v50  ;;  %v4053_v29 = vand.u32 4294901760, %v4052_v47 }
 0x1b7   :  { %11761 = vrot.lane.b32.xlu1 %v18500_v36, %s18124_s19 }
 0x1b8   :  { %v3098_v55 = vsub.f32 %v3096_v50, %v3097_v53 }
 0x1b9   :  { %2589 = vmatmul.mubr.f32.vlgmr.msra.gmra.mrb[0].mxu0 %v2588_v32  ;;  %v17625_v32 = vld [vmem:[%s19515_s1 + $0x20] sm:$0xf] }
 0x1ba   :  { %2606 = vmatpush1.msra.mxu0 %v2605_v33  ;;  %2669 = vmatprep.mubr.f32.mxu0 %v18122_v2  ;;  %v3099_v58 = vand.u32 4294901760, %v3098_v55  ;;  %v3959_v35 = vsel %vm108_vm0, %v17625_v32, 0 }
 0x1bb   :  { %2679 = vmatprep.subr.mxu0 %v2596_v15  ;;  %v3556_v15 = vand.u32 4294901760, %v3481_v62  ;;  %v18564_v31 = vand.u32 4294901760, %v3959_v35 }
 0x1bd   :  { %v3557_v9 = vsub.f32 %v3481_v62, %v3556_v15  ;;  %v4035_v42 = vsub.f32 %v3959_v35, %v18564_v31  ;;  %v18605_v62 = vand.u32 4294901760, %v8890_v60 }
 0x1bf   :  { %v4036_v19 = vand.u32 4294901760, %v4035_v42 }
 0x1c1   :  { %2671 = vmatmul.mubr.f32.vlgmr.msra.gmra.mrb[0].mxu0 %v18449_v5 }
 0x1c2   :  { %2682 = vmatpush1.msra.mxu0 %v2602_v18  ;;  %2745 = vmatprep.mubr.f32.mxu0 %v18122_v2 }
 0x1c3   :  { %2755 = vmatprep.subr.mxu0 %v18434_v61 }
 0x1c9   :  { %2748 = vmatmul.mubr.f32.vlgmr.msra.gmra.mrb[0].mxu0 %v2585_v14 }
 0x1ca   :  { %2757 = vmatpush1.msra.mxu0 %v2519_v3  ;;  %2820 = vmatprep.mubr.f32.mxu0 %v18122_v2 }
 0x1cb   :  { %2833 = vmatprep.subr.mxu0 %v2597_v11  ;;  %v3558_v11 = vand.u32 4294901760, %v3557_v9 }
 0x1cd   :  { %v3559_v20 = vsub.f32 %v3557_v9, %v3558_v11 }
 0x1d1   :  { %2824 = vmatmul.mubr.f32.vlgmr.msra.gmra.mrb[0].mxu0 %v2586_v21  ;;  %v3560_v21 = vand.u32 4294901760, %v3559_v20 }
 0x1d2   :  { %2837 = vmatpush1.msra.mxu0 %v2603_v22  ;;  %2900 = vmatprep.mubr.f32.mxu0 %v18122_v2 }
 0x1d3   :  { %2909 = vmatprep.subr.mxu0 %v18434_v61  ;;  %v3489_v61 = vand.u32 4294901760, %v3487_v59 }
 0x1d5   :  { %v3568_v10 = vsub.f32 %v3487_v59, %v3489_v61  ;;  %v17635_v59 = vld [vmem:[%s19515_s1 + $0x4] sm:$0xf] }
 0x1d7   :  { %v3569_v34 = vand.u32 4294901760, %v3568_v10 }
 0x1d9   :  { %2902 = vmatmul.mubr.f32.vlgmr.msra.gmra.mrb[0].mxu0 %v18449_v5 }
 0x1da   :  { %2911 = vmatpush1.msra.mxu0 %v2519_v3  ;;  %2974 = vmatprep.mubr.f32.mxu0 %v18122_v2  ;;  %v3570_v3 = vsub.f32 %v3568_v10, %v3569_v34 }
 0x1db   :  { %3012 = vmatprep.subr.mxu0 %v3011_v41 }
 0x1dc   :  { %v3571_v18 = vand.u32 4294901760, %v3570_v3 }
 0x1e1   :  { %2976 = vmatmul.mubr.f32.vlgmr.msra.gmra.mrb[0].mxu0 %v18449_v5  ;;  %v3491_v5 = vand.u32 4294901760, %v3484_v63 }
 0x1e2   :  { %3014 = vmatpush1.msra.mxu0 %v3013_v43  ;;  %3077 = vmatprep.mubr.f32.mxu0 %v18122_v2 }
 0x1e3   :  { %3094 = vmatprep.subr.mxu0 %v3093_v0  ;;  %v3574_v13 = vsub.f32 %v3484_v63, %v3491_v5  ;;  %v8887_v63 = vsel %vm112_vm3, %v18460_v16, 0 }
 0x1e5   :  { %v3575_v14 = vand.u32 4294901760, %v3574_v13 }
 0x1e7   :  { %v3576_v17 = vsub.f32 %v3574_v13, %v3575_v14 }
 0x1e9   :  { %3083 = vmatmul.mubr.f32.vlgmr.msra.gmra.mrb[0].mxu0 %v3082_v56  ;;  %v3577_v22 = vand.u32 4294901760, %v3576_v17 }
 0x1ea   :  { %3100 = vmatpush1.msra.mxu0 %v3099_v58  ;;  %3163 = vmatprep.mubr.f32.mxu0 %v18122_v2 }
 0x1eb   :  { %3173 = vmatprep.subr.mxu0 %v3090_v38 }
 0x1f1   :  { %3165 = vmatmul.mubr.f32.vlgmr.msra.gmra.mrb[0].mxu0 %v3078_v1 }
 0x1f2   :  { %3176 = vmatpush1.msra.mxu0 %v3096_v50  ;;  %3239 = vmatprep.mubr.f32.mxu0 %v18122_v2 }
 0x1f3   :  { %3249 = vmatprep.subr.mxu0 %v3011_v41 }
 0x1f9   :  { %3242 = vmatmul.mubr.f32.vlgmr.msra.gmra.mrb[0].mxu0 %v3079_v49  ;;  %v4054_v49 = vsub.f32 %v4052_v47, %v4053_v29 }
 0x1fa   :  { %3251 = vmatpush1.msra.mxu0 %v3013_v43  ;;  %3314 = vmatprep.mubr.f32.mxu0 %v18122_v2 }
 0x1fb   :  { %3327 = vmatprep.subr.mxu0 %v3091_v48  ;;  %v4055_v55 = vand.u32 4294901760, %v4054_v49 }
 0x201   :  { %3318 = vmatmul.mubr.f32.vlgmr.msra.gmra.mrb[0].mxu0 %v3080_v52 }
 0x202   :  { %3331 = vmatpush1.msra.mxu0 %v3097_v53  ;;  %3394 = vmatprep.mubr.f32.mxu0 %v18122_v2 }
 0x203   :  { %3403 = vmatprep.subr.mxu0 %v3011_v41  ;;  %v4047_v41 = vand.u32 4294901760, %v4046_v27 }
 0x205   :  { %v4048_v38 = vsub.f32 %v4046_v27, %v4047_v41 }
 0x209   :  { %3396 = vmatmul.mubr.f32.vlgmr.msra.gmra.mrb[0].mxu0 %v3078_v1 }
 0x20a   :  { %3405 = vmatpush1.msra.mxu0 %v3013_v43  ;;  %3468 = vmatprep.mubr.f32.mxu0 %v18122_v2  ;;  %v4037_v43 = vsub.f32 %v4035_v42, %v4036_v19 }
 0x20b   :  { %3490 = vmatprep.subr.mxu0 %v3489_v61 }
 0x20c   :  { %v4038_v50 = vand.u32 4294901760, %v4037_v43 }
 0x20d   :  { %v18540_v23 = vpop.permute.xlu1 %8867 }
 0x20e   :  { %v8866_v3 = vpop.permute.xlu0 %8865 }
 0x211   :  { %3470 = vmatmul.mubr.f32.vlgmr.msra.gmra.mrb[0].mxu0 %v3078_v1  ;;  %v18543_v24 = vpop.permute.xlu1 %8873  ;;  %v4049_v1 = vand.u32 4294901760, %v4048_v38 }
 0x212   :  { %3492 = vmatpush1.msra.mxu0 %v3491_v5  ;;  %3555 = vmatprep.mubr.f32.mxu0 %v18122_v2 }
 0x213   :  { %3572 = vmatprep.subr.mxu0 %v3571_v18 }
 0x215   :  { %v18554_v33 = vpop.permute.xlu1 %10310 }
 0x219   :  { %3561 = vmatmul.mubr.f32.vlgmr.msra.gmra.mrb[0].mxu0 %v3560_v21  ;;  %v18566_v39 = vpop.permute.xlu1 %10316  ;;  %v8872_v21 = vpop.permute.xlu0 %8871 }
 0x21a   :  { %3578 = vmatpush1.msra.mxu0 %v3577_v22  ;;  %3641 = vmatprep.mubr.f32.mxu0 %v18122_v2 }
 0x21b   :  { %3651 = vmatprep.subr.mxu0 %v3568_v10 }
 0x21d   :  { %v11754_v45 = vpop.permute.xlu1 %11753  ;;  %v10309_v25 = vpop.permute.xlu0 %10308 }
 0x21e   :  { %v18632_v35 = vsel %vm83_vm5, %v18554_v33, %v10309_v25 }
 0x221   :  { %3643 = vmatmul.mubr.f32.vlgmr.msra.gmra.mrb[0].mxu0 %v3556_v15  ;;  %v11756_v28 = vpop.permute.xlu1 %11755  ;;  %v10315_v32 = vpop.permute.xlu0 %10314 }
 0x222   :  { %3654 = vmatpush1.msra.mxu0 %v3574_v13  ;;  %3717 = vmatprep.mubr.f32.mxu0 %v18122_v2  ;;  %v18573_v51 = vsel %vm83_vm5, %v11754_v45, %v11756_v28  ;;  %v18577_v52 = vsel %vm83_vm5, %v11756_v28, %v11754_v45  ;;  %v18637_v26 = vsel %vm90_vm6, %v10315_v32, %v18566_v39 }
 0x223   :  { %3727 = vmatprep.subr.mxu0 %v3489_v61  ;;  %v8869_v45 = vsel %vm83_vm5, %v8866_v3, %v18540_v23 }
 0x225   :  { %v11760_v48 = vpop.permute.xlu1 %11759 }
 0x229   :  { %3720 = vmatmul.mubr.f32.vlgmr.msra.gmra.mrb[0].mxu0 %v3557_v9  ;;  %v11762_v53 = vpop.permute.xlu1 %11761 }
 0x22a   :  { %3729 = vmatpush1.msra.mxu0 %v3491_v5  ;;  %3792 = vmatprep.mubr.f32.mxu0 %v18122_v2  ;;  %v18581_v0 = vsel %vm90_vm6, %v11760_v48, %v11762_v53  ;;  %v18585_v54 = vsel %vm90_vm6, %v11762_v53, %v11760_v48 }
 0x22b   :  { %3805 = vmatprep.subr.mxu0 %v3569_v34  ;;  %v11767_v56 = vsel %vm18291_vm10, %v18585_v54, %v18573_v51  ;;  %v11768_v58 = vsel %vm18287_vm9, %v18581_v0, %v18577_v52 }
 0x231   :  { %3796 = vmatmul.mubr.f32.vlgmr.msra.gmra.mrb[0].mxu0 %v3558_v11 }
 0x232   :  { %3809 = vmatpush1.msra.mxu0 %v3575_v14  ;;  %3872 = vmatprep.mubr.f32.mxu0 %v18122_v2 }
 0x233   :  { %3881 = vmatprep.subr.mxu0 %v3489_v61  ;;  %v8884_v61 = vsel %vm108_vm0, %v17635_v59, 0 }
 0x234   :  { %v18609_v10 = vand.u32 4294901760, %v8884_v61 }
 0x236   :  { %v8960_v12 = vsub.f32 %v8884_v61, %v18609_v10 }
 0x238   :  { %v8961_v13 = vand.u32 4294901760, %v8960_v12 }
 0x239   :  { %3874 = vmatmul.mubr.f32.vlgmr.msra.gmra.mrb[0].mxu0 %v3556_v15 }
 0x23a   :  { %3883 = vmatpush1.msra.mxu0 %v3491_v5  ;;  %3946 = vmatprep.mubr.f32.mxu0 %v18122_v2  ;;  %v8971_v5 = vsub.f32 %v8890_v60, %v18605_v62  ;;  %v8962_v14 = vsub.f32 %v8960_v12, %v8961_v13 }
 0x23b   :  { %3968 = vmatprep.subr.mxu0 %v3967_v57 }
 0x23c   :  { %v8972_v9 = vand.u32 4294901760, %v8971_v5  ;;  %v8963_v17 = vand.u32 4294901760, %v8962_v14 }
 0x23e   :  { %v8973_v11 = vsub.f32 %v8971_v5, %v8972_v9 }
 0x240   :  { %v8974_v20 = vand.u32 4294901760, %v8973_v11 }
 0x241   :  { %3948 = vmatmul.mubr.f32.vlgmr.msra.gmra.mrb[0].mxu0 %v3556_v15  ;;  %v18612_v15 = vand.u32 4294901760, %v8887_v63 }
 0x242   :  { %3970 = vmatpush1.msra.mxu0 %v3969_v40  ;;  %4033 = vmatprep.mubr.f32.mxu0 %v18122_v2 }
 0x243   :  { %4050 = vmatprep.subr.mxu0 %v4049_v1  ;;  %v8977_v34 = vsub.f32 %v8887_v63, %v18612_v15 }
 0x245   :  { %v8978_v16 = vand.u32 4294901760, %v8977_v34 }
 0x247   :  { %v8979_v18 = vsub.f32 %v8977_v34, %v8978_v16 }
 0x249   :  { %4039 = vmatmul.mubr.f32.vlgmr.msra.gmra.mrb[0].mxu0 %v4038_v50  ;;  %v8980_v22 = vand.u32 4294901760, %v8979_v18 }
 0x24a   :  { %4056 = vmatpush1.msra.mxu0 %v4055_v55  ;;  %4119 = vmatprep.mubr.f32.mxu0 %v18122_v2 }
 0x24b   :  { %4129 = vmatprep.subr.mxu0 %v4046_v27  ;;  %v18642_v27 = vsel %vm90_vm6, %v18566_v39, %v10315_v32  ;;  %v8870_v39 = vsel %vm83_vm5, %v18540_v23, %v8866_v3 }
 0x251   :  { %4121 = vmatmul.mubr.f32.vlgmr.msra.gmra.mrb[0].mxu0 %v18564_v31 }
 0x252   :  { %4132 = vmatpush1.msra.mxu0 %v4052_v47  ;;  %4195 = vmatprep.mubr.f32.mxu0 %v18122_v2  ;;  %v8876_v47 = vsel %vm90_vm6, %v18543_v24, %v8872_v21 }
 0x253   :  { %4205 = vmatprep.subr.mxu0 %v3967_v57  ;;  %v8877_v28 = vsel %vm18248_vm8, %v8869_v45, %v8876_v47 }
 0x254   :  { %v9361_v23 = vsel %vm112_vm3, %v8877_v28, 0 }
 0x255   :  { %v9368_v43 = vand.u32 4294901760, %v9361_v23 }
 0x257   :  { %v9451_v50 = vsub.f32 %v9361_v23, %v9368_v43 }
 0x259   :  { %4198 = vmatmul.mubr.f32.vlgmr.msra.gmra.mrb[0].mxu0 %v4035_v42  ;;  %v9452_v59 = vand.u32 4294901760, %v9451_v50 }
 0x25a   :  { %4207 = vmatpush1.msra.mxu0 %v3969_v40  ;;  %4270 = vmatprep.mubr.f32.mxu0 %v18122_v2 }
 0x25b   :  { %4283 = vmatprep.subr.mxu0 %v4047_v41 }
 0x261   :  { %4274 = vmatmul.mubr.f32.vlgmr.msra.gmra.mrb[0].mxu0 %v4036_v19  ;;  %v8881_v19 = vld [vmem:[%s19515_s1] sm:$0xf] }
 0x262   :  { %4287 = vmatpush1.msra.mxu0 %v4053_v29  ;;  %4350 = vmatprep.mubr.f32.mxu0 %v18122_v2  ;;  %v9358_v29 = vsel %vm108_vm0, %v8881_v19, 0  ;;  %v17637_v19 = vld [vmem:[%s19515_s1 + $0xc] sm:$0xf] }
 0x263   :  { %4359 = vmatprep.subr.mxu0 %v3967_v57  ;;  %v18627_v57 = vsel %vm83_vm5, %v10309_v25, %v18554_v33  ;;  %v10323_v33 = vsel %vm18287_vm9, %v18637_v26, %v18632_v35 }
 0x264   :  { %v10320_v28 = vsel %vm18248_vm8, %v18627_v57, %v18642_v27 }
 0x265   :  { %v10329_v23 = vsel %vm112_vm3, %v10320_v28, 0  ;;  %v17639_v28 = vld [vmem:[%s19515_s1 + $0x14] sm:$0xf] }
 0x269   :  { %4352 = vmatmul.mubr.f32.vlgmr.msra.gmra.mrb[0].mxu0 %v18564_v31 }
 0x26a   :  { %4361 = vmatpush1.msra.mxu0 %v3969_v40  ;;  %4424 = vmatprep.mubr.f32.mxu0 %v18122_v2  ;;  %v8875_v40 = vsel %vm90_vm6, %v8872_v21, %v18543_v24  ;;  %v9433_v24 = vand.u32 4294901760, %v9358_v29 }
 0x26b   :  { %8893 = vmatprep.subr.mxu0 %v18605_v62  ;;  %v8878_v41 = vsel %vm18244_vm7, %v8870_v39, %v8875_v40 }
 0x26c   :  { %v9364_v42 = vsel %vm112_vm3, %v8878_v41, 0  ;;  %v9434_v49 = vsub.f32 %v9358_v29, %v9433_v24  ;;  %v10326_v29 = vsel %vm108_vm0, %v17637_v19, 0  ;;  %v11284_v19 = vsel %vm112_vm3, %v10323_v33, 0 }
 0x26d   :  { %v9366_v38 = vand.u32 4294901760, %v9364_v42 }
 0x26e   :  { %v9435_v55 = vand.u32 4294901760, %v9434_v49 }
 0x26f   :  { %v9445_v1 = vsub.f32 %v9364_v42, %v9366_v38 }
 0x270   :  { %v9436_v61 = vsub.f32 %v9434_v49, %v9435_v55 }
 0x271   :  { %4426 = vmatmul.mubr.f32.vlgmr.msra.gmra.mrb[0].mxu0 %v18564_v31  ;;  %v10322_v31 = vsel %vm18291_vm10, %v18642_v27, %v18627_v57  ;;  %v9446_v48 = vand.u32 4294901760, %v9445_v1 }
 0x272   :  { %8895 = vmatpush1.msra.mxu0 %v18612_v15  ;;  %8958 = vmatprep.mubr.f32.mxu0 %v18122_v2  ;;  %v9437_v63 = vand.u32 4294901760, %v9436_v61 }
 0x273   :  { %8975 = vmatprep.subr.mxu0 %v8974_v20  ;;  %v9447_v53 = vsub.f32 %v9445_v1, %v9446_v48 }
 0x275   :  { %8964 = vmatmul.mubr.f32.vlgmr.msra.gmra.mrb[2].mxu0 %v8963_v17  ;;  %v9448_v60 = vand.u32 4294901760, %v9447_v53 }
 0x276   :  { %8981 = vmatpush1.msra.mxu0 %v8980_v22  ;;  %9044 = vmatprep.mubr.f32.mxu0 %v18122_v2 }
 0x277   :  { %9054 = vmatprep.subr.mxu0 %v8971_v5 }
 0x27d   :  { %9046 = vmatmul.mubr.f32.vlgmr.msra.gmra.mrb[2].mxu0 %v18609_v10 }
 0x27e   :  { %9057 = vmatpush1.msra.mxu0 %v8977_v34  ;;  %9120 = vmatprep.mubr.f32.mxu0 %v18122_v2  ;;  %v17636_v34 = vld [vmem:[%s19515_s1 + $0x8] sm:$0xf] }
 0x27f   :  { %9130 = vmatprep.subr.mxu0 %v18605_v62 }
 0x285   :  { %9123 = vmatmul.mubr.f32.vlgmr.msra.gmra.mrb[2].mxu0 %v8960_v12 }
 0x286   :  { %9132 = vmatpush1.msra.mxu0 %v18612_v15  ;;  %9195 = vmatprep.mubr.f32.mxu0 %v18122_v2 }
 0x287   :  { %9208 = vmatprep.subr.mxu0 %v8972_v9  ;;  %v8879_v9 = vsel %vm18291_vm10, %v8876_v47, %v8869_v45  ;;  %v10321_v45 = vsel %vm18244_vm7, %v18632_v35, %v18637_v26  ;;  %v11281_v35 = vsel %vm112_vm3, %v10322_v31, 0 }
 0x288   :  { %v10332_v47 = vsel %vm112_vm3, %v10321_v45, 0 }
 0x28d   :  { %9199 = vmatmul.mubr.f32.vlgmr.msra.gmra.mrb[2].mxu0 %v8961_v13  ;;  %v9833_v13 = vsel %vm108_vm0, %v17636_v34, 0 }
 0x28e   :  { %9212 = vmatpush1.msra.mxu0 %v8978_v16  ;;  %9275 = vmatprep.mubr.f32.mxu0 %v18122_v2  ;;  %v9836_v16 = vsel %vm112_vm3, %v8879_v9, 0  ;;  %v9908_v11 = vand.u32 4294901760, %v9833_v13  ;;  %v18093_v9 = vld [vmem:[%s19514_s0 + $0x8] sm:$0xff] }
 0x28f   :  { %9284 = vmatprep.subr.mxu0 %v18605_v62  ;;  %v9453_v62 = vsub.f32 %v9451_v50, %v9452_v59  ;;  %v9843_v14 = vand.u32 4294901760, %v9836_v16 }
 0x290   :  { %v9909_v20 = vsub.f32 %v9833_v13, %v9908_v11  ;;  %v10805_v13 = vsel %vm112_vm3, %v18093_v9, 0 }
 0x291   :  { %v9454_v5 = vand.u32 4294901760, %v9453_v62  ;;  %v9926_v17 = vsub.f32 %v9836_v16, %v9843_v14 }
 0x292   :  { %v9910_v22 = vand.u32 4294901760, %v9909_v20 }
 0x293   :  { %v9927_v25 = vand.u32 4294901760, %v9926_v17 }
 0x295   :  { %9277 = vmatmul.mubr.f32.vlgmr.msra.gmra.mrb[2].mxu0 %v18609_v10 }
 0x296   :  { %9286 = vmatpush1.msra.mxu0 %v18612_v15  ;;  %9349 = vmatprep.mubr.f32.mxu0 %v18122_v2 }
 0x297   :  { %9367 = vmatprep.subr.mxu0 %v9366_v38 }
 0x29d   :  { %9351 = vmatmul.mubr.f32.vlgmr.msra.gmra.mrb[2].mxu0 %v18609_v10  ;;  %v8880_v10 = vsel %vm18287_vm9, %v8875_v40, %v8870_v39  ;;  %v9911_v39 = vsub.f32 %v9909_v20, %v9910_v22  ;;  %v9928_v40 = vsub.f32 %v9926_v17, %v9927_v25 }
 0x29e   :  { %9369 = vmatpush1.msra.mxu0 %v9368_v43  ;;  %9432 = vmatprep.mubr.f32.mxu0 %v18122_v2  ;;  %v9839_v15 = vsel %vm112_vm3, %v8880_v10, 0  ;;  %v10807_v10 = vsel %vm112_vm3, %v18374_v37, 0 }
 0x29f   :  { %9449 = vmatprep.subr.mxu0 %v9448_v60  ;;  %v9841_v12 = vand.u32 4294901760, %v9839_v15  ;;  %v9912_v41 = vand.u32 4294901760, %v9911_v39  ;;  %v9929_v42 = vand.u32 4294901760, %v9928_v40 }
 0x2a1   :  { %v9920_v3 = vsub.f32 %v9839_v15, %v9841_v12  ;;  %v10809_v15 = vand.u32 4294901760, %v10807_v10 }
 0x2a3   :  { %v9921_v18 = vand.u32 4294901760, %v9920_v3  ;;  %v10888_v16 = vsub.f32 %v10807_v10, %v10809_v15 }
 0x2a5   :  { %9438 = vmatmul.mubr.f32.vlgmr.msra.gmra.mrb[2].mxu0 %v9437_v63  ;;  %v9922_v21 = vsub.f32 %v9920_v3, %v9921_v18 }
 0x2a6   :  { %9455 = vmatpush1.msra.mxu0 %v9454_v5  ;;  %9518 = vmatprep.mubr.f32.mxu0 %v18122_v2 }
 0x2a7   :  { %9528 = vmatprep.subr.mxu0 %v9445_v1  ;;  %v9923_v32 = vand.u32 4294901760, %v9922_v21 }
 0x2ad   :  { %9520 = vmatmul.mubr.f32.vlgmr.msra.gmra.mrb[2].mxu0 %v9433_v24 }
 0x2ae   :  { %9531 = vmatpush1.msra.mxu0 %v9451_v50  ;;  %9594 = vmatprep.mubr.f32.mxu0 %v18122_v2 }
 0x2af   :  { %9604 = vmatprep.subr.mxu0 %v9366_v38 }
 0x2b5   :  { %9597 = vmatmul.mubr.f32.vlgmr.msra.gmra.mrb[2].mxu0 %v9434_v49 }
 0x2b6   :  { %9606 = vmatpush1.msra.mxu0 %v9368_v43  ;;  %9669 = vmatprep.mubr.f32.mxu0 %v18122_v2 }
 0x2b7   :  { %9682 = vmatprep.subr.mxu0 %v9446_v48 }
 0x2bd   :  { %9673 = vmatmul.mubr.f32.vlgmr.msra.gmra.mrb[2].mxu0 %v9435_v55 }
 0x2be   :  { %9686 = vmatpush1.msra.mxu0 %v9452_v59  ;;  %9749 = vmatprep.mubr.f32.mxu0 %v18122_v2 }
 0x2bf   :  { %9758 = vmatprep.subr.mxu0 %v9366_v38  ;;  %v10334_v38 = vand.u32 4294901760, %v10332_v47 }
 0x2c1   :  { %v10413_v1 = vsub.f32 %v10332_v47, %v10334_v38 }
 0x2c3   :  { %v10414_v48 = vand.u32 4294901760, %v10413_v1 }
 0x2c5   :  { %9751 = vmatmul.mubr.f32.vlgmr.msra.gmra.mrb[2].mxu0 %v9433_v24  ;;  %v10415_v53 = vsub.f32 %v10413_v1, %v10414_v48 }
 0x2c6   :  { %9760 = vmatpush1.msra.mxu0 %v9368_v43  ;;  %9823 = vmatprep.mubr.f32.mxu0 %v18122_v2  ;;  %v10336_v43 = vand.u32 4294901760, %v10329_v23 }
 0x2c7   :  { %9842 = vmatprep.subr.mxu0 %v9841_v12  ;;  %v10416_v60 = vand.u32 4294901760, %v10415_v53 }
 0x2c8   :  { %v10419_v50 = vsub.f32 %v10329_v23, %v10336_v43  ;;  %v11278_v23 = vsel %vm108_vm0, %v17639_v28, 0 }
 0x2c9   :  { %v11353_v33 = vand.u32 4294901760, %v11278_v23 }
 0x2ca   :  { %v10420_v59 = vand.u32 4294901760, %v10419_v50 }
 0x2cc   :  { %v10421_v62 = vsub.f32 %v10419_v50, %v10420_v59 }
 0x2cd   :  { %9825 = vmatmul.mubr.f32.vlgmr.msra.gmra.mrb[2].mxu0 %v9433_v24  ;;  %v10401_v24 = vand.u32 4294901760, %v10326_v29 }
 0x2ce   :  { %9844 = vmatpush1.msra.mxu0 %v9843_v14  ;;  %9907 = vmatprep.mubr.f32.mxu0 %v18122_v2  ;;  %v10422_v5 = vand.u32 4294901760, %v10421_v62  ;;  %v17640_v62 = vld [vmem:[%s19515_s1 + $0x18] sm:$0xf] }
 0x2cf   :  { %9924 = vmatprep.subr.mxu0 %v9923_v32  ;;  %v10402_v49 = vsub.f32 %v10326_v29, %v10401_v24  ;;  %v11286_v29 = vand.u32 4294901760, %v11284_v19  ;;  %v11771_v10 = vsel %vm108_vm0, %v17640_v62, 0 }
 0x2d1   :  { %v10403_v55 = vand.u32 4294901760, %v10402_v49  ;;  %v11365_v26 = vsub.f32 %v11284_v19, %v11286_v29 }
 0x2d3   :  { %v10404_v61 = vsub.f32 %v10402_v49, %v10403_v55 }
 0x2d5   :  { %9913 = vmatmul.mubr.f32.vlgmr.msra.gmra.mrb[2].mxu0 %v9912_v41  ;;  %v10405_v63 = vand.u32 4294901760, %v10404_v61 }
 0x2d6   :  { %9930 = vmatpush1.msra.mxu0 %v9929_v42  ;;  %9993 = vmatprep.mubr.f32.mxu0 %v18122_v2 }
 0x2d7   :  { %10003 = vmatprep.subr.mxu0 %v9920_v3  ;;  %v10811_v3 = vand.u32 4294901760, %v10805_v13 }
 0x2dd   :  { %9995 = vmatmul.mubr.f32.vlgmr.msra.gmra.mrb[2].mxu0 %v9908_v11 }
 0x2de   :  { %10006 = vmatpush1.msra.mxu0 %v9926_v17  ;;  %10069 = vmatprep.mubr.f32.mxu0 %v18122_v2 }
 0x2df   :  { %10079 = vmatprep.subr.mxu0 %v9841_v12 }
 0x2e5   :  { %10072 = vmatmul.mubr.f32.vlgmr.msra.gmra.mrb[2].mxu0 %v9909_v20 }
 0x2e6   :  { %10081 = vmatpush1.msra.mxu0 %v9843_v14  ;;  %10144 = vmatprep.mubr.f32.mxu0 %v18122_v2 }
 0x2e7   :  { %10157 = vmatprep.subr.mxu0 %v9921_v18  ;;  %v10894_v18 = vsub.f32 %v10805_v13, %v10811_v3 }
 0x2e9   :  { %v10895_v21 = vand.u32 4294901760, %v10894_v18 }
 0x2eb   :  { %v10896_v32 = vsub.f32 %v10894_v18, %v10895_v21 }
 0x2ed   :  { %10148 = vmatmul.mubr.f32.vlgmr.msra.gmra.mrb[2].mxu0 %v9910_v22  ;;  %v10897_v40 = vand.u32 4294901760, %v10896_v32  ;;  %v17641_v32 = vld [vmem:[%s19515_s1 + $0x1c] sm:$0xf] }
 0x2ee   :  { %10161 = vmatpush1.msra.mxu0 %v9927_v25  ;;  %10224 = vmatprep.mubr.f32.mxu0 %v18122_v2 }
 0x2ef   :  { %10233 = vmatprep.subr.mxu0 %v9841_v12  ;;  %v17638_v12 = vld [vmem:[%s19515_s1 + $0x10] sm:$0xf] }
 0x2f0   :  { %v10803_v34 = vsel %vm108_vm0, %v17638_v12, 0 }
 0x2f1   :  { %v10876_v37 = vand.u32 4294901760, %v10803_v34 }
 0x2f5   :  { %10226 = vmatmul.mubr.f32.vlgmr.msra.gmra.mrb[2].mxu0 %v9908_v11 }
 0x2f6   :  { %10235 = vmatpush1.msra.mxu0 %v9843_v14  ;;  %10298 = vmatprep.mubr.f32.mxu0 %v18122_v2  ;;  %v10877_v14 = vsub.f32 %v10803_v34, %v10876_v37  ;;  %v11846_v34 = vand.u32 4294901760, %v11771_v10 }
 0x2f7   :  { %10335 = vmatprep.subr.mxu0 %v10334_v38 }
 0x2f8   :  { %v10878_v17 = vand.u32 4294901760, %v10877_v14 }
 0x2fa   :  { %v10879_v25 = vsub.f32 %v10877_v14, %v10878_v17 }
 0x2fc   :  { %v10880_v39 = vand.u32 4294901760, %v10879_v25  ;;  %v12254_v25 = vsel %vm112_vm3, %v18500_v36, 0 }
 0x2fd   :  { %10300 = vmatmul.mubr.f32.vlgmr.msra.gmra.mrb[2].mxu0 %v9908_v11  ;;  %v10889_v11 = vand.u32 4294901760, %v10888_v16 }
 0x2fe   :  { %10337 = vmatpush1.msra.mxu0 %v10336_v43  ;;  %10400 = vmatprep.mubr.f32.mxu0 %v18122_v2 }
 0x2ff   :  { %10417 = vmatprep.subr.mxu0 %v10416_v60  ;;  %v10890_v20 = vsub.f32 %v10888_v16, %v10889_v11  ;;  %v11766_v60 = vsel %vm18244_vm7, %v18577_v52, %v18581_v0 }
 0x300   :  { %v11777_v61 = vsel %vm112_vm3, %v11766_v60, 0 }
 0x301   :  { %v10891_v22 = vand.u32 4294901760, %v10890_v20 }
 0x305   :  { %10406 = vmatmul.mubr.f32.vlgmr.msra.gmra.mrb[2].mxu0 %v10405_v63  ;;  %v11779_v63 = vand.u32 4294901760, %v11777_v61 }
 0x306   :  { %10423 = vmatpush1.msra.mxu0 %v10422_v5  ;;  %10486 = vmatprep.mubr.f32.mxu0 %v18122_v2  ;;  %v11765_v5 = vsel %vm18248_vm8, %v18573_v51, %v18585_v54 }
 0x307   :  { %10496 = vmatprep.subr.mxu0 %v10413_v1  ;;  %v11288_v1 = vand.u32 4294901760, %v11281_v35  ;;  %v11858_v12 = vsub.f32 %v11777_v61, %v11779_v63 }
 0x309   :  { %v11859_v13 = vand.u32 4294901760, %v11858_v12 }
 0x30d   :  { %10488 = vmatmul.mubr.f32.vlgmr.msra.gmra.mrb[2].mxu0 %v10401_v24 }
 0x30e   :  { %10499 = vmatpush1.msra.mxu0 %v10419_v50  ;;  %10562 = vmatprep.mubr.f32.mxu0 %v18122_v2 }
 0x30f   :  { %10572 = vmatprep.subr.mxu0 %v10334_v38 }
 0x315   :  { %10565 = vmatmul.mubr.f32.vlgmr.msra.gmra.mrb[2].mxu0 %v10402_v49 }
 0x316   :  { %10574 = vmatpush1.msra.mxu0 %v10336_v43  ;;  %10637 = vmatprep.mubr.f32.mxu0 %v18122_v2 }
 0x317   :  { %10650 = vmatprep.subr.mxu0 %v10414_v48  ;;  %v11371_v48 = vsub.f32 %v11281_v35, %v11288_v1 }
 0x319   :  { %v11372_v53 = vand.u32 4294901760, %v11371_v48 }
 0x31b   :  { %v11373_v57 = vsub.f32 %v11371_v48, %v11372_v53 }
 0x31d   :  { %10641 = vmatmul.mubr.f32.vlgmr.msra.gmra.mrb[2].mxu0 %v10403_v55  ;;  %v11374_v31 = vand.u32 4294901760, %v11373_v57 }
 0x31e   :  { %10654 = vmatpush1.msra.mxu0 %v10420_v59  ;;  %10717 = vmatprep.mubr.f32.mxu0 %v18122_v2 }
 0x31f   :  { %10726 = vmatprep.subr.mxu0 %v10334_v38 }
 0x325   :  { %10719 = vmatmul.mubr.f32.vlgmr.msra.gmra.mrb[2].mxu0 %v10401_v24 }
 0x326   :  { %10728 = vmatpush1.msra.mxu0 %v10336_v43  ;;  %10791 = vmatprep.mubr.f32.mxu0 %v18122_v2  ;;  %v11354_v43 = vsub.f32 %v11278_v23, %v11353_v33 }
 0x327   :  { %10810 = vmatprep.subr.mxu0 %v10809_v15 }
 0x328   :  { %v11355_v50 = vand.u32 4294901760, %v11354_v43 }
 0x32a   :  { %v11356_v59 = vsub.f32 %v11354_v43, %v11355_v50 }
 0x32c   :  { %v11357_v27 = vand.u32 4294901760, %v11356_v59 }
 0x32d   :  { %10793 = vmatmul.mubr.f32.vlgmr.msra.gmra.mrb[2].mxu0 %v10401_v24  ;;  %v11366_v24 = vand.u32 4294901760, %v11365_v26 }
 0x32e   :  { %10812 = vmatpush1.msra.mxu0 %v10811_v3  ;;  %10875 = vmatprep.mubr.f32.mxu0 %v18122_v2 }
 0x32f   :  { %10892 = vmatprep.subr.mxu0 %v10891_v22  ;;  %v11367_v49 = vsub.f32 %v11365_v26, %v11366_v24 }
 0x331   :  { %v11368_v55 = vand.u32 4294901760, %v11367_v49 }
 0x335   :  { %10881 = vmatmul.mubr.f32.vlgmr.msra.gmra.mrb[2].mxu0 %v10880_v39  ;;  %v12256_v39 = vand.u32 4294901760, %v12254_v25 }
 0x336   :  { %10898 = vmatpush1.msra.mxu0 %v10897_v40  ;;  %10961 = vmatprep.mubr.f32.mxu0 %v18122_v2  ;;  %v12248_v40 = vsel %vm108_vm0, %v17641_v32, 0 }
 0x337   :  { %10971 = vmatprep.subr.mxu0 %v10888_v16  ;;  %v11847_v16 = vsub.f32 %v11771_v10, %v11846_v34 }
 0x33d   :  { %10963 = vmatmul.mubr.f32.vlgmr.msra.gmra.mrb[2].mxu0 %v10876_v37 }
 0x33e   :  { %10974 = vmatpush1.msra.mxu0 %v10894_v18  ;;  %11037 = vmatprep.mubr.f32.mxu0 %v18122_v2 }
 0x33f   :  { %11047 = vmatprep.subr.mxu0 %v10809_v15 }
 0x344   :  { %v18740_v41 = vpop.f32.mrb[0].mxu0 }
 0x345   :  { %v4434_v42 = vsel %vm112_vm3, %v18740_v41, 0.0  ;;  %v18744_v45 = vpop.f32.mrb[1].mxu0  ;;  %11040 = vmatmul.mubr.f32.vlgmr.msra.gmra.mrb[2].mxu0 %v10877_v14 }
 0x346   :  { %v4435_v47 = vsel %vm112_vm3, %v18744_v45, 0.0  ;;  %11049 = vmatpush1.msra.mxu0 %v10811_v3  ;;  %11112 = vmatprep.mubr.f32.mxu0 %v18122_v2 }
 0x347   :  { %v4436_v38 = vadd.f32 %v4435_v47, %v4434_v42  ;;  %11125 = vmatprep.subr.mxu0 %v10889_v11  ;;  %v11848_v11 = vand.u32 4294901760, %v11847_v16  ;;  %v12251_v42 = vsel %vm112_vm3, %v18440_v4, 0  ;;  %v12335_v47 = vsub.f32 %v12254_v25, %v12256_v39 }
 0x348   :  { %v12258_v19 = vand.u32 4294901760, %v12251_v42 }
 0x349   :  { %4437 = vadd.xlane.f32.xlu0 %v4436_v38  ;;  %v11849_v20 = vsub.f32 %v11847_v16, %v11848_v11  ;;  %v18800_v38 = vand.u32 4294901760, %v12248_v40  ;;  %v12336_v36 = vand.u32 4294901760, %v12335_v47 }
 0x34b   :  { %v12324_v28 = vsub.f32 %v12248_v40, %v18800_v38  ;;  %v12337_v23 = vsub.f32 %v12335_v47, %v12336_v36 }
 0x34d   :  { %11116 = vmatmul.mubr.f32.vlgmr.msra.gmra.mrb[2].mxu0 %v10878_v17  ;;  %v12325_v35 = vand.u32 4294901760, %v12324_v28 }
 0x34e   :  { %11129 = vmatpush1.msra.mxu0 %v10895_v21  ;;  %11192 = vmatprep.mubr.f32.mxu0 %v18122_v2  ;;  %v11850_v21 = vand.u32 4294901760, %v11849_v20 }
 0x34f   :  { %11201 = vmatprep.subr.mxu0 %v10809_v15  ;;  %v11774_v15 = vsel %vm112_vm3, %v11765_v5, 0 }
 0x350   :  { %v11781_v9 = vand.u32 4294901760, %v11774_v15 }
 0x355   :  { %11194 = vmatmul.mubr.f32.vlgmr.msra.gmra.mrb[2].mxu0 %v10876_v37 }
 0x356   :  { %11203 = vmatpush1.msra.mxu0 %v10811_v3  ;;  %11266 = vmatprep.mubr.f32.mxu0 %v18122_v2  ;;  %v11860_v3 = vsub.f32 %v11858_v12, %v11859_v13 }
 0x357   :  { %11287 = vmatprep.subr.mxu0 %v11286_v29 }
 0x358   :  { %v11861_v18 = vand.u32 4294901760, %v11860_v3 }
 0x35d   :  { %11268 = vmatmul.mubr.f32.vlgmr.msra.gmra.mrb[2].mxu0 %v10876_v37  ;;  %v11864_v37 = vsub.f32 %v11774_v15, %v11781_v9 }
 0x35e   :  { %11289 = vmatpush1.msra.mxu0 %v11288_v1  ;;  %11352 = vmatprep.mubr.f32.mxu0 %v18122_v2 }
 0x35f   :  { %11369 = vmatprep.subr.mxu0 %v11368_v55  ;;  %v11865_v14 = vand.u32 4294901760, %v11864_v37  ;;  %v12731_v55 = vsel %vm112_vm3, %v11768_v58, 0  ;;  %v12728_v58 = vsel %vm112_vm3, %v11767_v56, 0 }
 0x360   :  { %v12735_v62 = vand.u32 4294901760, %v12728_v58 }
 0x361   :  { %v11866_v17 = vsub.f32 %v11864_v37, %v11865_v14 }
 0x362   :  { %v12818_v10 = vsub.f32 %v12728_v58, %v12735_v62  ;;  %v4489_v58 = vld [vmem:[%s19516_s2] sm:$0xf] }
 0x363   :  { %v11867_v22 = vand.u32 4294901760, %v11866_v17 }
 0x365   :  { %11358 = vmatmul.mubr.f32.vlgmr.msra.gmra.mrb[2].mxu0 %v11357_v27  ;;  %v12733_v27 = vand.u32 4294901760, %v12731_v55 }
 0x366   :  { %11375 = vmatpush1.msra.mxu0 %v11374_v31  ;;  %11438 = vmatprep.mubr.f32.mxu0 %v18122_v2 }
 0x367   :  { %11448 = vmatprep.subr.mxu0 %v11365_v26  ;;  %v12812_v60 = vsub.f32 %v12731_v55, %v12733_v27 }
 0x36d   :  { %11440 = vmatmul.mubr.f32.vlgmr.msra.gmra.mrb[2].mxu0 %v11353_v33 }
 0x36e   :  { %11451 = vmatpush1.msra.mxu0 %v11371_v48  ;;  %11514 = vmatprep.mubr.f32.mxu0 %v18122_v2 }
 0x36f   :  { %11524 = vmatprep.subr.mxu0 %v11286_v29 }
 0x375   :  { %11517 = vmatmul.mubr.f32.vlgmr.msra.gmra.mrb[2].mxu0 %v11354_v43 }
 0x376   :  { %11526 = vmatpush1.msra.mxu0 %v11288_v1  ;;  %11589 = vmatprep.mubr.f32.mxu0 %v18122_v2 }
 0x377   :  { %11602 = vmatprep.subr.mxu0 %v11366_v24 }
 0x37d   :  { %11593 = vmatmul.mubr.f32.vlgmr.msra.gmra.mrb[2].mxu0 %v11355_v50 }
 0x37e   :  { %11606 = vmatpush1.msra.mxu0 %v11372_v53  ;;  %11669 = vmatprep.mubr.f32.mxu0 %v18122_v2 }
 0x37f   :  { %11678 = vmatprep.subr.mxu0 %v11286_v29  ;;  %v12341_v29 = vsub.f32 %v12251_v42, %v12258_v19 }
 0x381   :  { %v12342_v26 = vand.u32 4294901760, %v12341_v29 }
 0x383   :  { %v12343_v4 = vsub.f32 %v12341_v29, %v12342_v26 }
 0x385   :  { %11671 = vmatmul.mubr.f32.vlgmr.msra.gmra.mrb[2].mxu0 %v11353_v33  ;;  %v12344_v43 = vand.u32 4294901760, %v12343_v4 }
 0x386   :  { %11680 = vmatpush1.msra.mxu0 %v11288_v1  ;;  %11743 = vmatprep.mubr.f32.mxu0 %v18122_v2  ;;  %v12326_v1 = vsub.f32 %v12324_v28, %v12325_v35 }
 0x387   :  { %11780 = vmatprep.subr.mxu0 %v11779_v63 }
 0x388   :  { %v12327_v24 = vand.u32 4294901760, %v12326_v1 }
 0x38d   :  { %11745 = vmatmul.mubr.f32.vlgmr.msra.gmra.mrb[2].mxu0 %v11353_v33  ;;  %v12338_v33 = vand.u32 4294901760, %v12337_v23 }
 0x38e   :  { %11782 = vmatpush1.msra.mxu0 %v11781_v9  ;;  %11845 = vmatprep.mubr.f32.mxu0 %v18122_v2 }
 0x38f   :  { %11862 = vmatprep.subr.mxu0 %v11861_v18 }
 0x395   :  { %11851 = vmatmul.mubr.f32.vlgmr.msra.gmra.mrb[2].mxu0 %v11850_v21  ;;  %v17626_v21 = vld [vmem:[%s19516_s2 + $0x4] sm:$0xf] }
 0x396   :  { %11868 = vmatpush1.msra.mxu0 %v11867_v22  ;;  %11931 = vmatprep.mubr.f32.mxu0 %v18122_v2  ;;  %v4493_v22 = vsel %vm108_vm0, %v17626_v21, 0 }
 0x397   :  { %11941 = vmatprep.subr.mxu0 %v11858_v12  ;;  %v18865_v25 = vand.u32 4294901760, %v4493_v22 }
 0x39d   :  { %11933 = vmatmul.mubr.f32.vlgmr.msra.gmra.mrb[2].mxu0 %v11846_v34 }
 0x39e   :  { %11944 = vmatpush1.msra.mxu0 %v11864_v37  ;;  %12007 = vmatprep.mubr.f32.mxu0 %v18122_v2 }
 0x39f   :  { %12017 = vmatprep.subr.mxu0 %v11779_v63 }
 0x3a5   :  { %12010 = vmatmul.mubr.f32.vlgmr.msra.gmra.mrb[2].mxu0 %v11847_v16 }
 0x3a6   :  { %12019 = vmatpush1.msra.mxu0 %v11781_v9  ;;  %12082 = vmatprep.mubr.f32.mxu0 %v18122_v2 }
 0x3a7   :  { %12095 = vmatprep.subr.mxu0 %v11859_v13 }
 0x3ad   :  { %12086 = vmatmul.mubr.f32.vlgmr.msra.gmra.mrb[2].mxu0 %v11848_v11 }
 0x3ae   :  { %12099 = vmatpush1.msra.mxu0 %v11865_v14  ;;  %12162 = vmatprep.mubr.f32.mxu0 %v18122_v2 }
 0x3af   :  { %12171 = vmatprep.subr.mxu0 %v11779_v63  ;;  %v12813_v63 = vand.u32 4294901760, %v12812_v60 }
 0x3b1   :  { %v12814_v15 = vsub.f32 %v12812_v60, %v12813_v63 }
 0x3b3   :  { %v12815_v51 = vand.u32 4294901760, %v12814_v15 }
 0x3b5   :  { %12164 = vmatmul.mubr.f32.vlgmr.msra.gmra.mrb[2].mxu0 %v11846_v34 }
 0x3b6   :  { %12173 = vmatpush1.msra.mxu0 %v11781_v9  ;;  %12236 = vmatprep.mubr.f32.mxu0 %v18122_v2 }
 0x3b7   :  { %12257 = vmatprep.subr.mxu0 %v12256_v39 }
 0x3bd   :  { %12238 = vmatmul.mubr.f32.vlgmr.msra.gmra.mrb[2].mxu0 %v11846_v34  ;;  %v12819_v34 = vand.u32 4294901760, %v12818_v10 }
 0x3be   :  { %12259 = vmatpush1.msra.mxu0 %v12258_v19  ;;  %12322 = vmatprep.mubr.f32.mxu0 %v18122_v2 }
 0x3bf   :  { %12339 = vmatprep.subr.mxu0 %v12338_v33  ;;  %v12820_v56 = vsub.f32 %v12818_v10, %v12819_v34 }
 0x3c1   :  { %v12821_v13 = vand.u32 4294901760, %v12820_v56 }
 0x3c5   :  { %12328 = vmatmul.mubr.f32.vlgmr.msra.gmra.mrb[2].mxu0 %v12327_v24 }
 0x3c6   :  { %12345 = vmatpush1.msra.mxu0 %v12344_v43  ;;  %12408 = vmatprep.mubr.f32.mxu0 %v18122_v2 }
 0x3c7   :  { %12418 = vmatprep.subr.mxu0 %v12335_v47 }
 0x3cd   :  { %12410 = vmatmul.mubr.f32.vlgmr.msra.gmra.mrb[2].mxu0 %v18800_v38 }
 0x3ce   :  { %12421 = vmatpush1.msra.mxu0 %v12341_v29  ;;  %12484 = vmatprep.mubr.f32.mxu0 %v18122_v2 }
 0x3cf   :  { %12494 = vmatprep.subr.mxu0 %v12256_v39 }
 0x3d5   :  { %12487 = vmatmul.mubr.f32.vlgmr.msra.gmra.mrb[2].mxu0 %v12324_v28 }
 0x3d6   :  { %12496 = vmatpush1.msra.mxu0 %v12258_v19  ;;  %v4438_v48 = vpop.xlane.xlu0 %4437  ;;  %12559 = vmatprep.mubr.f32.mxu0 %v18122_v2 }
 0x3d7   :  { %12572 = vmatprep.subr.mxu0 %v12336_v36  ;;  %v4440_v49 = vmul.f32 0.00390625, %v4438_v48 }
 0x3d9   :  { %v18810_v50 = vsub.f32 %v18740_v41, %v4440_v49  ;;  %v18813_v53 = vsub.f32 %v18744_v45, %v4440_v49  ;;  %v17642_v41 = vld [vmem:[%s19515_s1 + $0x20] sm:$0xf] }
 0x3da   :  { %v12725_v0 = vsel %vm108_vm0, %v17642_v41, 0 }
 0x3db   :  { %v4443_v59 = vmul.f32 %v18810_v50, %v18810_v50  ;;  %v4444_v57 = vmul.f32 %v18813_v53, %v18813_v53  ;;  %v12800_v61 = vand.u32 4294901760, %v12725_v0 }
 0x3dd   :  { %12563 = vmatmul.mubr.f32.vlgmr.msra.gmra.mrb[2].mxu0 %v12325_v35  ;;  %v4445_v45 = vsel %vm112_vm3, %v4443_v59, 0.0  ;;  %v4446_v31 = vsel %vm112_vm3, %v4444_v57, 0.0  ;;  %v12801_v5 = vsub.f32 %v12725_v0, %v12800_v61 }
 0x3de   :  { %12576 = vmatpush1.msra.mxu0 %v12342_v26  ;;  %v4447_v52 = vadd.f32 %v4446_v31, %v4445_v45  ;;  %12639 = vmatprep.mubr.f32.mxu0 %v18122_v2 }
 0x3df   :  { %12648 = vmatprep.subr.mxu0 %v12256_v39  ;;  %v12802_v12 = vand.u32 4294901760, %v12801_v5 }
 0x3e0   :  { %4448 = vadd.xlane.f32.xlu1 %v4447_v52 }
 0x3e1   :  { %v12803_v54 = vsub.f32 %v12801_v5, %v12802_v12 }
 0x3e3   :  { %v12804_v9 = vand.u32 4294901760, %v12803_v54 }
 0x3e5   :  { %12641 = vmatmul.mubr.f32.vlgmr.msra.gmra.mrb[2].mxu0 %v18800_v38 }
 0x3e6   :  { %12650 = vmatpush1.msra.mxu0 %v12258_v19  ;;  %12713 = vmatprep.mubr.f32.mxu0 %v18122_v2 }
 0x3e7   :  { %12734 = vmatprep.subr.mxu0 %v12733_v27 }
 0x3ed   :  { %12715 = vmatmul.mubr.f32.vlgmr.msra.gmra.mrb[2].mxu0 %v18800_v38  ;;  %v4569_v38 = vsub.f32 %v4493_v22, %v18865_v25 }
 0x3ee   :  { %12736 = vmatpush1.msra.mxu0 %v12735_v62  ;;  %12799 = vmatprep.mubr.f32.mxu0 %v18122_v2 }
 0x3ef   :  { %12816 = vmatprep.subr.mxu0 %v12815_v51  ;;  %v4570_v28 = vand.u32 4294901760, %v4569_v38 }
 0x3f1   :  { %v4571_v35 = vsub.f32 %v4569_v38, %v4570_v28 }
 0x3f5   :  { %12805 = vmatmul.mubr.f32.vlgmr.msra.gmra.mrb[2].mxu0 %v12804_v9 }
 0x3f6   :  { %12822 = vmatpush1.msra.mxu0 %v12821_v13  ;;  %12885 = vmatprep.mubr.f32.mxu0 %v18122_v2 }
 0x3f7   :  { %12895 = vmatprep.subr.mxu0 %v12812_v60  ;;  %v4967_v60 = vsel %vm108_vm0, %v4489_v58, 0  ;;  %v17627_v58 = vld [vmem:[%s19516_s2 + $0x8] sm:$0xf] }
 0x3fd   :  { %12887 = vmatmul.mubr.f32.vlgmr.msra.gmra.mrb[2].mxu0 %v12800_v61 }
 0x3fe   :  { %12898 = vmatpush1.msra.mxu0 %v12818_v10  ;;  %12961 = vmatprep.mubr.f32.mxu0 %v18122_v2 }
 0x3ff   :  { %12971 = vmatprep.subr.mxu0 %v12733_v27 }
 0x405   :  { %12964 = vmatmul.mubr.f32.vlgmr.msra.gmra.mrb[2].mxu0 %v12801_v5 }
 0x406   :  { %12973 = vmatpush1.msra.mxu0 %v12735_v62  ;;  %13036 = vmatprep.mubr.f32.mxu0 %v18122_v2 }
 0x407   :  { %13049 = vmatprep.subr.mxu0 %v12813_v63 }
 0x40d   :  { %13040 = vmatmul.mubr.f32.vlgmr.msra.gmra.mrb[2].mxu0 %v12802_v12 }
 0x40e   :  { %13053 = vmatpush1.msra.mxu0 %v12819_v34  ;;  %13116 = vmatprep.mubr.f32.mxu0 %v18122_v2 }
 0x40f   :  { %13125 = vmatprep.subr.mxu0 %v12733_v27 }
 0x415   :  { %13118 = vmatmul.mubr.f32.vlgmr.msra.gmra.mrb[2].mxu0 %v12800_v61 }
 0x416   :  { %13127 = vmatpush1.msra.mxu0 %v12735_v62  ;;  %13190 = vmatprep.mubr.f32.mxu0 %v18122_v2 }
 0x41d   :  { %13192 = vmatmul.mubr.f32.vlgmr.msra.gmra.mrb[2].mxu0 %v12800_v61  ;;  %v18928_v61 = vand.u32 4294901760, %v4967_v60 }
 0x41f   :  { %v18931_v5 = vsub.f32 %v4967_v60, %v18928_v61 }
 0x421   :  { %v5044_v12 = vand.u32 4294901760, %v18931_v5 }
 0x423   :  { %v5045_v54 = vsub.f32 %v18931_v5, %v5044_v12 }
 0x46d   :  { %v4449_v16 = vpop.xlane.xlu1 %4448 }
 0x46e   :  { %v4450_v37 = vmul.f32 0.00390625, %v4449_v16 }
 0x470   :  { %v4451_v3 = vadd.f32 1e-05, %v4450_v37 }
 0x472   :  { %18085 = vrsqrt.f32 %v4451_v3 }
 0x47c   :  { %v18086_v11 = vpop.eup %18085 }
 0x47d   :  { %v4454_v14 = vmul.f32 %v18086_v11, %v18813_v53  ;;  %v4453_v18 = vmul.f32 %v18086_v11, %v18810_v50  ;;  %v4572_v50 = vand.u32 4294901760, %v4571_v35 }
 0x47f   :  { %v18849_v20 = vmax.f32 %v4454_v14, 0.0  ;;  %v18851_v17 = vmax.f32 %v4453_v18, 0.0 }
 0x481   :  { %4459 = vrot.lane.b32.xlu1 %v18849_v20, %s18121_s15  ;;  %4457 = vrot.lane.b32.xlu0 %v18851_v17, %s18121_s15 }
 0x485   :  { %4463 = vrot.lane.b32.xlu0 %v18851_v17, %s18120_s14 }
 0x489   :  { %4465 = vrot.lane.b32.xlu0 %v18849_v20, %s18120_s14 }
 0x4f0   :  { %v18867_v32 = vpop.f32.mrb[2].mxu0 }
 0x4f1   :  { %v13200_v39 = vsel %vm112_vm3, %v18867_v32, 0.0  ;;  %v18871_v40 = vpop.f32.mrb[3].mxu0 }
 0x4f2   :  { %v13201_v42 = vsel %vm112_vm3, %v18871_v40, 0.0 }
 0x4f3   :  { %v4458_v47 = vpop.permute.xlu0 %4457  ;;  %v13202_v19 = vadd.f32 %v13201_v42, %v13200_v39  ;;  %v4460_v29 = vpop.permute.xlu1 %4459  ;;  %v5046_v39 = vand.u32 4294901760, %v5045_v54 }
 0x4f4   :  { %v18878_v26 = vsel %vm58_vm2, %v4458_v47, %v4460_v29  ;;  %v4462_v52 = vsel %vm58_vm2, %v4460_v29, %v4458_v47 }
 0x4f7   :  { %v4464_v36 = vpop.permute.xlu0 %4463 }
 0x4fb   :  { %v4466_v23 = vpop.permute.xlu0 %4465 }
 0x4fc   :  { %v4467_v33 = vsel %vm42_vm1, %v4464_v36, %v4466_v23  ;;  %v4468_v1 = vsel %vm42_vm1, %v4466_v23, %v4464_v36 }
 0x4fd   :  { %v4499_v4 = vsel %vm112_vm3, %v4467_v33, 0  ;;  %4481 = vrot.lane.b32.xlu1 %v4467_v33, %s18124_s19  ;;  %4475 = vrot.lane.b32.xlu0 %v4467_v33, %s18123_s18  ;;  %v4469_v24 = vsel %vm42_vm1, %v18878_v26, %v4468_v1  ;;  %v18912_v0 = vsel %vm45_vm4, %v4467_v33, %v4462_v52 }
 0x4fe   :  { %v4501_v43 = vand.u32 4294901760, %v4499_v4  ;;  %v4496_v48 = vsel %vm112_vm3, %v4469_v24, 0 }
 0x4ff   :  { %v4503_v49 = vand.u32 4294901760, %v4496_v48 }
 0x500   :  { %v4580_v53 = vsub.f32 %v4499_v4, %v4501_v43  ;;  %4502 = vmatprep.subr.mxu1 %v4501_v43 }
 0x501   :  { %5920 = vrot.lane.b32.xlu1 %v18849_v20, %s18123_s18  ;;  %v4586_v55 = vsub.f32 %v4496_v48, %v4503_v49  ;;  %4473 = vrot.lane.b32.xlu0 %v4469_v24, %s18123_s18 }
 0x502   :  { %4504 = vmatpush1.msra.mxu1 %v4503_v49  ;;  %v4581_v59 = vand.u32 4294901760, %v4580_v53 }
 0x503   :  { %v4587_v57 = vand.u32 4294901760, %v4586_v55  ;;  %4573 = vmatmul.mubr.f32.vlgmr.msra.gmra.mrb[0].mxu1 %v4572_v50 }
 0x504   :  { %v4582_v41 = vsub.f32 %v4580_v53, %v4581_v59  ;;  %4653 = vmatprep.mubr.f32.mxu1 %v18122_v2 }
 0x505   :  { %5926 = vrot.lane.b32.xlu1 %v18849_v20, %s18124_s19  ;;  %4479 = vrot.lane.b32.xlu0 %v4469_v24, %s18124_s19  ;;  %v4588_v27 = vsub.f32 %v4586_v55, %v4587_v57 }
 0x506   :  { %v4583_v45 = vand.u32 4294901760, %v4582_v41 }
 0x507   :  { %v4589_v31 = vand.u32 4294901760, %v4588_v27 }
 0x508   :  { %4584 = vmatprep.subr.mxu1 %v4583_v45 }
 0x509   :  { %7368 = vrot.lane.b32.xlu1 %v18878_v26, %s18123_s18  ;;  %5918 = vrot.lane.b32.xlu0 %v18851_v17, %s18123_s18 }
 0x50a   :  { %4590 = vmatpush1.msra.mxu1 %v4589_v31 }
 0x50b   :  { %4655 = vmatmul.mubr.f32.vlgmr.msra.gmra.mrb[0].mxu1 %v18865_v25  ;;  %4663 = vmatprep.subr.mxu1 %v4580_v53 }
 0x50c   :  { %4666 = vmatpush1.msra.mxu1 %v4586_v55  ;;  %4729 = vmatprep.mubr.f32.mxu1 %v18122_v2 }
 0x50d   :  { %4739 = vmatprep.subr.mxu1 %v4501_v43  ;;  %7374 = vrot.lane.b32.xlu1 %v18878_v26, %s18124_s19 }
 0x50e   :  { %5924 = vrot.lane.b32.xlu0 %v18851_v17, %s18124_s19 }
 0x511   :  { %7370 = vrot.lane.b32.xlu1 %v18912_v0, %s18123_s18 }
 0x513   :  { %4732 = vmatmul.mubr.f32.vlgmr.msra.gmra.mrb[0].mxu1 %v4569_v38 }
 0x514   :  { %4741 = vmatpush1.msra.mxu1 %v4503_v49  ;;  %4804 = vmatprep.mubr.f32.mxu1 %v18122_v2 }
 0x515   :  { %4817 = vmatprep.subr.mxu1 %v4581_v59  ;;  %7376 = vrot.lane.b32.xlu1 %v18912_v0, %s18124_s19 }
 0x51b   :  { %4808 = vmatmul.mubr.f32.vlgmr.msra.gmra.mrb[0].mxu1 %v4570_v28 }
 0x51c   :  { %4821 = vmatpush1.msra.mxu1 %v4587_v57  ;;  %4884 = vmatprep.mubr.f32.mxu1 %v18122_v2 }
 0x51d   :  { %4893 = vmatprep.subr.mxu1 %v4501_v43 }
 0x523   :  { %4886 = vmatmul.mubr.f32.vlgmr.msra.gmra.mrb[0].mxu1 %v18865_v25 }
 0x524   :  { %4895 = vmatpush1.msra.mxu1 %v4503_v49  ;;  %4958 = vmatprep.mubr.f32.mxu1 %v18122_v2 }
 0x52b   :  { %4960 = vmatmul.mubr.f32.vlgmr.msra.gmra.mrb[0].mxu1 %v18865_v25 }
 0x52c   :  { %5041 = vmatprep.mubr.f32.mxu1 %v18122_v2 }
 0x52d   :  { %13203 = vadd.xlane.f32.xlu0 %v13202_v19 }
 0x56f   :  { %v4482_v62 = vpop.permute.xlu1 %4481  ;;  %v4476_v63 = vpop.permute.xlu0 %4475 }
 0x573   :  { %v5921_v10 = vpop.permute.xlu1 %5920  ;;  %v4474_v15 = vpop.permute.xlu0 %4473 }
 0x574   :  { %v18937_v56 = vsel %vm83_vm5, %v4474_v15, %v4476_v63  ;;  %v4478_v9 = vsel %vm83_vm5, %v4476_v63, %v4474_v15  ;;  %v5443_v63 = vsel %vm108_vm0, %v17627_v58, 0 }
 0x575   :  { %v19017_v15 = vand.u32 4294901760, %v5443_v63 }
 0x577   :  { %v5927_v34 = vpop.permute.xlu1 %5926  ;;  %v4480_v51 = vpop.permute.xlu0 %4479 }
 0x578   :  { %v4483_v13 = vsel %vm90_vm6, %v4480_v51, %v4482_v62  ;;  %v4484_v16 = vsel %vm90_vm6, %v4482_v62, %v4480_v51 }
 0x579   :  { %v4485_v37 = vsel %vm18248_vm8, %v18937_v56, %v4484_v16  ;;  %v4486_v3 = vsel %vm18244_vm7, %v4478_v9, %v4483_v13  ;;  %v4488_v31 = vsel %vm18287_vm9, %v4483_v13, %v4478_v9  ;;  %v4487_v62 = vsel %vm18291_vm10, %v4484_v16, %v18937_v56 }
 0x57a   :  { %v4970_v11 = vsel %vm112_vm3, %v4485_v37, 0  ;;  %v4973_v14 = vsel %vm112_vm3, %v4486_v3, 0  ;;  %v5449_v52 = vsel %vm112_vm3, %v4488_v31, 0 }
 0x57b   :  { %v4975_v18 = vand.u32 4294901760, %v4973_v14  ;;  %v4977_v21 = vand.u32 4294901760, %v4970_v11  ;;  %v7369_v22 = vpop.permute.xlu1 %7368  ;;  %v5919_v25 = vpop.permute.xlu0 %5918  ;;  %v5451_v60 = vand.u32 4294901760, %v5449_v52 }
 0x57c   :  { %v18954_v28 = vsel %vm83_vm5, %v5919_v25, %v5921_v10  ;;  %v18958_v29 = vsel %vm83_vm5, %v5921_v10, %v5919_v25 }
 0x57d   :  { %v5054_v42 = vsub.f32 %v4973_v14, %v4975_v18  ;;  %v5060_v47 = vsub.f32 %v4970_v11, %v4977_v21  ;;  %4976 = vmatprep.subr.mxu1 %v4975_v18  ;;  %v5530_v10 = vsub.f32 %v5449_v52, %v5451_v60 }
 0x57e   :  { %4978 = vmatpush1.msra.mxu1 %v4977_v21 }
 0x57f   :  { %v7375_v38 = vpop.permute.xlu1 %7374  ;;  %5047 = vmatmul.mubr.f32.vlgmr.msra.gmra.mrb[0].mxu1 %v5046_v39  ;;  %v5055_v19 = vand.u32 4294901760, %v5054_v42  ;;  %v5061_v36 = vand.u32 4294901760, %v5060_v47  ;;  %v5531_v51 = vand.u32 4294901760, %v5530_v10 }
 0x580   :  { %v5925_v23 = vpop.permute.xlu0 %5924  ;;  %5127 = vmatprep.mubr.f32.mxu1 %v18122_v2 }
 0x581   :  { %v18963_v35 = vsel %vm90_vm6, %v5925_v23, %v5927_v34  ;;  %v18967_v33 = vsel %vm90_vm6, %v5927_v34, %v5925_v23  ;;  %v5056_v1 = vsub.f32 %v5054_v42, %v5055_v19  ;;  %v5062_v4 = vsub.f32 %v5060_v47, %v5061_v36 }
 0x582   :  { %v5932_v24 = vsel %vm18291_vm10, %v18967_v33, %v18954_v28  ;;  %v5933_v43 = vsel %vm18287_vm9, %v18963_v35, %v18958_v29  ;;  %v5532_v56 = vsub.f32 %v5530_v10, %v5531_v51  ;;  %v5930_v23 = vsel %vm18248_vm8, %v18954_v28, %v18967_v33 }
 0x583   :  { %v7371_v48 = vpop.permute.xlu1 %7370  ;;  %v5057_v49 = vand.u32 4294901760, %v5056_v1  ;;  %v5063_v50 = vand.u32 4294901760, %v5062_v4  ;;  %v5940_v4 = vsel %vm112_vm3, %v5930_v23, 0 }
 0x584   :  { %v18979_v55 = vsel %vm83_vm5, %v7369_v22, %v7371_v48  ;;  %v18991_v41 = vsel %vm83_vm5, %v7371_v48, %v7369_v22  ;;  %v5533_v16 = vand.u32 4294901760, %v5532_v56 }
 0x585   :  { %5058 = vmatprep.subr.mxu1 %v5057_v49 }
 0x586   :  { %5064 = vmatpush1.msra.mxu1 %v5063_v50  ;;  %v5947_v50 = vand.u32 4294901760, %v5940_v4 }
 0x587   :  { %v7377_v53 = vpop.permute.xlu1 %7376  ;;  %5129 = vmatmul.mubr.f32.vlgmr.msra.gmra.mrb[0].mxu1 %v18928_v61  ;;  %5137 = vmatprep.subr.mxu1 %v5054_v42 }
 0x588   :  { %v18983_v59 = vsel %vm90_vm6, %v7375_v38, %v7377_v53  ;;  %v18987_v57 = vsel %vm90_vm6, %v7377_v53, %v7375_v38  ;;  %5140 = vmatpush1.msra.mxu1 %v5060_v47  ;;  %5203 = vmatprep.mubr.f32.mxu1 %v18122_v2  ;;  %v6030_v52 = vsub.f32 %v5940_v4, %v5947_v50 }
 0x589   :  { %v7382_v27 = vsel %vm18291_vm10, %v18987_v57, %v18979_v55  ;;  %v7383_v45 = vsel %vm18287_vm9, %v18983_v59, %v18991_v41  ;;  %5213 = vmatprep.subr.mxu1 %v4975_v18 }
 0x58f   :  { %5206 = vmatmul.mubr.f32.vlgmr.msra.gmra.mrb[0].mxu1 %v18931_v5  ;;  %v5446_v5 = vsel %vm112_vm3, %v4487_v62, 0 }
 0x590   :  { %5215 = vmatpush1.msra.mxu1 %v4977_v21  ;;  %5278 = vmatprep.mubr.f32.mxu1 %v18122_v2  ;;  %v5453_v34 = vand.u32 4294901760, %v5446_v5 }
 0x591   :  { %5291 = vmatprep.subr.mxu1 %v5055_v19  ;;  %v17628_v19 = vld [vmem:[%s19516_s2 + $0xc] sm:$0xf] }
 0x592   :  { %v5536_v54 = vsub.f32 %v5446_v5, %v5453_v34  ;;  %v5937_v1 = vsel %vm108_vm0, %v17628_v19, 0 }
 0x593   :  { %v6012_v49 = vand.u32 4294901760, %v5937_v1 }
 0x594   :  { %v5537_v13 = vand.u32 4294901760, %v5536_v54 }
 0x595   :  { %v6013_v31 = vsub.f32 %v5937_v1, %v6012_v49 }
 0x596   :  { %v5538_v3 = vsub.f32 %v5536_v54, %v5537_v13 }
 0x597   :  { %5282 = vmatmul.mubr.f32.vlgmr.msra.gmra.mrb[0].mxu1 %v5044_v12  ;;  %v5519_v12 = vsub.f32 %v5443_v63, %v19017_v15  ;;  %v6014_v62 = vand.u32 4294901760, %v6013_v31  ;;  %v6031_v63 = vand.u32 4294901760, %v6030_v52 }
 0x598   :  { %5295 = vmatpush1.msra.mxu1 %v5061_v36  ;;  %5358 = vmatprep.mubr.f32.mxu1 %v18122_v2  ;;  %v5539_v14 = vand.u32 4294901760, %v5538_v3 }
 0x599   :  { %5367 = vmatprep.subr.mxu1 %v4975_v18  ;;  %v5520_v9 = vand.u32 4294901760, %v5519_v12  ;;  %v6015_v5 = vsub.f32 %v6013_v31, %v6014_v62 }
 0x59b   :  { %v5521_v37 = vsub.f32 %v5519_v12, %v5520_v9 }
 0x59d   :  { %v5522_v11 = vand.u32 4294901760, %v5521_v37 }
 0x59f   :  { %5360 = vmatmul.mubr.f32.vlgmr.msra.gmra.mrb[0].mxu1 %v18928_v61 }
 0x5a0   :  { %5369 = vmatpush1.msra.mxu1 %v4977_v21  ;;  %5432 = vmatprep.mubr.f32.mxu1 %v18122_v2 }
 0x5a1   :  { %5452 = vmatprep.subr.mxu1 %v5451_v60 }
 0x5a7   :  { %5434 = vmatmul.mubr.f32.vlgmr.msra.gmra.mrb[0].mxu1 %v18928_v61 }
 0x5a8   :  { %5454 = vmatpush1.msra.mxu1 %v5453_v34  ;;  %5517 = vmatprep.mubr.f32.mxu1 %v18122_v2 }
 0x5a9   :  { %5534 = vmatprep.subr.mxu1 %v5533_v16 }
 0x5af   :  { %5523 = vmatmul.mubr.f32.vlgmr.msra.gmra.mrb[0].mxu1 %v5522_v11 }
 0x5b0   :  { %5540 = vmatpush1.msra.mxu1 %v5539_v14  ;;  %5603 = vmatprep.mubr.f32.mxu1 %v18122_v2 }
 0x5b1   :  { %5613 = vmatprep.subr.mxu1 %v5530_v10  ;;  %v6032_v10 = vsub.f32 %v6030_v52, %v6031_v63 }
 0x5b7   :  { %5605 = vmatmul.mubr.f32.vlgmr.msra.gmra.mrb[0].mxu1 %v19017_v15 }
 0x5b8   :  { %5616 = vmatpush1.msra.mxu1 %v5536_v54  ;;  %5679 = vmatprep.mubr.f32.mxu1 %v18122_v2 }
 0x5b9   :  { %5689 = vmatprep.subr.mxu1 %v5451_v60 }
 0x5ba   :  { %v13204_v18 = vpop.xlane.xlu0 %13203 }
 0x5bb   :  { %v13205_v61 = vmul.f32 0.00390625, %v13204_v18 }
 0x5bd   :  { %v19028_v21 = vsub.f32 %v18867_v32, %v13205_v61  ;;  %v19031_v22 = vsub.f32 %v18871_v40, %v13205_v61  ;;  %v5931_v32 = vsel %vm18244_vm7, %v18958_v29, %v18963_v35  ;;  %v6896_v29 = vsel %vm112_vm3, %v5932_v24, 0 }
 0x5be   :  { %v5943_v40 = vsel %vm112_vm3, %v5931_v32, 0  ;;  %v17630_v32 = vld [vmem:[%s19516_s2 + $0x14] sm:$0xf] }
 0x5bf   :  { %v13208_v25 = vmul.f32 %v19028_v21, %v19028_v21  ;;  %v13209_v39 = vmul.f32 %v19031_v22, %v19031_v22  ;;  %5682 = vmatmul.mubr.f32.vlgmr.msra.gmra.mrb[0].mxu1 %v5519_v12  ;;  %v5945_v36 = vand.u32 4294901760, %v5943_v40  ;;  %v6033_v12 = vand.u32 4294901760, %v6032_v10 }
 0x5c0   :  { %5691 = vmatpush1.msra.mxu1 %v5453_v34  ;;  %5754 = vmatprep.mubr.f32.mxu1 %v18122_v2  ;;  %v6893_v19 = vsel %vm108_vm0, %v17630_v32, 0 }
 0x5c1   :  { %v13210_v42 = vsel %vm112_vm3, %v13208_v25, 0.0  ;;  %v13211_v47 = vsel %vm112_vm3, %v13209_v39, 0.0  ;;  %5767 = vmatprep.subr.mxu1 %v5531_v51  ;;  %v6024_v48 = vsub.f32 %v5943_v40, %v5945_v36  ;;  %v6016_v51 = vand.u32 4294901760, %v6015_v5  ;;  %v17631_v5 = vld [vmem:[%s19516_s2 + $0x18] sm:$0xf] }
 0x5c2   :  { %v13212_v38 = vadd.f32 %v13211_v47, %v13210_v42 }
 0x5c3   :  { %v6025_v53 = vand.u32 4294901760, %v6024_v48 }
 0x5c4   :  { %13213 = vadd.xlane.f32.xlu1 %v13212_v38  ;;  %v6899_v38 = vsel %vm112_vm3, %v5933_v43, 0  ;;  %v19093_v43 = vand.u32 4294901760, %v6893_v19 }
 0x5c5   :  { %v6026_v58 = vsub.f32 %v6024_v48, %v6025_v53  ;;  %v6901_v40 = vand.u32 4294901760, %v6899_v38 }
 0x5c6   :  { %v6969_v1 = vsub.f32 %v6893_v19, %v19093_v43  ;;  %v7868_v19 = vsel %vm112_vm3, %v18878_v26, 0 }
 0x5c7   :  { %5758 = vmatmul.mubr.f32.vlgmr.msra.gmra.mrb[0].mxu1 %v5520_v9  ;;  %v6418_v9 = vsel %vm112_vm3, %v18851_v17, 0  ;;  %v6980_v35 = vsub.f32 %v6899_v38, %v6901_v40  ;;  %v17632_v38 = vld [vmem:[%s19516_s2 + $0x1c] sm:$0xf] }
 0x5c8   :  { %5771 = vmatpush1.msra.mxu1 %v5537_v13  ;;  %5834 = vmatprep.mubr.f32.mxu1 %v18122_v2  ;;  %v6425_v37 = vand.u32 4294901760, %v6418_v9 }
 0x5c9   :  { %5843 = vmatprep.subr.mxu1 %v5451_v60  ;;  %v6027_v60 = vand.u32 4294901760, %v6026_v58  ;;  %v6981_v23 = vand.u32 4294901760, %v6980_v35 }
 0x5ca   :  { %v6508_v11 = vsub.f32 %v6418_v9, %v6425_v37 }
 0x5cc   :  { %v6509_v61 = vand.u32 4294901760, %v6508_v11 }
 0x5ce   :  { %v6510_v17 = vsub.f32 %v6508_v11, %v6509_v61 }
 0x5cf   :  { %5836 = vmatmul.mubr.f32.vlgmr.msra.gmra.mrb[0].mxu1 %v19017_v15 }
 0x5d0   :  { %5845 = vmatpush1.msra.mxu1 %v5453_v34  ;;  %5908 = vmatprep.mubr.f32.mxu1 %v18122_v2  ;;  %v17629_v34 = vld [vmem:[%s19516_s2 + $0x10] sm:$0xf]  ;;  %v6511_v47 = vand.u32 4294901760, %v6510_v17 }
 0x5d1   :  { %5946 = vmatprep.subr.mxu1 %v5945_v36  ;;  %v6415_v56 = vsel %vm108_vm0, %v17629_v34, 0 }
 0x5d2   :  { %v6490_v16 = vand.u32 4294901760, %v6415_v56 }
 0x5d4   :  { %v6491_v3 = vsub.f32 %v6415_v56, %v6490_v16 }
 0x5d6   :  { %v6492_v18 = vand.u32 4294901760, %v6491_v3 }
 0x5d7   :  { %5910 = vmatmul.mubr.f32.vlgmr.msra.gmra.mrb[0].mxu1 %v19017_v15  ;;  %v6421_v15 = vsel %vm112_vm3, %v18849_v20, 0 }
 0x5d8   :  { %5948 = vmatpush1.msra.mxu1 %v5947_v50  ;;  %6011 = vmatprep.mubr.f32.mxu1 %v18122_v2  ;;  %v6423_v54 = vand.u32 4294901760, %v6421_v15  ;;  %v6493_v39 = vsub.f32 %v6491_v3, %v6492_v18 }
 0x5d9   :  { %6028 = vmatprep.subr.mxu1 %v6027_v60 }
 0x5da   :  { %v6502_v13 = vsub.f32 %v6421_v15, %v6423_v54  ;;  %v6494_v42 = vand.u32 4294901760, %v6493_v39 }
 0x5dc   :  { %v6503_v20 = vand.u32 4294901760, %v6502_v13 }
 0x5de   :  { %v6504_v14 = vsub.f32 %v6502_v13, %v6503_v20 }
 0x5df   :  { %6017 = vmatmul.mubr.f32.vlgmr.msra.gmra.mrb[0].mxu1 %v6016_v51  ;;  %v7380_v51 = vsel %vm18248_vm8, %v18979_v55, %v18987_v57 }
 0x5e0   :  { %6034 = vmatpush1.msra.mxu1 %v6033_v12  ;;  %6097 = vmatprep.mubr.f32.mxu1 %v18122_v2  ;;  %v6505_v25 = vand.u32 4294901760, %v6504_v14  ;;  %v7387_v12 = vsel %vm108_vm0, %v17631_v5, 0  ;;  %v7390_v15 = vsel %vm112_vm3, %v7380_v51, 0 }
 0x5e1   :  { %6107 = vmatprep.subr.mxu1 %v6024_v48  ;;  %v6982_v48 = vsub.f32 %v6980_v35, %v6981_v23  ;;  %v7397_v9 = vand.u32 4294901760, %v7390_v15 }
 0x5e3   :  { %v6983_v28 = vand.u32 4294901760, %v6982_v48  ;;  %v7480_v14 = vsub.f32 %v7390_v15, %v7397_v9 }
 0x5e7   :  { %6099 = vmatmul.mubr.f32.vlgmr.msra.gmra.mrb[0].mxu1 %v6012_v49 }
 0x5e8   :  { %6110 = vmatpush1.msra.mxu1 %v6030_v52  ;;  %6173 = vmatprep.mubr.f32.mxu1 %v18122_v2 }
 0x5e9   :  { %6183 = vmatprep.subr.mxu1 %v5945_v36 }
 0x5ef   :  { %6176 = vmatmul.mubr.f32.vlgmr.msra.gmra.mrb[0].mxu1 %v6013_v31 }
 0x5f0   :  { %6185 = vmatpush1.msra.mxu1 %v5947_v50  ;;  %6248 = vmatprep.mubr.f32.mxu1 %v18122_v2 }
 0x5f1   :  { %6261 = vmatprep.subr.mxu1 %v6025_v53 }
 0x5f7   :  { %6252 = vmatmul.mubr.f32.vlgmr.msra.gmra.mrb[0].mxu1 %v6014_v62  ;;  %v7381_v62 = vsel %vm18244_vm7, %v18991_v41, %v18983_v59  ;;  %v8346_v59 = vsel %vm112_vm3, %v7382_v27, 0 }
 0x5f8   :  { %6265 = vmatpush1.msra.mxu1 %v6031_v63  ;;  %6328 = vmatprep.mubr.f32.mxu1 %v18122_v2  ;;  %v7393_v60 = vsel %vm112_vm3, %v7381_v62, 0 }
 0x5f9   :  { %6337 = vmatprep.subr.mxu1 %v5945_v36  ;;  %v6903_v36 = vand.u32 4294901760, %v6896_v29  ;;  %v7395_v10 = vand.u32 4294901760, %v7393_v60 }
 0x5fb   :  { %v6986_v4 = vsub.f32 %v6896_v29, %v6903_v36  ;;  %v7474_v34 = vsub.f32 %v7393_v60, %v7395_v10 }
 0x5ff   :  { %6330 = vmatmul.mubr.f32.vlgmr.msra.gmra.mrb[0].mxu1 %v6012_v49 }
 0x600   :  { %6339 = vmatpush1.msra.mxu1 %v5947_v50  ;;  %6402 = vmatprep.mubr.f32.mxu1 %v18122_v2  ;;  %v6987_v50 = vand.u32 4294901760, %v6986_v4 }
 0x601   :  { %6424 = vmatprep.subr.mxu1 %v6423_v54 }
 0x602   :  { %v6988_v24 = vsub.f32 %v6986_v4, %v6987_v50 }
 0x604   :  { %v6989_v31 = vand.u32 4294901760, %v6988_v24  ;;  %v8349_v24 = vsel %vm112_vm3, %v7383_v45, 0 }
 0x607   :  { %6404 = vmatmul.mubr.f32.vlgmr.msra.gmra.mrb[0].mxu1 %v6012_v49  ;;  %v6970_v49 = vand.u32 4294901760, %v6969_v1 }
 0x608   :  { %6426 = vmatpush1.msra.mxu1 %v6425_v37  ;;  %6489 = vmatprep.mubr.f32.mxu1 %v18122_v2 }
 0x609   :  { %6506 = vmatprep.subr.mxu1 %v6505_v25  ;;  %v6971_v33 = vsub.f32 %v6969_v1, %v6970_v49 }
 0x60b   :  { %v6972_v53 = vand.u32 4294901760, %v6971_v33 }
 0x60f   :  { %6495 = vmatmul.mubr.f32.vlgmr.msra.gmra.mrb[0].mxu1 %v6494_v42 }
 0x610   :  { %6512 = vmatpush1.msra.mxu1 %v6511_v47  ;;  %6575 = vmatprep.mubr.f32.mxu1 %v18122_v2  ;;  %v7871_v47 = vsel %vm112_vm3, %v18912_v0, 0 }
 0x611   :  { %6585 = vmatprep.subr.mxu1 %v6502_v13  ;;  %v7873_v32 = vand.u32 4294901760, %v7871_v47 }
 0x613   :  { %v7952_v29 = vsub.f32 %v7871_v47, %v7873_v32 }
 0x615   :  { %v7953_v0 = vand.u32 4294901760, %v7952_v29 }
 0x617   :  { %6577 = vmatmul.mubr.f32.vlgmr.msra.gmra.mrb[0].mxu1 %v6490_v16 }
 0x618   :  { %6588 = vmatpush1.msra.mxu1 %v6508_v11  ;;  %6651 = vmatprep.mubr.f32.mxu1 %v18122_v2 }
 0x619   :  { %6661 = vmatprep.subr.mxu1 %v6423_v54 }
 0x61f   :  { %6654 = vmatmul.mubr.f32.vlgmr.msra.gmra.mrb[0].mxu1 %v6491_v3 }
 0x620   :  { %6663 = vmatpush1.msra.mxu1 %v6425_v37  ;;  %6726 = vmatprep.mubr.f32.mxu1 %v18122_v2 }
 0x621   :  { %6739 = vmatprep.subr.mxu1 %v6503_v20 }
 0x627   :  { %6730 = vmatmul.mubr.f32.vlgmr.msra.gmra.mrb[0].mxu1 %v6492_v18  ;;  %v7481_v18 = vand.u32 4294901760, %v7480_v14 }
 0x628   :  { %6743 = vmatpush1.msra.mxu1 %v6509_v61  ;;  %6806 = vmatprep.mubr.f32.mxu1 %v18122_v2 }
 0x629   :  { %6815 = vmatprep.subr.mxu1 %v6423_v54  ;;  %v19117_v54 = vand.u32 4294901760, %v7387_v12  ;;  %v7482_v39 = vsub.f32 %v7480_v14, %v7481_v18 }
 0x62b   :  { %v7463_v20 = vsub.f32 %v7387_v12, %v19117_v54  ;;  %v7483_v42 = vand.u32 4294901760, %v7482_v39 }
 0x62f   :  { %6808 = vmatmul.mubr.f32.vlgmr.msra.gmra.mrb[0].mxu1 %v6490_v16 }
 0x630   :  { %6817 = vmatpush1.msra.mxu1 %v6425_v37  ;;  %6880 = vmatprep.mubr.f32.mxu1 %v18122_v2  ;;  %v7475_v37 = vand.u32 4294901760, %v7474_v34 }
 0x631   :  { %6902 = vmatprep.subr.mxu1 %v6901_v40 }
 0x637   :  { %6882 = vmatmul.mubr.f32.vlgmr.msra.gmra.mrb[0].mxu1 %v6490_v16 }
 0x638   :  { %6904 = vmatpush1.msra.mxu1 %v6903_v36  ;;  %6967 = vmatprep.mubr.f32.mxu1 %v18122_v2 }
 0x639   :  { %6984 = vmatprep.subr.mxu1 %v6983_v28 }
 0x63f   :  { %6973 = vmatmul.mubr.f32.vlgmr.msra.gmra.mrb[0].mxu1 %v6972_v53  ;;  %v17633_v53 = vld [vmem:[%s19516_s2 + $0x20] sm:$0xf] }
 0x640   :  { %6990 = vmatpush1.msra.mxu1 %v6989_v31  ;;  %7053 = vmatprep.mubr.f32.mxu1 %v18122_v2  ;;  %v19167_v31 = vand.u32 4294901760, %v8349_v24 }
 0x641   :  { %7063 = vmatprep.subr.mxu1 %v6980_v35 }
 0x642   :  { %v8430_v41 = vsub.f32 %v8349_v24, %v19167_v31 }
 0x644   :  { %v8431_v62 = vand.u32 4294901760, %v8430_v41 }
 0x646   :  { %v8432_v55 = vsub.f32 %v8430_v41, %v8431_v62 }
 0x647   :  { %7055 = vmatmul.mubr.f32.vlgmr.msra.gmra.mrb[0].mxu1 %v19093_v43 }
 0x648   :  { %7066 = vmatpush1.msra.mxu1 %v6986_v4  ;;  %7129 = vmatprep.mubr.f32.mxu1 %v18122_v2  ;;  %v8433_v5 = vand.u32 4294901760, %v8432_v55 }
 0x649   :  { %7139 = vmatprep.subr.mxu1 %v6901_v40 }
 0x64f   :  { %7132 = vmatmul.mubr.f32.vlgmr.msra.gmra.mrb[0].mxu1 %v6969_v1  ;;  %v7954_v1 = vsub.f32 %v7952_v29, %v7953_v0 }
 0x650   :  { %7141 = vmatpush1.msra.mxu1 %v6903_v36  ;;  %7204 = vmatprep.mubr.f32.mxu1 %v18122_v2 }
 0x651   :  { %v13214_v52 = vpop.xlane.xlu1 %13213  ;;  %7217 = vmatprep.subr.mxu1 %v6981_v23 }
 0x652   :  { %v13215_v58 = vmul.f32 0.00390625, %v13214_v52  ;;  %v8343_v52 = vsel %vm108_vm0, %v17633_v53, 0 }
 0x653   :  { %v19178_v45 = vand.u32 4294901760, %v8343_v52 }
 0x654   :  { %v13216_v63 = vadd.f32 1e-05, %v13215_v58  ;;  %v19180_v58 = vand.u32 4294901760, %v8346_v59 }
 0x656   :  { %18087 = vrsqrt.f32 %v13216_v63  ;;  %v8419_v63 = vsub.f32 %v8343_v52, %v19178_v45  ;;  %v8436_v60 = vsub.f32 %v8346_v59, %v19180_v58 }
 0x657   :  { %7208 = vmatmul.mubr.f32.vlgmr.msra.gmra.mrb[0].mxu1 %v6970_v49  ;;  %v7955_v49 = vand.u32 4294901760, %v7954_v1  ;;  %v13254_v1 = vld [vmem:[%s19516_s2] sm:$0xf] }
 0x658   :  { %7221 = vmatpush1.msra.mxu1 %v6987_v50  ;;  %7284 = vmatprep.mubr.f32.mxu1 %v18122_v2  ;;  %v8420_v57 = vand.u32 4294901760, %v8419_v63  ;;  %v8437_v27 = vand.u32 4294901760, %v8436_v60 }
 0x659   :  { %7293 = vmatprep.subr.mxu1 %v6901_v40  ;;  %v7865_v40 = vsel %vm108_vm0, %v17632_v38, 0 }
 0x65a   :  { %v7940_v35 = vand.u32 4294901760, %v7865_v40  ;;  %v8438_v51 = vsub.f32 %v8436_v60, %v8437_v27 }
 0x65c   :  { %v8439_v15 = vand.u32 4294901760, %v8438_v51 }
 0x65f   :  { %7286 = vmatmul.mubr.f32.vlgmr.msra.gmra.mrb[0].mxu1 %v19093_v43 }
 0x660   :  { %v18088_v56 = vpop.eup %18087  ;;  %7295 = vmatpush1.msra.mxu1 %v6903_v36  ;;  %7358 = vmatprep.mubr.f32.mxu1 %v18122_v2  ;;  %v7941_v36 = vsub.f32 %v7865_v40, %v7940_v35 }
 0x661   :  { %v13219_v13 = vmul.f32 %v18088_v56, %v19031_v22  ;;  %v13218_v16 = vmul.f32 %v18088_v56, %v19028_v21  ;;  %7396 = vmatprep.subr.mxu1 %v7395_v10  ;;  %v7476_v22 = vsub.f32 %v7474_v34, %v7475_v37  ;;  %v7464_v21 = vand.u32 4294901760, %v7463_v20 }
 0x662   :  { %v7942_v4 = vand.u32 4294901760, %v7941_v36 }
 0x663   :  { %v19124_v3 = vmax.f32 %v13219_v13, 0.0  ;;  %v19126_v11 = vmax.f32 %v13218_v16, 0.0  ;;  %v7477_v61 = vand.u32 4294901760, %v7476_v22  ;;  %v7465_v25 = vsub.f32 %v7463_v20, %v7464_v21 }
 0x664   :  { %v7943_v50 = vsub.f32 %v7941_v36, %v7942_v4 }
 0x665   :  { %13224 = vrot.lane.b32.xlu1 %v19124_v3, %s18121_s15  ;;  %13222 = vrot.lane.b32.xlu0 %v19126_v11, %s18121_s15  ;;  %v7466_v17 = vand.u32 4294901760, %v7465_v25 }
 0x666   :  { %v7944_v28 = vand.u32 4294901760, %v7943_v50 }
 0x667   :  { %7360 = vmatmul.mubr.f32.vlgmr.msra.gmra.mrb[0].mxu1 %v19093_v43  ;;  %v7875_v43 = vand.u32 4294901760, %v7868_v19 }
 0x668   :  { %7398 = vmatpush1.msra.mxu1 %v7397_v9  ;;  %7461 = vmatprep.mubr.f32.mxu1 %v18122_v2 }
 0x669   :  { %13228 = vrot.lane.b32.xlu0 %v19126_v11, %s18120_s14  ;;  %7478 = vmatprep.subr.mxu1 %v7477_v61  ;;  %v7958_v23 = vsub.f32 %v7868_v19, %v7875_v43 }
 0x66b   :  { %v7959_v48 = vand.u32 4294901760, %v7958_v23 }
 0x66d   :  { %13230 = vrot.lane.b32.xlu0 %v19124_v3, %s18120_s14  ;;  %v7960_v26 = vsub.f32 %v7958_v23, %v7959_v48 }
 0x66f   :  { %7467 = vmatmul.mubr.f32.vlgmr.msra.gmra.mrb[0].mxu1 %v7466_v17  ;;  %v7961_v33 = vand.u32 4294901760, %v7960_v26 }
 0x670   :  { %7484 = vmatpush1.msra.mxu1 %v7483_v42  ;;  %7547 = vmatprep.mubr.f32.mxu1 %v18122_v2 }
 0x671   :  { %7557 = vmatprep.subr.mxu1 %v7474_v34 }
 0x677   :  { %7549 = vmatmul.mubr.f32.vlgmr.msra.gmra.mrb[0].mxu1 %v19117_v54 }
 0x678   :  { %7560 = vmatpush1.msra.mxu1 %v7480_v14  ;;  %7623 = vmatprep.mubr.f32.mxu1 %v18122_v2 }
 0x679   :  { %7633 = vmatprep.subr.mxu1 %v7395_v10 }
 0x67f   :  { %7626 = vmatmul.mubr.f32.vlgmr.msra.gmra.mrb[0].mxu1 %v7463_v20 }
 0x680   :  { %7635 = vmatpush1.msra.mxu1 %v7397_v9  ;;  %7698 = vmatprep.mubr.f32.mxu1 %v18122_v2 }
 0x681   :  { %7711 = vmatprep.subr.mxu1 %v7475_v37  ;;  %v17643_v37 = vld [vmem:[%s19516_s2 + $0x4] sm:$0xf] }
 0x687   :  { %7702 = vmatmul.mubr.f32.vlgmr.msra.gmra.mrb[0].mxu1 %v7464_v21  ;;  %v13257_v21 = vsel %vm108_vm0, %v17643_v37, 0 }
 0x688   :  { %7715 = vmatpush1.msra.mxu1 %v7481_v18  ;;  %7778 = vmatprep.mubr.f32.mxu1 %v18122_v2  ;;  %v13332_v25 = vand.u32 4294901760, %v13257_v21 }
 0x689   :  { %7787 = vmatprep.subr.mxu1 %v7395_v10  ;;  %v8421_v10 = vsub.f32 %v8419_v63, %v8420_v57 }
 0x68a   :  { %v13333_v38 = vsub.f32 %v13257_v21, %v13332_v25 }
 0x68b   :  { %v8422_v12 = vand.u32 4294901760, %v8421_v10 }
 0x68c   :  { %v13334_v19 = vand.u32 4294901760, %v13333_v38 }
 0x68f   :  { %7780 = vmatmul.mubr.f32.vlgmr.msra.gmra.mrb[0].mxu1 %v19117_v54 }
 0x690   :  { %7789 = vmatpush1.msra.mxu1 %v7397_v9  ;;  %7852 = vmatprep.mubr.f32.mxu1 %v18122_v2 }
 0x691   :  { %7874 = vmatprep.subr.mxu1 %v7873_v32 }
 0x697   :  { %7854 = vmatmul.mubr.f32.vlgmr.msra.gmra.mrb[0].mxu1 %v19117_v54 }
 0x698   :  { %7876 = vmatpush1.msra.mxu1 %v7875_v43  ;;  %7939 = vmatprep.mubr.f32.mxu1 %v18122_v2 }
 0x699   :  { %7956 = vmatprep.subr.mxu1 %v7955_v49 }
 0x69f   :  { %7945 = vmatmul.mubr.f32.vlgmr.msra.gmra.mrb[0].mxu1 %v7944_v28 }
 0x6a0   :  { %7962 = vmatpush1.msra.mxu1 %v7961_v33  ;;  %8025 = vmatprep.mubr.f32.mxu1 %v18122_v2 }
 0x6a1   :  { %8035 = vmatprep.subr.mxu1 %v7952_v29 }
 0x6a7   :  { %8027 = vmatmul.mubr.f32.vlgmr.msra.gmra.mrb[0].mxu1 %v7940_v35 }
 0x6a8   :  { %8038 = vmatpush1.msra.mxu1 %v7958_v23  ;;  %8101 = vmatprep.mubr.f32.mxu1 %v18122_v2 }
 0x6a9   :  { %8111 = vmatprep.subr.mxu1 %v7873_v32 }
 0x6af   :  { %8104 = vmatmul.mubr.f32.vlgmr.msra.gmra.mrb[0].mxu1 %v7941_v36 }
 0x6b0   :  { %8113 = vmatpush1.msra.mxu1 %v7875_v43  ;;  %8176 = vmatprep.mubr.f32.mxu1 %v18122_v2 }
 0x6b1   :  { %8189 = vmatprep.subr.mxu1 %v7953_v0 }
 0x6b7   :  { %8180 = vmatmul.mubr.f32.vlgmr.msra.gmra.mrb[0].mxu1 %v7942_v4  ;;  %v13731_v4 = vsel %vm108_vm0, %v13254_v1, 0 }
 0x6b8   :  { %8193 = vmatpush1.msra.mxu1 %v7959_v48  ;;  %8256 = vmatprep.mubr.f32.mxu1 %v18122_v2  ;;  %v19254_v48 = vand.u32 4294901760, %v13731_v4 }
 0x6b9   :  { %8265 = vmatprep.subr.mxu1 %v7873_v32 }
 0x6ba   :  { %v19257_v26 = vsub.f32 %v13731_v4, %v19254_v48 }
 0x6bc   :  { %v13808_v33 = vand.u32 4294901760, %v19257_v26 }
 0x6bf   :  { %8258 = vmatmul.mubr.f32.vlgmr.msra.gmra.mrb[0].mxu1 %v7940_v35 }
 0x6c0   :  { %8267 = vmatpush1.msra.mxu1 %v7875_v43  ;;  %8330 = vmatprep.mubr.f32.mxu1 %v18122_v2 }
 0x6c1   :  { %8352 = vmatprep.subr.mxu1 %v19167_v31 }
 0x6c7   :  { %8332 = vmatmul.mubr.f32.vlgmr.msra.gmra.mrb[0].mxu1 %v7940_v35  ;;  %v13335_v35 = vsub.f32 %v13333_v38, %v13334_v19 }
 0x6c8   :  { %8354 = vmatpush1.msra.mxu1 %v19180_v58  ;;  %8417 = vmatprep.mubr.f32.mxu1 %v18122_v2 }
 0x6c9   :  { %8434 = vmatprep.subr.mxu1 %v8433_v5  ;;  %v13336_v36 = vand.u32 4294901760, %v13335_v35 }
 0x6cf   :  { %8423 = vmatmul.mubr.f32.vlgmr.msra.gmra.mrb[0].mxu1 %v8422_v12 }
 0x6d0   :  { %8440 = vmatpush1.msra.mxu1 %v8439_v15  ;;  %8503 = vmatprep.mubr.f32.mxu1 %v18122_v2 }
 0x6d1   :  { %8513 = vmatprep.subr.mxu1 %v8430_v41 }
 0x6d7   :  { %v13223_v34 = vpop.permute.xlu0 %13222  ;;  %8505 = vmatmul.mubr.f32.vlgmr.msra.gmra.mrb[0].mxu1 %v19178_v45  ;;  %v13225_v13 = vpop.permute.xlu1 %13224 }
 0x6d8   :  { %8516 = vmatpush1.msra.mxu1 %v8436_v60  ;;  %8579 = vmatprep.mubr.f32.mxu1 %v18122_v2  ;;  %v19205_v20 = vsel %vm58_vm2, %v13223_v34, %v13225_v13  ;;  %v13227_v39 = vsel %vm58_vm2, %v13225_v13, %v13223_v34 }
 0x6d9   :  { %8589 = vmatprep.subr.mxu1 %v19167_v31 }
 0x6db   :  { %v13229_v54 = vpop.permute.xlu0 %13228 }
 0x6df   :  { %v13231_v56 = vpop.permute.xlu0 %13230  ;;  %8582 = vmatmul.mubr.f32.vlgmr.msra.gmra.mrb[0].mxu1 %v8419_v63 }
 0x6e0   :  { %v13232_v9 = vsel %vm42_vm1, %v13229_v54, %v13231_v56  ;;  %v13233_v16 = vsel %vm42_vm1, %v13231_v56, %v13229_v54  ;;  %8591 = vmatpush1.msra.mxu1 %v19180_v58  ;;  %8654 = vmatprep.mubr.f32.mxu1 %v18122_v2 }
 0x6e1   :  { %13246 = vrot.lane.b32.xlu1 %v13232_v9, %s18124_s19  ;;  %13240 = vrot.lane.b32.xlu0 %v13232_v9, %s18123_s18  ;;  %v13234_v14 = vsel %vm42_vm1, %v19205_v20, %v13233_v16  ;;  %v13263_v22 = vsel %vm112_vm3, %v13232_v9, 0  ;;  %v19225_v42 = vsel %vm45_vm4, %v13232_v9, %v13227_v39 }
 0x6e2   :  { %8667 = vmatprep.subr.mxu1 %v8431_v62  ;;  %v13265_v18 = vand.u32 4294901760, %v13263_v22  ;;  %v13260_v61 = vsel %vm112_vm3, %v13234_v14, 0 }
 0x6e3   :  { %v13267_v17 = vand.u32 4294901760, %v13260_v61 }
 0x6e4   :  { %v13344_v47 = vsub.f32 %v13263_v22, %v13265_v18 }
 0x6e5   :  { %14683 = vrot.lane.b32.xlu1 %v19124_v3, %s18123_s18  ;;  %13238 = vrot.lane.b32.xlu0 %v13234_v14, %s18123_s18  ;;  %v13350_v32 = vsub.f32 %v13260_v61, %v13267_v17 }
 0x6e6   :  { %v13345_v40 = vand.u32 4294901760, %v13344_v47 }
 0x6e7   :  { %8658 = vmatmul.mubr.f32.vlgmr.msra.gmra.mrb[0].mxu1 %v8420_v57  ;;  %v13351_v30 = vand.u32 4294901760, %v13350_v32 }
 0x6e8   :  { %8671 = vmatpush1.msra.mxu1 %v8437_v27  ;;  %8734 = vmatprep.mubr.f32.mxu1 %v18122_v2  ;;  %v13346_v29 = vsub.f32 %v13344_v47, %v13345_v40 }
 0x6e9   :  { %14689 = vrot.lane.b32.xlu1 %v19124_v3, %s18124_s19  ;;  %13244 = vrot.lane.b32.xlu0 %v13234_v14, %s18124_s19  ;;  %v13352_v43 = vsub.f32 %v13350_v32, %v13351_v30 }
 0x6ea   :  { %8743 = vmatprep.subr.mxu1 %v19167_v31  ;;  %v13347_v0 = vand.u32 4294901760, %v13346_v29  ;;  %v13809_v31 = vsub.f32 %v19257_v26, %v13808_v33 }
 0x6eb   :  { %v13353_v23 = vand.u32 4294901760, %v13352_v43  ;;  %v17644_v43 = vld [vmem:[%s19516_s2 + $0x8] sm:$0xf] }
 0x6ec   :  { %v13810_v10 = vand.u32 4294901760, %v13809_v31 }
 0x6ed   :  { %16130 = vrot.lane.b32.xlu1 %v19225_v42, %s18123_s18  ;;  %14681 = vrot.lane.b32.xlu0 %v19126_v11, %s18123_s18 }
 0x6ef   :  { %8736 = vmatmul.mubr.f32.vlgmr.msra.gmra.mrb[0].mxu1 %v19178_v45 }
 0x6f0   :  { %8745 = vmatpush1.msra.mxu1 %v19180_v58  ;;  %8808 = vmatprep.mubr.f32.mxu1 %v18122_v2 }
 0x6f1   :  { %16136 = vrot.lane.b32.xlu1 %v19225_v42, %s18124_s19  ;;  %14687 = vrot.lane.b32.xlu0 %v19126_v11, %s18124_s19 }
 0x6f2   :  { %13266 = vmatprep.subr.mxu1 %v13265_v18 }
 0x6f5   :  { %16128 = vrot.lane.b32.xlu0 %v19205_v20, %s18123_s18 }
 0x6f7   :  { %8810 = vmatmul.mubr.f32.vlgmr.msra.gmra.mrb[0].mxu1 %v19178_v45 }
 0x6f8   :  { %13268 = vmatpush1.msra.mxu1 %v13267_v17  ;;  %13331 = vmatprep.mubr.f32.mxu1 %v18122_v2 }
 0x6f9   :  { %16134 = vrot.lane.b32.xlu0 %v19205_v20, %s18124_s19  ;;  %13348 = vmatprep.subr.mxu1 %v13347_v0 }
 0x6fb   :  { %13337 = vmatmul.mubr.f32.vlgmr.msra.gmra.mrb[2].mxu1 %v13336_v36 }
 0x6fc   :  { %13354 = vmatpush1.msra.mxu1 %v13353_v23  ;;  %13417 = vmatprep.mubr.f32.mxu1 %v18122_v2  ;;  %v14206_v23 = vsel %vm108_vm0, %v17644_v43, 0 }
 0x6fd   :  { %13427 = vmatprep.subr.mxu1 %v13344_v47 }
 0x703   :  { %13419 = vmatmul.mubr.f32.vlgmr.msra.gmra.mrb[2].mxu1 %v13332_v25 }
 0x704   :  { %13430 = vmatpush1.msra.mxu1 %v13350_v32  ;;  %13493 = vmatprep.mubr.f32.mxu1 %v18122_v2 }
 0x705   :  { %13503 = vmatprep.subr.mxu1 %v13265_v18 }
 0x70b   :  { %13496 = vmatmul.mubr.f32.vlgmr.msra.gmra.mrb[2].mxu1 %v13333_v38 }
 0x70c   :  { %13505 = vmatpush1.msra.mxu1 %v13267_v17  ;;  %13568 = vmatprep.mubr.f32.mxu1 %v18122_v2 }
 0x70d   :  { %13581 = vmatprep.subr.mxu1 %v13345_v40 }
 0x713   :  { %13572 = vmatmul.mubr.f32.vlgmr.msra.gmra.mrb[2].mxu1 %v13334_v19 }
 0x714   :  { %13585 = vmatpush1.msra.mxu1 %v13351_v30  ;;  %13648 = vmatprep.mubr.f32.mxu1 %v18122_v2 }
 0x715   :  { %13657 = vmatprep.subr.mxu1 %v13265_v18 }
 0x71b   :  { %13650 = vmatmul.mubr.f32.vlgmr.msra.gmra.mrb[2].mxu1 %v13332_v25 }
 0x71c   :  { %13659 = vmatpush1.msra.mxu1 %v13267_v17  ;;  %13722 = vmatprep.mubr.f32.mxu1 %v18122_v2 }
 0x723   :  { %13724 = vmatmul.mubr.f32.vlgmr.msra.gmra.mrb[2].mxu1 %v13332_v25 }
 0x724   :  { %13805 = vmatprep.mubr.f32.mxu1 %v18122_v2 }
 0x753   :  { %v13247_v49 = vpop.permute.xlu1 %13246  ;;  %v13241_v50 = vpop.permute.xlu0 %13240 }
 0x757   :  { %v13239_v28 = vpop.permute.xlu0 %13238  ;;  %v14684_v24 = vpop.permute.xlu1 %14683 }
 0x758   :  { %v19263_v52 = vsel %vm83_vm5, %v13239_v28, %v13241_v50  ;;  %v13243_v59 = vsel %vm83_vm5, %v13241_v50, %v13239_v28 }
 0x75b   :  { %v13245_v53 = vpop.permute.xlu0 %13244  ;;  %v14690_v55 = vpop.permute.xlu1 %14689 }
 0x75c   :  { %v13248_v41 = vsel %vm90_vm6, %v13245_v53, %v13247_v49  ;;  %v13249_v45 = vsel %vm90_vm6, %v13247_v49, %v13245_v53  ;;  %v14281_v49 = vand.u32 4294901760, %v14206_v23 }
 0x75d   :  { %v13250_v58 = vsel %vm18248_vm8, %v19263_v52, %v13249_v45  ;;  %v13251_v62 = vsel %vm18244_vm7, %v13243_v59, %v13248_v41  ;;  %v13253_v8 = vsel %vm18287_vm9, %v13248_v41, %v13243_v59  ;;  %v13252_v36 = vsel %vm18291_vm10, %v13249_v45, %v19263_v52 }
 0x75e   :  { %v13734_v63 = vsel %vm112_vm3, %v13250_v58, 0  ;;  %v13737_v60 = vsel %vm112_vm3, %v13251_v62, 0  ;;  %v14212_v35 = vsel %vm112_vm3, %v13253_v8, 0  ;;  %v14209_v1 = vsel %vm112_vm3, %v13252_v36, 0 }
 0x75f   :  { %v13739_v57 = vand.u32 4294901760, %v13737_v60  ;;  %v13741_v27 = vand.u32 4294901760, %v13734_v63  ;;  %v14682_v5 = vpop.permute.xlu0 %14681  ;;  %v16131_v37 = vpop.permute.xlu1 %16130  ;;  %v14214_v0 = vand.u32 4294901760, %v14212_v35  ;;  %v14216_v50 = vand.u32 4294901760, %v14209_v1 }
 0x760   :  { %v19280_v15 = vsel %vm83_vm5, %v14682_v5, %v14684_v24  ;;  %v19284_v34 = vsel %vm83_vm5, %v14684_v24, %v14682_v5  ;;  %v14282_v28 = vsub.f32 %v14206_v23, %v14281_v49  ;;  %v15182_v36 = vsel %vm112_vm3, %v19124_v3, 0  ;;  %v17646_v23 = vld [vmem:[%s19516_s2 + $0x10] sm:$0xf] }
 0x761   :  { %v13818_v51 = vsub.f32 %v13737_v60, %v13739_v57  ;;  %v13824_v12 = vsub.f32 %v13734_v63, %v13741_v27  ;;  %13740 = vmatprep.subr.mxu1 %v13739_v57  ;;  %v14293_v4 = vsub.f32 %v14212_v35, %v14214_v0  ;;  %v17645_v63 = vld [vmem:[%s19516_s2 + $0xc] sm:$0xf] }
 0x762   :  { %13742 = vmatpush1.msra.mxu1 %v13741_v27  ;;  %v14283_v53 = vand.u32 4294901760, %v14282_v28 }
 0x763   :  { %v14688_v54 = vpop.permute.xlu0 %14687  ;;  %13811 = vmatmul.mubr.f32.vlgmr.msra.gmra.mrb[2].mxu1 %v13810_v10  ;;  %v13819_v13 = vand.u32 4294901760, %v13818_v51  ;;  %v13825_v16 = vand.u32 4294901760, %v13824_v12  ;;  %v16137_v17 = vpop.permute.xlu1 %16136 }
 0x764   :  { %v19288_v56 = vsel %vm90_vm6, %v14688_v54, %v14690_v55  ;;  %v19292_v9 = vsel %vm90_vm6, %v14690_v55, %v14688_v54  ;;  %13891 = vmatprep.mubr.f32.mxu1 %v18122_v2  ;;  %v14284_v59 = vsub.f32 %v14282_v28, %v14283_v53 }
 0x765   :  { %v14695_v14 = vsel %vm18291_vm10, %v19292_v9, %v19280_v15  ;;  %v14696_v22 = vsel %vm18287_vm9, %v19288_v56, %v19284_v34  ;;  %v13820_v18 = vsub.f32 %v13818_v51, %v13819_v13  ;;  %v13826_v61 = vsub.f32 %v13824_v12, %v13825_v16 }
 0x766   :  { %v14285_v45 = vand.u32 4294901760, %v14284_v59  ;;  %v14693_v55 = vsel %vm18248_vm8, %v19280_v15, %v19292_v9 }
 0x767   :  { %v16129_v21 = vpop.permute.xlu0 %16128  ;;  %v13821_v25 = vand.u32 4294901760, %v13820_v18  ;;  %v13827_v39 = vand.u32 4294901760, %v13826_v61 }
 0x768   :  { %v19305_v38 = vsel %vm83_vm5, %v16129_v21, %v16131_v37  ;;  %v19309_v32 = vsel %vm83_vm5, %v16131_v37, %v16129_v21 }
 0x769   :  { %13822 = vmatprep.subr.mxu1 %v13821_v25 }
 0x76a   :  { %13828 = vmatpush1.msra.mxu1 %v13827_v39 }
 0x76b   :  { %v16135_v47 = vpop.permute.xlu0 %16134  ;;  %13893 = vmatmul.mubr.f32.vlgmr.msra.gmra.mrb[2].mxu1 %v19254_v48  ;;  %13901 = vmatprep.subr.mxu1 %v13818_v51 }
 0x76c   :  { %v19313_v40 = vsel %vm90_vm6, %v16135_v47, %v16137_v17  ;;  %v19317_v19 = vsel %vm90_vm6, %v16137_v17, %v16135_v47  ;;  %13904 = vmatpush1.msra.mxu1 %v13824_v12  ;;  %13967 = vmatprep.mubr.f32.mxu1 %v18122_v2 }
 0x76d   :  { %v16142_v30 = vsel %vm18291_vm10, %v19317_v19, %v19305_v38  ;;  %v16143_v29 = vsel %vm18287_vm9, %v19313_v40, %v19309_v32  ;;  %13977 = vmatprep.subr.mxu1 %v13739_v57 }
 0x76e   :  { %v17103_v6 = vsel %vm112_vm3, %v16142_v30, 0 }
 0x773   :  { %13970 = vmatmul.mubr.f32.vlgmr.msra.gmra.mrb[2].mxu1 %v19257_v26  ;;  %v14294_v26 = vand.u32 4294901760, %v14293_v4 }
 0x774   :  { %13979 = vmatpush1.msra.mxu1 %v13741_v27  ;;  %14042 = vmatprep.mubr.f32.mxu1 %v18122_v2 }
 0x775   :  { %14055 = vmatprep.subr.mxu1 %v13819_v13  ;;  %v14295_v24 = vsub.f32 %v14293_v4, %v14294_v26 }
 0x777   :  { %v14296_v52 = vand.u32 4294901760, %v14295_v24 }
 0x77b   :  { %14046 = vmatmul.mubr.f32.vlgmr.msra.gmra.mrb[2].mxu1 %v13808_v33  ;;  %v14299_v33 = vsub.f32 %v14209_v1, %v14216_v50  ;;  %v15184_v1 = vand.u32 4294901760, %v15182_v36 }
 0x77c   :  { %14059 = vmatpush1.msra.mxu1 %v13825_v16  ;;  %14122 = vmatprep.mubr.f32.mxu1 %v18122_v2 }
 0x77d   :  { %14131 = vmatprep.subr.mxu1 %v13739_v57  ;;  %v14300_v31 = vand.u32 4294901760, %v14299_v33  ;;  %v14699_v57 = vsel %vm108_vm0, %v17645_v63, 0 }
 0x77e   :  { %v14774_v10 = vand.u32 4294901760, %v14699_v57 }
 0x77f   :  { %v14301_v41 = vsub.f32 %v14299_v33, %v14300_v31 }
 0x780   :  { %v14775_v54 = vsub.f32 %v14699_v57, %v14774_v10 }
 0x781   :  { %v14302_v58 = vand.u32 4294901760, %v14301_v41 }
 0x782   :  { %v14776_v37 = vand.u32 4294901760, %v14775_v54 }
 0x783   :  { %14124 = vmatmul.mubr.f32.vlgmr.msra.gmra.mrb[2].mxu1 %v19254_v48 }
 0x784   :  { %14133 = vmatpush1.msra.mxu1 %v13741_v27  ;;  %14196 = vmatprep.mubr.f32.mxu1 %v18122_v2  ;;  %v14702_v27 = vsel %vm112_vm3, %v14693_v55, 0  ;;  %v14777_v61 = vsub.f32 %v14775_v54, %v14776_v37 }
 0x785   :  { %14215 = vmatprep.subr.mxu1 %v14214_v0  ;;  %v14709_v51 = vand.u32 4294901760, %v14702_v27 }
 0x786   :  { %v14778_v39 = vand.u32 4294901760, %v14777_v61  ;;  %v16140_v61 = vsel %vm18248_vm8, %v19305_v38, %v19317_v19 }
 0x787   :  { %v14792_v13 = vsub.f32 %v14702_v27, %v14709_v51 }
 0x789   :  { %v14793_v21 = vand.u32 4294901760, %v14792_v13 }
 0x78b   :  { %14198 = vmatmul.mubr.f32.vlgmr.msra.gmra.mrb[2].mxu1 %v19254_v48  ;;  %v14694_v48 = vsel %vm18244_vm7, %v19284_v34, %v19288_v56  ;;  %v14794_v25 = vsub.f32 %v14792_v13, %v14793_v21  ;;  %v15656_v34 = vsel %vm112_vm3, %v14695_v14, 0 }
 0x78c   :  { %14217 = vmatpush1.msra.mxu1 %v14216_v50  ;;  %14280 = vmatprep.mubr.f32.mxu1 %v18122_v2  ;;  %v14705_v62 = vsel %vm112_vm3, %v14694_v48, 0  ;;  %v15659_v48 = vsel %vm112_vm3, %v14696_v22, 0  ;;  %v15663_v55 = vand.u32 4294901760, %v15656_v34 }
 0x78d   :  { %14297 = vmatprep.subr.mxu1 %v14296_v52  ;;  %v14707_v60 = vand.u32 4294901760, %v14705_v62  ;;  %v14795_v17 = vand.u32 4294901760, %v14794_v25  ;;  %v15661_v63 = vand.u32 4294901760, %v15659_v48  ;;  %v16149_v25 = vsel %vm112_vm3, %v16140_v61, 0 }
 0x78f   :  { %v14786_v5 = vsub.f32 %v14705_v62, %v14707_v60  ;;  %v17647_v62 = vld [vmem:[%s19516_s2 + $0x14] sm:$0xf]  ;;  %v15740_v56 = vsub.f32 %v15659_v48, %v15661_v63  ;;  %v16626_v48 = vsel %vm112_vm3, %v19205_v20, 0 }
 0x791   :  { %v14787_v12 = vand.u32 4294901760, %v14786_v5  ;;  %v15741_v57 = vand.u32 4294901760, %v15740_v56 }
 0x793   :  { %14286 = vmatmul.mubr.f32.vlgmr.msra.gmra.mrb[2].mxu1 %v14285_v45  ;;  %v14788_v16 = vsub.f32 %v14786_v5, %v14787_v12 }
 0x794   :  { %14303 = vmatpush1.msra.mxu1 %v14302_v58  ;;  %14366 = vmatprep.mubr.f32.mxu1 %v18122_v2 }
 0x795   :  { %14376 = vmatprep.subr.mxu1 %v14293_v4  ;;  %v14789_v18 = vand.u32 4294901760, %v14788_v16  ;;  %v15176_v4 = vsel %vm108_vm0, %v17646_v23, 0  ;;  %v16141_v16 = vsel %vm18244_vm7, %v19309_v32, %v19313_v40 }
 0x79b   :  { %14368 = vmatmul.mubr.f32.vlgmr.msra.gmra.mrb[2].mxu1 %v14281_v49 }
 0x79c   :  { %14379 = vmatpush1.msra.mxu1 %v14299_v33  ;;  %14442 = vmatprep.mubr.f32.mxu1 %v18122_v2 }
 0x79d   :  { %14452 = vmatprep.subr.mxu1 %v14214_v0 }
 0x7a3   :  { %14445 = vmatmul.mubr.f32.vlgmr.msra.gmra.mrb[2].mxu1 %v14282_v28 }
 0x7a4   :  { %14454 = vmatpush1.msra.mxu1 %v14216_v50  ;;  %14517 = vmatprep.mubr.f32.mxu1 %v18122_v2 }
 0x7a5   :  { %14530 = vmatprep.subr.mxu1 %v14294_v26  ;;  %v15251_v26 = vand.u32 4294901760, %v15176_v4 }
 0x7a7   :  { %v15252_v33 = vsub.f32 %v15176_v4, %v15251_v26 }
 0x7ab   :  { %14521 = vmatmul.mubr.f32.vlgmr.msra.gmra.mrb[2].mxu1 %v14283_v53 }
 0x7ac   :  { %14534 = vmatpush1.msra.mxu1 %v14300_v31  ;;  %14597 = vmatprep.mubr.f32.mxu1 %v18122_v2  ;;  %v15253_v31 = vand.u32 4294901760, %v15252_v33 }
 0x7ad   :  { %14606 = vmatprep.subr.mxu1 %v14214_v0 }
 0x7ae   :  { %v15254_v41 = vsub.f32 %v15252_v33, %v15253_v31 }
 0x7b0   :  { %v15255_v45 = vand.u32 4294901760, %v15254_v41 }
 0x7b3   :  { %14599 = vmatmul.mubr.f32.vlgmr.msra.gmra.mrb[2].mxu1 %v14281_v49 }
 0x7b4   :  { %14608 = vmatpush1.msra.mxu1 %v14216_v50  ;;  %14671 = vmatprep.mubr.f32.mxu1 %v18122_v2  ;;  %v15263_v50 = vsub.f32 %v15182_v36, %v15184_v1 }
 0x7b5   :  { %14708 = vmatprep.subr.mxu1 %v14707_v60 }
 0x7b6   :  { %v15264_v3 = vand.u32 4294901760, %v15263_v50 }
 0x7b8   :  { %v15265_v53 = vsub.f32 %v15263_v50, %v15264_v3 }
 0x7ba   :  { %v15266_v59 = vand.u32 4294901760, %v15265_v53 }
 0x7bb   :  { %14673 = vmatmul.mubr.f32.vlgmr.msra.gmra.mrb[2].mxu1 %v14281_v49  ;;  %v15179_v49 = vsel %vm112_vm3, %v19126_v11, 0 }
 0x7bc   :  { %14710 = vmatpush1.msra.mxu1 %v14709_v51  ;;  %14773 = vmatprep.mubr.f32.mxu1 %v18122_v2  ;;  %v15186_v28 = vand.u32 4294901760, %v15179_v49 }
 0x7bd   :  { %14790 = vmatprep.subr.mxu1 %v14789_v18 }
 0x7be   :  { %v15269_v24 = vsub.f32 %v15179_v49, %v15186_v28 }
 0x7c0   :  { %v15270_v52 = vand.u32 4294901760, %v15269_v24 }
 0x7c2   :  { %v15271_v11 = vsub.f32 %v15269_v24, %v15270_v52 }
 0x7c3   :  { %14779 = vmatmul.mubr.f32.vlgmr.msra.gmra.mrb[2].mxu1 %v14778_v39 }
 0x7c4   :  { %14796 = vmatpush1.msra.mxu1 %v14795_v17  ;;  %14859 = vmatprep.mubr.f32.mxu1 %v18122_v2  ;;  %v15272_v58 = vand.u32 4294901760, %v15271_v11 }
 0x7c5   :  { %14869 = vmatprep.subr.mxu1 %v14786_v5  ;;  %v15746_v5 = vsub.f32 %v15656_v34, %v15663_v55 }
 0x7ca   :  { %v19368_v47 = vpop.f32.mrb[0].mxu1 }
 0x7cb   :  { %v8818_v8 = vsel %vm112_vm3, %v19368_v47, 0.0  ;;  %v19372_v35 = vpop.f32.mrb[1].mxu1  ;;  %14861 = vmatmul.mubr.f32.vlgmr.msra.gmra.mrb[2].mxu1 %v14774_v10 }
 0x7cc   :  { %v8819_v43 = vsel %vm112_vm3, %v19372_v35, 0.0  ;;  %14872 = vmatpush1.msra.mxu1 %v14792_v13  ;;  %14935 = vmatprep.mubr.f32.mxu1 %v18122_v2 }
 0x7cd   :  { %v8820_v0 = vadd.f32 %v8819_v43, %v8818_v8  ;;  %14945 = vmatprep.subr.mxu1 %v14707_v60  ;;  %v16156_v8 = vand.u32 4294901760, %v16149_v25 }
 0x7cf   :  { %8821 = vadd.xlane.f32.xlu0 %v8820_v0  ;;  %v16239_v46 = vsub.f32 %v16149_v25, %v16156_v8 }
 0x7d3   :  { %14938 = vmatmul.mubr.f32.vlgmr.msra.gmra.mrb[2].mxu1 %v14775_v54 }
 0x7d4   :  { %14947 = vmatpush1.msra.mxu1 %v14709_v51  ;;  %15010 = vmatprep.mubr.f32.mxu1 %v18122_v2 }
 0x7d5   :  { %15023 = vmatprep.subr.mxu1 %v14787_v12  ;;  %v15747_v12 = vand.u32 4294901760, %v15746_v5 }
 0x7d7   :  { %v15748_v15 = vsub.f32 %v15746_v5, %v15747_v12 }
 0x7d9   :  { %v15749_v14 = vand.u32 4294901760, %v15748_v15 }
 0x7db   :  { %15014 = vmatmul.mubr.f32.vlgmr.msra.gmra.mrb[2].mxu1 %v14776_v37  ;;  %v16152_v37 = vsel %vm112_vm3, %v16141_v16, 0 }
 0x7dc   :  { %15027 = vmatpush1.msra.mxu1 %v14793_v21  ;;  %15090 = vmatprep.mubr.f32.mxu1 %v18122_v2  ;;  %v17648_v21 = vld [vmem:[%s19516_s2 + $0x18] sm:$0xf]  ;;  %v16154_v18 = vand.u32 4294901760, %v16152_v37 }
 0x7dd   :  { %15099 = vmatprep.subr.mxu1 %v14707_v60  ;;  %v15653_v60 = vsel %vm108_vm0, %v17647_v62, 0  ;;  %v16146_v44 = vsel %vm108_vm0, %v17648_v21, 0 }
 0x7de   :  { %v15728_v22 = vand.u32 4294901760, %v15653_v60  ;;  %v16233_v39 = vsub.f32 %v16152_v37, %v16154_v18  ;;  %v19429_v17 = vand.u32 4294901760, %v16146_v44 }
 0x7e0   :  { %v15729_v27 = vsub.f32 %v15653_v60, %v15728_v22  ;;  %v16234_v43 = vand.u32 4294901760, %v16233_v39  ;;  %v16222_v0 = vsub.f32 %v16146_v44, %v19429_v17  ;;  %v16633_v60 = vand.u32 4294901760, %v16626_v48 }
 0x7e2   :  { %v16235_v36 = vsub.f32 %v16233_v39, %v16234_v43  ;;  %v16223_v23 = vand.u32 4294901760, %v16222_v0 }
 0x7e3   :  { %15092 = vmatmul.mubr.f32.vlgmr.msra.gmra.mrb[2].mxu1 %v14774_v10 }
 0x7e4   :  { %15101 = vmatpush1.msra.mxu1 %v14709_v51  ;;  %15164 = vmatprep.mubr.f32.mxu1 %v18122_v2  ;;  %v15730_v51 = vand.u32 4294901760, %v15729_v27  ;;  %v16236_v4 = vand.u32 4294901760, %v16235_v36  ;;  %v16224_v49 = vsub.f32 %v16222_v0, %v16223_v23 }
 0x7e5   :  { %15185 = vmatprep.subr.mxu1 %v15184_v1 }
 0x7e6   :  { %v15731_v13 = vsub.f32 %v15729_v27, %v15730_v51 }
 0x7e8   :  { %v15732_v9 = vand.u32 4294901760, %v15731_v13 }
 0x7eb   :  { %15166 = vmatmul.mubr.f32.vlgmr.msra.gmra.mrb[2].mxu1 %v14774_v10  ;;  %v15742_v10 = vsub.f32 %v15740_v56, %v15741_v57 }
 0x7ec   :  { %15187 = vmatpush1.msra.mxu1 %v15186_v28  ;;  %15250 = vmatprep.mubr.f32.mxu1 %v18122_v2 }
 0x7ed   :  { %15267 = vmatprep.subr.mxu1 %v15266_v59  ;;  %v15743_v54 = vand.u32 4294901760, %v15742_v10 }
 0x7f3   :  { %15256 = vmatmul.mubr.f32.vlgmr.msra.gmra.mrb[2].mxu1 %v15255_v45 }
 0x7f4   :  { %15273 = vmatpush1.msra.mxu1 %v15272_v58  ;;  %15336 = vmatprep.mubr.f32.mxu1 %v18122_v2 }
 0x7f5   :  { %15346 = vmatprep.subr.mxu1 %v15263_v50 }
 0x7fb   :  { %15338 = vmatmul.mubr.f32.vlgmr.msra.gmra.mrb[2].mxu1 %v15251_v26 }
 0x7fc   :  { %15349 = vmatpush1.msra.mxu1 %v15269_v24  ;;  %15412 = vmatprep.mubr.f32.mxu1 %v18122_v2 }
 0x7fd   :  { %15422 = vmatprep.subr.mxu1 %v15184_v1 }
 0x803   :  { %15415 = vmatmul.mubr.f32.vlgmr.msra.gmra.mrb[2].mxu1 %v15252_v33 }
 0x804   :  { %15424 = vmatpush1.msra.mxu1 %v15186_v28  ;;  %15487 = vmatprep.mubr.f32.mxu1 %v18122_v2 }
 0x805   :  { %15500 = vmatprep.subr.mxu1 %v15264_v3 }
 0x80b   :  { %15491 = vmatmul.mubr.f32.vlgmr.msra.gmra.mrb[2].mxu1 %v15253_v31 }
 0x80c   :  { %15504 = vmatpush1.msra.mxu1 %v15270_v52  ;;  %15567 = vmatprep.mubr.f32.mxu1 %v18122_v2 }
 0x80d   :  { %15576 = vmatprep.subr.mxu1 %v15184_v1  ;;  %v16240_v1 = vand.u32 4294901760, %v16239_v46 }
 0x80f   :  { %v16241_v50 = vsub.f32 %v16239_v46, %v16240_v1 }
 0x813   :  { %15569 = vmatmul.mubr.f32.vlgmr.msra.gmra.mrb[2].mxu1 %v15251_v26 }
 0x814   :  { %15578 = vmatpush1.msra.mxu1 %v15186_v28  ;;  %15641 = vmatprep.mubr.f32.mxu1 %v18122_v2  ;;  %v16242_v28 = vand.u32 4294901760, %v16241_v50 }
 0x815   :  { %15662 = vmatprep.subr.mxu1 %v15661_v63 }
 0x81b   :  { %15643 = vmatmul.mubr.f32.vlgmr.msra.gmra.mrb[2].mxu1 %v15251_v26  ;;  %v16225_v26 = vand.u32 4294901760, %v16224_v49 }
 0x81c   :  { %15664 = vmatpush1.msra.mxu1 %v15663_v55  ;;  %15727 = vmatprep.mubr.f32.mxu1 %v18122_v2 }
 0x81d   :  { %15744 = vmatprep.subr.mxu1 %v15743_v54  ;;  %v17650_v54 = vld [vmem:[%s19516_s2 + $0x20] sm:$0xf] }
 0x81e   :  { %v17100_v15 = vsel %vm108_vm0, %v17650_v54, 0 }
 0x81f   :  { %v17175_v40 = vand.u32 4294901760, %v17100_v15 }
 0x823   :  { %15733 = vmatmul.mubr.f32.vlgmr.msra.gmra.mrb[2].mxu1 %v15732_v9 }
 0x824   :  { %15750 = vmatpush1.msra.mxu1 %v15749_v14  ;;  %15813 = vmatprep.mubr.f32.mxu1 %v18122_v2  ;;  %v17176_v14 = vsub.f32 %v17100_v15, %v17175_v40 }
 0x825   :  { %15823 = vmatprep.subr.mxu1 %v15740_v56  ;;  %v16716_v56 = vsub.f32 %v16626_v48, %v16633_v60  ;;  %v18095_v48 = vld [vmem:[%s19514_s0 + $0x8] sm:$0xff] }
 0x826   :  { %v17177_v21 = vand.u32 4294901760, %v17176_v14 }
 0x828   :  { %v17178_v61 = vsub.f32 %v17176_v14, %v17177_v21 }
 0x82a   :  { %v17179_v19 = vand.u32 4294901760, %v17178_v61 }
 0x82b   :  { %15815 = vmatmul.mubr.f32.vlgmr.msra.gmra.mrb[2].mxu1 %v15728_v22 }
 0x82c   :  { %15826 = vmatpush1.msra.mxu1 %v15746_v5  ;;  %15889 = vmatprep.mubr.f32.mxu1 %v18122_v2 }
 0x82d   :  { %15899 = vmatprep.subr.mxu1 %v15661_v63 }
 0x833   :  { %15892 = vmatmul.mubr.f32.vlgmr.msra.gmra.mrb[2].mxu1 %v15729_v27 }
 0x834   :  { %15901 = vmatpush1.msra.mxu1 %v15663_v55  ;;  %15964 = vmatprep.mubr.f32.mxu1 %v18122_v2 }
 0x835   :  { %15977 = vmatprep.subr.mxu1 %v15741_v57  ;;  %v16717_v57 = vand.u32 4294901760, %v16716_v56 }
 0x837   :  { %v16718_v20 = vsub.f32 %v16716_v56, %v16717_v57 }
 0x83b   :  { %15968 = vmatmul.mubr.f32.vlgmr.msra.gmra.mrb[2].mxu1 %v15730_v51  ;;  %v16719_v51 = vand.u32 4294901760, %v16718_v20 }
 0x83c   :  { %15981 = vmatpush1.msra.mxu1 %v15747_v12  ;;  %16044 = vmatprep.mubr.f32.mxu1 %v18122_v2  ;;  %v17106_v12 = vsel %vm112_vm3, %v16143_v29, 0  ;;  %v17110_v29 = vand.u32 4294901760, %v17103_v6 }
 0x83d   :  { %16053 = vmatprep.subr.mxu1 %v15661_v63  ;;  %v17108_v13 = vand.u32 4294901760, %v17106_v12 }
 0x83e   :  { %v17193_v16 = vsub.f32 %v17103_v6, %v17110_v29 }
 0x83f   :  { %v17187_v32 = vsub.f32 %v17106_v12, %v17108_v13 }
 0x841   :  { %v17188_v9 = vand.u32 4294901760, %v17187_v32 }
 0x843   :  { %16046 = vmatmul.mubr.f32.vlgmr.msra.gmra.mrb[2].mxu1 %v15728_v22  ;;  %v17189_v37 = vsub.f32 %v17187_v32, %v17188_v9 }
 0x844   :  { %16055 = vmatpush1.msra.mxu1 %v15663_v55  ;;  %16118 = vmatprep.mubr.f32.mxu1 %v18122_v2 }
 0x845   :  { %16155 = vmatprep.subr.mxu1 %v16154_v18  ;;  %v17190_v7 = vand.u32 4294901760, %v17189_v37 }
 0x84b   :  { %16120 = vmatmul.mubr.f32.vlgmr.msra.gmra.mrb[2].mxu1 %v15728_v22 }
 0x84c   :  { %16157 = vmatpush1.msra.mxu1 %v16156_v8  ;;  %16220 = vmatprep.mubr.f32.mxu1 %v18122_v2 }
 0x84d   :  { %16237 = vmatprep.subr.mxu1 %v16236_v4 }
 0x853   :  { %16226 = vmatmul.mubr.f32.vlgmr.msra.gmra.mrb[2].mxu1 %v16225_v26 }
 0x854   :  { %16243 = vmatpush1.msra.mxu1 %v16242_v28  ;;  %16306 = vmatprep.mubr.f32.mxu1 %v18122_v2 }
 0x855   :  { %16316 = vmatprep.subr.mxu1 %v16233_v39 }
 0x85b   :  { %16308 = vmatmul.mubr.f32.vlgmr.msra.gmra.mrb[2].mxu1 %v19429_v17 }
 0x85c   :  { %v8822_v3 = vpop.xlane.xlu0 %8821  ;;  %16319 = vmatpush1.msra.mxu1 %v16239_v46  ;;  %16382 = vmatprep.mubr.f32.mxu1 %v18122_v2  ;;  %v18094_v46 = vld [vmem:[%s19514_s0] sm:$0xff] }
 0x85d   :  { %v8823_v33 = vmul.f32 0.00390625, %v8822_v3  ;;  %16392 = vmatprep.subr.mxu1 %v16154_v18 }
 0x85f   :  { %v19438_v24 = vsub.f32 %v19368_v47, %v8823_v33  ;;  %v19441_v53 = vsub.f32 %v19372_v35, %v8823_v33  ;;  %v16629_v47 = vsel %vm112_vm3, %v19225_v42, 0  ;;  %v17649_v35 = vld [vmem:[%s19516_s2 + $0x1c] sm:$0xf] }
 0x860   :  { %v16631_v45 = vand.u32 4294901760, %v16629_v47  ;;  %v16623_v58 = vsel %vm108_vm0, %v17649_v35, 0 }
 0x861   :  { %v8826_v31 = vmul.f32 %v19438_v24, %v19438_v24  ;;  %v8827_v52 = vmul.f32 %v19441_v53, %v19441_v53  ;;  %v16698_v63 = vand.u32 4294901760, %v16623_v58 }
 0x862   :  { %v16710_v62 = vsub.f32 %v16629_v47, %v16631_v45 }
 0x863   :  { %v8828_v59 = vsel %vm112_vm3, %v8826_v31, 0.0  ;;  %v8829_v41 = vsel %vm112_vm3, %v8827_v52, 0.0  ;;  %16385 = vmatmul.mubr.f32.vlgmr.msra.gmra.mrb[2].mxu1 %v16222_v0  ;;  %v16699_v34 = vsub.f32 %v16623_v58, %v16698_v63 }
 0x864   :  { %v8830_v11 = vadd.f32 %v8829_v41, %v8828_v59  ;;  %16394 = vmatpush1.msra.mxu1 %v16156_v8  ;;  %16457 = vmatprep.mubr.f32.mxu1 %v18122_v2  ;;  %v16711_v42 = vand.u32 4294901760, %v16710_v62 }
 0x865   :  { %16470 = vmatprep.subr.mxu1 %v16234_v43  ;;  %v16700_v55 = vand.u32 4294901760, %v16699_v34 }
 0x866   :  { %8831 = vadd.xlane.f32.xlu0 %v8830_v11  ;;  %v16712_v22 = vsub.f32 %v16710_v62, %v16711_v42 }
 0x867   :  { %v16701_v5 = vsub.f32 %v16699_v34, %v16700_v55 }
 0x868   :  { %v16713_v27 = vand.u32 4294901760, %v16712_v22 }
 0x869   :  { %v16702_v10 = vand.u32 4294901760, %v16701_v5 }
 0x86b   :  { %16461 = vmatmul.mubr.f32.vlgmr.msra.gmra.mrb[2].mxu1 %v16223_v23 }
 0x86c   :  { %16474 = vmatpush1.msra.mxu1 %v16240_v1  ;;  %16537 = vmatprep.mubr.f32.mxu1 %v18122_v2 }
 0x86d   :  { %16546 = vmatprep.subr.mxu1 %v16154_v18  ;;  %v17194_v18 = vand.u32 4294901760, %v17193_v16 }
 0x86f   :  { %v17195_v38 = vsub.f32 %v17193_v16, %v17194_v18 }
 0x871   :  { %v17196_v30 = vand.u32 4294901760, %v17195_v38 }
 0x873   :  { %16539 = vmatmul.mubr.f32.vlgmr.msra.gmra.mrb[2].mxu1 %v19429_v17 }
 0x874   :  { %16548 = vmatpush1.msra.mxu1 %v16156_v8  ;;  %16611 = vmatprep.mubr.f32.mxu1 %v18122_v2 }
 0x875   :  { %16632 = vmatprep.subr.mxu1 %v16631_v45 }
 0x87b   :  { %16613 = vmatmul.mubr.f32.vlgmr.msra.gmra.mrb[2].mxu1 %v19429_v17 }
 0x87c   :  { %16634 = vmatpush1.msra.mxu1 %v16633_v60  ;;  %16697 = vmatprep.mubr.f32.mxu1 %v18122_v2 }
 0x87d   :  { %16714 = vmatprep.subr.mxu1 %v16713_v27 }
 0x883   :  { %16703 = vmatmul.mubr.f32.vlgmr.msra.gmra.mrb[2].mxu1 %v16702_v10 }
 0x884   :  { %16720 = vmatpush1.msra.mxu1 %v16719_v51  ;;  %16783 = vmatprep.mubr.f32.mxu1 %v18122_v2 }
 0x885   :  { %16793 = vmatprep.subr.mxu1 %v16710_v62 }
 0x88b   :  { %16785 = vmatmul.mubr.f32.vlgmr.msra.gmra.mrb[2].mxu1 %v16698_v63 }
 0x88c   :  { %16796 = vmatpush1.msra.mxu1 %v16716_v56  ;;  %16859 = vmatprep.mubr.f32.mxu1 %v18122_v2 }
 0x88d   :  { %16869 = vmatprep.subr.mxu1 %v16631_v45 }
 0x893   :  { %16862 = vmatmul.mubr.f32.vlgmr.msra.gmra.mrb[2].mxu1 %v16699_v34 }
 0x894   :  { %16871 = vmatpush1.msra.mxu1 %v16633_v60  ;;  %16934 = vmatprep.mubr.f32.mxu1 %v18122_v2 }
 0x895   :  { %16947 = vmatprep.subr.mxu1 %v16711_v42 }
 0x89b   :  { %16938 = vmatmul.mubr.f32.vlgmr.msra.gmra.mrb[2].mxu1 %v16700_v55 }
 0x89c   :  { %16951 = vmatpush1.msra.mxu1 %v16717_v57  ;;  %17014 = vmatprep.mubr.f32.mxu1 %v18122_v2 }
 0x89d   :  { %17023 = vmatprep.subr.mxu1 %v16631_v45 }
 0x8a3   :  { %17016 = vmatmul.mubr.f32.vlgmr.msra.gmra.mrb[2].mxu1 %v16698_v63 }
 0x8a4   :  { %17025 = vmatpush1.msra.mxu1 %v16633_v60  ;;  %17088 = vmatprep.mubr.f32.mxu1 %v18122_v2 }
 0x8a5   :  { %17109 = vmatprep.subr.mxu1 %v17108_v13 }
 0x8ab   :  { %17090 = vmatmul.mubr.f32.vlgmr.msra.gmra.mrb[2].mxu1 %v16698_v63 }
 0x8ac   :  { %17111 = vmatpush1.msra.mxu1 %v17110_v29  ;;  %17174 = vmatprep.mubr.f32.mxu1 %v18122_v2 }
 0x8ad   :  { %17191 = vmatprep.subr.mxu1 %v17190_v7 }
 0x8b3   :  { %17180 = vmatmul.mubr.f32.vlgmr.msra.gmra.mrb[2].mxu1 %v17179_v19 }
 0x8b4   :  { %17197 = vmatpush1.msra.mxu1 %v17196_v30  ;;  %17260 = vmatprep.mubr.f32.mxu1 %v18122_v2 }
 0x8b5   :  { %17270 = vmatprep.subr.mxu1 %v17187_v32 }
 0x8bb   :  { %17262 = vmatmul.mubr.f32.vlgmr.msra.gmra.mrb[2].mxu1 %v17175_v40 }
 0x8bc   :  { %17273 = vmatpush1.msra.mxu1 %v17193_v16  ;;  %17336 = vmatprep.mubr.f32.mxu1 %v18122_v2 }
 0x8bd   :  { %17346 = vmatprep.subr.mxu1 %v17108_v13 }
 0x8c3   :  { %17339 = vmatmul.mubr.f32.vlgmr.msra.gmra.mrb[2].mxu1 %v17176_v14 }
 0x8c4   :  { %17348 = vmatpush1.msra.mxu1 %v17110_v29  ;;  %17411 = vmatprep.mubr.f32.mxu1 %v18122_v2 }
 0x8c5   :  { %17424 = vmatprep.subr.mxu1 %v17188_v9 }
 0x8cb   :  { %17415 = vmatmul.mubr.f32.vlgmr.msra.gmra.mrb[2].mxu1 %v17177_v21 }
 0x8cc   :  { %17428 = vmatpush1.msra.mxu1 %v17194_v18  ;;  %17491 = vmatprep.mubr.f32.mxu1 %v18122_v2 }
 0x8cd   :  { %17500 = vmatprep.subr.mxu1 %v17108_v13 }
 0x8d3   :  { %17493 = vmatmul.mubr.f32.vlgmr.msra.gmra.mrb[2].mxu1 %v17175_v40 }
 0x8d4   :  { %17502 = vmatpush1.msra.mxu1 %v17110_v29  ;;  %17565 = vmatprep.mubr.f32.mxu1 %v18122_v2 }
 0x8db   :  { %17567 = vmatmul.mubr.f32.vlgmr.msra.gmra.mrb[2].mxu1 %v17175_v40 }
 0x8f3   :  { %v8832_v44 = vpop.xlane.xlu0 %8831 }
 0x8f4   :  { %v8833_v25 = vmul.f32 0.00390625, %v8832_v44 }
 0x8f6   :  { %v8834_v39 = vadd.f32 1e-05, %v8833_v25 }
 0x8f8   :  { %18089 = vrsqrt.f32 %v8834_v39 }
 0x902   :  { %v18090_v17 = vpop.eup %18089 }
 0x903   :  { %v8836_v8 = vmul.f32 %v18090_v17, %v19438_v24  ;;  %v8837_v43 = vmul.f32 %v18090_v17, %v19441_v53 }
 0x905   :  { %v8840_v0 = vcombine.low %v8836_v8, %v8837_v43 }
 0x907   :  { %v8842_v36 = vadd.f32 %v18094_v46, %v8840_v0 }
 0x909   :  { %8843 = vst [vmem:[#allocation2] sm:$0xff] %v8842_v36 }
 0x9ae   :  { %v17568_v23 = vpop.f32.mrb[2].mxu1 }
 0x9af   :  { %v17575_v2 = vsel %vm112_vm3, %v17568_v23, 0.0  ;;  %v17570_v1 = vpop.f32.mrb[3].mxu1 }
 0x9b0   :  { %v17576_v4 = vsel %vm112_vm3, %v17570_v1, 0.0 }
 0x9b1   :  { %v17577_v49 = vadd.f32 %v17576_v4, %v17575_v2 }
 0x9b3   :  { %17578 = vadd.xlane.f32.xlu1 %v17577_v49 }
 0xa40   :  { %v17579_v50 = vpop.xlane.xlu1 %17578 }
 0xa41   :  { %v17580_v26 = vmul.f32 0.00390625, %v17579_v50 }
 0xa43   :  { %v17581_v28 = vsub.f32 %v17568_v23, %v17580_v26  ;;  %v17582_v3 = vsub.f32 %v17570_v1, %v17580_v26 }
 0xa45   :  { %v17583_v33 = vmul.f32 %v17581_v28, %v17581_v28  ;;  %v17584_v24 = vmul.f32 %v17582_v3, %v17582_v3 }
 0xa47   :  { %v17585_v53 = vsel %vm112_vm3, %v17583_v33, 0.0  ;;  %v17586_v31 = vsel %vm112_vm3, %v17584_v24, 0.0 }
 0xa48   :  { %v17587_v52 = vadd.f32 %v17586_v31, %v17585_v53 }
 0xa4a   :  { %17588 = vadd.xlane.f32.xlu0 %v17587_v52 }
 0xad7   :  { %v17589_v59 = vpop.xlane.xlu0 %17588 }
 0xad8   :  { %v17590_v41 = vmul.f32 0.00390625, %v17589_v59 }
 0xada   :  { %v17591_v11 = vadd.f32 1e-05, %v17590_v41 }
 0xadc   :  { %18091 = vrsqrt.f32 %v17591_v11 }
 0xae6   :  { %v18092_v47 = vpop.eup %18091 }
 0xae7   :  { %v17593_v35 = vmul.f32 %v18092_v47, %v17581_v28  ;;  %v17594_v45 = vmul.f32 %v18092_v47, %v17582_v3 }
 0xae9   :  { %v17597_v58 = vcombine.low %v17593_v35, %v17594_v45 }
 0xaeb   :  { %v17599_v62 = vadd.f32 %v18095_v48, %v17597_v58 }
 0xaed   :  { %17601 = vst [vmem:[#allocation2 + $0x8] sm:$0xff] %v17599_v62 }
 0xaee   :  { %18107 = shalt.err (!%p18104_p4)
}
 0xaef   :  { %s18108_s25 = scalar_lea.hbm %s19517_s3, 256 }
 0xaf0   :  { %p18109_p5 = scmp.ne.s32.totalorder %s19517_s3, %s18108_s25  ;;  %p18112_p6 = scmp.lt.u32.totalorder %s18108_s25, %s19517_s3 }
 0xaf2   :  { %p18114_p7 = pnand %p18112_p6, %p18109_p5 }
 0xaf4   :  { %18117 = shalt.err (!%p18114_p7)
}
 0xaf5   :  { %s18126_s18 = smov 128   ;;  %s18127_s19 = smov 8  }
 0xaf6   :  { %17613 = dma.vmem_to_hbm [thread:$0]  %s17608_s21, 256, %s19517_s3, [#allocation3], %s18126_s18, %s18126_s18, %s18127_s19  }
 0xaf7   :  { %18118 = dma.done.wait [#allocation3], 256  }
 0xaf8   :  { %18119 = vsyncadd [#allocation3], 4294967040 }
 0xaf9   :  { %17617 = vsyncpa [#allocation3], 1 }

</bundles_post_ra>
